<compile_context>
chip_gen: v5e
topology: v5e:2x2
jax: 0.10.0
libtpu: 0.0.40
codegen_flags: <defaults>
</compile_context>

<pallas_src>
import functools
import math

import jax
import jax.numpy as jnp
import numpy as np
from jax.experimental import pallas as pl
from jax.experimental.pallas import tpu as pltpu


def _round_up(x, m):
    return (x + m - 1) // m * m


# ---------------------------------------------------------------------------
# Fused Pallas kernel: matmul + bias + (BatchNorm) + activation
# ---------------------------------------------------------------------------
def _fused_matmul_kernel(x_ref, w_ref, b_ref, g_ref, bt_ref, o_ref, *, act, bn, eps):
    k = pl.program_id(1)
    nk = pl.num_programs(1)

    @pl.when(k == 0)
    def _():
        o_ref[...] = jnp.zeros_like(o_ref)

    # bf16 operands, f32 accumulation, accumulate straight into the resident
    # output block (constant block index along the K axis).
    o_ref[...] += jnp.dot(x_ref[...], w_ref[...],
                          preferred_element_type=jnp.float32)

    @pl.when(k == nk - 1)
    def _():
        y = o_ref[...] + b_ref[...]
        if bn:
            # Training-mode batch statistics over all rows (= N*H*W per
            # channel).  Single-pass E[x^2] - mean^2, biased variance like
            # PyTorch's normalization path.
            mean = jnp.mean(y, axis=0, keepdims=True)
            var = jnp.maximum(jnp.mean(y * y, axis=0, keepdims=True) - mean * mean, 0.0)
            y = (y - mean) * jax.lax.rsqrt(var + eps)
            y = y * g_ref[...] + bt_ref[...]
        if act == "leaky":
            y = jnp.where(y >= 0, y, 0.2 * y)
        elif act == "sigmoid":
            y = 1.0 / (1.0 + jnp.exp(-y))
        o_ref[...] = y.astype(o_ref.dtype)


def fused_matmul(x, w, b, gamma=None, beta=None, *, act="none", bn=False,
                 tm=512, tk=2048, eps=1e-5):
    """y = act(BN?(x @ w + b)) on TPU.  x:[M,K] f32, w:[K,N] f32 -> [M,N] f32."""
    M, K = x.shape
    K2, N = w.shape
    assert K == K2

    M_pad = _round_up(M, 8)
    N_pad = _round_up(N, 128)

    if bn:
        # BN statistics need the full row extent resident in one block.
        if M != M_pad:
            raise ValueError("BN-fused layer requires M to be a multiple of 8")
        tm_eff = M_pad
    else:
        tm_eff = min(_round_up(tm, 8), M_pad)
        M_pad = _round_up(M_pad, tm_eff)

    tk_eff = min(_round_up(tk, 128), _round_up(K, 128))
    K_pad = _round_up(K, tk_eff)

    # bf16 operands for the MXU; bias / BN params stay f32 for the epilogue.
    x_p = jnp.pad(x.astype(jnp.bfloat16), ((0, M_pad - M), (0, K_pad - K)))
    w_p = jnp.pad(w.astype(jnp.bfloat16), ((0, K_pad - K), (0, N_pad - N)))

    def _row(v, fill):
        if v is None:
            v = jnp.full((N,), fill, jnp.float32)
        return jnp.pad(v.astype(jnp.float32).reshape(1, -1), ((0, 0), (0, N_pad - N)))

    b_p = _row(b, 0.0)
    g_p = _row(gamma, 1.0)
    bt_p = _row(beta, 0.0)

    out = pl.pallas_call(
        functools.partial(_fused_matmul_kernel, act=act, bn=bn, eps=eps),
        out_shape=jax.ShapeDtypeStruct((M_pad, N_pad), jnp.float32),
        grid_spec=pltpu.PrefetchScalarGridSpec(
            num_scalar_prefetch=0,
            grid=(M_pad // tm_eff, K_pad // tk_eff),
            in_specs=[
                pl.BlockSpec((tm_eff, tk_eff), lambda i, k: (i, k)),
                pl.BlockSpec((tk_eff, N_pad), lambda i, k: (k, 0)),
                pl.BlockSpec((1, N_pad), lambda i, k: (0, 0)),
                pl.BlockSpec((1, N_pad), lambda i, k: (0, 0)),
                pl.BlockSpec((1, N_pad), lambda i, k: (0, 0)),
            ],
            out_specs=pl.BlockSpec((tm_eff, N_pad), lambda i, k: (i, 0)),
        ),
        compiler_params=pltpu.CompilerParams(
            dimension_semantics=("parallel", "arbitrary")),
    )(x_p, w_p, b_p, g_p, bt_p)
    return out[:M, :N]


# ---------------------------------------------------------------------------
# Glue: NHWC im2col (pure index shuffling; the matmul runs in Pallas)
# ---------------------------------------------------------------------------
# TODO(synk): stream the shifted 4x4 windows via manual DMA / custom index maps
# instead of materializing the 16x-expanded patch matrix in HBM.
def im2col_nhwc(x, kh=4, kw=4, stride=2, pad=1):
    B, H, W, C = x.shape
    Ho = (H + 2 * pad - kh) // stride + 1
    Wo = (W + 2 * pad - kw) // stride + 1
    xp = jnp.pad(x, ((0, 0), (pad, pad), (pad, pad), (0, 0)))
    cols = []
    for i in range(kh):
        for j in range(kw):
            cols.append(xp[:, i:i + stride * Ho:stride, j:j + stride * Wo:stride, :])
    patches = jnp.stack(cols, axis=3)                # [B, Ho, Wo, kh*kw, C]
    return patches.reshape(B * Ho * Wo, kh * kw * C), Ho, Wo


def conv_layer(x_nhwc, W, b, gamma=None, beta=None, *, act, bn):
    """Conv2d(k=4,s=2,p=1) [+ BN] + activation; NHWC in, NHWC out."""
    B = x_nhwc.shape[0]
    Cout = W.shape[0]
    patches, Ho, Wo = im2col_nhwc(x_nhwc)
    # Rows ordered (ki, kj, cin) to match the (ki, kj, cin) patch columns.
    w_mat = W.transpose(2, 3, 1, 0).reshape(-1, Cout)
    y = fused_matmul(patches, w_mat, b, gamma, beta, act=act, bn=bn)
    return y.reshape(B, Ho, Wo, Cout)


# ---------------------------------------------------------------------------
# Discriminator forward
# ---------------------------------------------------------------------------
def discriminator_forward(x, p):
    # Single NCHW -> NHWC transpose; everything downstream stays NHWC-flat.
    h = x.transpose(0, 2, 3, 1)

    h = conv_layer(h, p["W1"], p["b1"], act="leaky", bn=False)            # [B,16,16,64]
    h = conv_layer(h, p["W2"], p["b2"], p["g2"], p["bt2"],
                   act="leaky", bn=True)                                  # [B, 8, 8,128]
    h = conv_layer(h, p["W3"], p["b3"], p["g3"], p["bt3"],
                   act="sigmoid", bn=True)                                # [B, 4, 4,256]

    # PyTorch flattens NCHW; compensate by permuting Wl's columns to (h, w, c)
    # order instead of transposing the activations.
    B, Ho, Wo, C = h.shape
    flat = h.reshape(B, Ho * Wo * C)
    wl = p["Wl"].reshape(1, C, Ho, Wo).transpose(0, 2, 3, 1).reshape(1, -1)
    # Tiny GEMV (N=1): plain dot per perf review — a pallas_call here would be
    # pure launch overhead with 127/128 padded lanes.
    return flat @ wl.T + p["bl"]


# ---------------------------------------------------------------------------
# Pure-JAX reference (for correctness check)
# ---------------------------------------------------------------------------
def reference_forward(x, p):
    def conv(h, W, b):
        o = jax.lax.conv_general_dilated(
            h, W, window_strides=(2, 2), padding=((1, 1), (1, 1)),
            dimension_numbers=("NCHW", "OIHW", "NCHW"))
        return o + b.reshape(1, -1, 1, 1)

    def leaky(h):
        return jnp.where(h >= 0, h, 0.2 * h)

    def bn(h, g, bt):
        m = h.mean(axis=(0, 2, 3), keepdims=True)
        v = ((h - m) ** 2).mean(axis=(0, 2, 3), keepdims=True)
        return (h - m) * jax.lax.rsqrt(v + 1e-5) * g.reshape(1, -1, 1, 1) + bt.reshape(1, -1, 1, 1)

    h = leaky(conv(x, p["W1"], p["b1"]))
    h = leaky(bn(conv(h, p["W2"], p["b2"]), p["g2"], p["bt2"]))
    h = jax.nn.sigmoid(bn(conv(h, p["W3"], p["b3"]), p["g3"], p["bt3"]))
    h = h.reshape(h.shape[0], -1)
    return h @ p["Wl"].T + p["bl"]


# ---------------------------------------------------------------------------
# Deterministic parameter init (PyTorch-style uniform(-1/sqrt(fan_in), +))
# ---------------------------------------------------------------------------
def init_params(key, in_channels):
    dims = [in_channels, 64, 128, 256]
    keys = jax.random.split(key, 16)
    p = {}

    def uni(k, shape, fan_in):
        bound = 1.0 / math.sqrt(fan_in)
        return jax.random.uniform(k, shape, jnp.float32, -bound, bound)

    for i in range(3):
        cin, cout = dims[i], dims[i + 1]
        fan_in = cin * 4 * 4
        p[f"W{i+1}"] = uni(keys[2 * i], (cout, cin, 4, 4), fan_in)
        p[f"b{i+1}"] = uni(keys[2 * i + 1], (cout,), fan_in)
    p["g2"] = jnp.ones((128,), jnp.float32)
    p["bt2"] = jnp.zeros((128,), jnp.float32)
    p["g3"] = jnp.ones((256,), jnp.float32)
    p["bt3"] = jnp.zeros((256,), jnp.float32)
    p["Wl"] = uni(keys[10], (1, 256 * 4 * 4), 256 * 4 * 4)
    p["bl"] = uni(keys[11], (1,), 256 * 4 * 4)
    return p


if __name__ == "__main__":
    key = jax.random.PRNGKey(0)
    k_x, k_p = jax.random.split(key)

    in_channels = 3
    batch = 2
    # ratio=32 -> network expects 32x32 spatial input so the head sees 256*4*4.
    x = jax.random.normal(k_x, (batch, in_channels, 32, 32), jnp.float32)
    params = init_params(k_p, in_channels)

    fwd = jax.jit(discriminator_forward)
    out = jax.block_until_ready(fwd(x, params))
    assert out.shape == (batch, 1), out.shape

    ref = jax.block_until_ready(reference_forward(x, params))
    np.testing.assert_allclose(np.asarray(out), np.asarray(ref), rtol=2e-2, atol=2e-2)

    print("KERNEL_OK")
</pallas_src>

<mosaic_0001>
module attributes {stable_mosaic.version = 11 : i64} {
  func.func @_fused_matmul_kernel(%arg0: i32, %arg1: i32, %arg2: memref<512x128xbf16, #tpu.memory_space<vmem>>, %arg3: memref<128x128xbf16, #tpu.memory_space<vmem>>, %arg4: memref<1x128xf32, #tpu.memory_space<vmem>>, %arg5: memref<1x128xf32, #tpu.memory_space<vmem>>, %arg6: memref<1x128xf32, #tpu.memory_space<vmem>>, %arg7: memref<512x128xf32, #tpu.memory_space<vmem>>) attributes {dimension_semantics = [#tpu.dimension_semantics<parallel>, #tpu.dimension_semantics<arbitrary>], iteration_bounds = array<i64: 1, 1>, scalar_prefetch = 0 : i64, scratch_operands = 0 : i64, tpu.core_type = #tpu.core_type<tc>, window_params = [{transform_indices = @transform_0, window_bounds = array<i64: 512, 128>}, {transform_indices = @transform_1, window_bounds = array<i64: 128, 128>}, {pipeline_mode = #tpu.pipeline_mode<synchronous>, transform_indices = @transform_2, window_bounds = array<i64: 1, 128>}, {pipeline_mode = #tpu.pipeline_mode<synchronous>, transform_indices = @transform_3, window_bounds = array<i64: 1, 128>}, {pipeline_mode = #tpu.pipeline_mode<synchronous>, transform_indices = @transform_4, window_bounds = array<i64: 1, 128>}, {transform_indices = @transform_5, window_bounds = array<i64: 512, 128>}]} {
    %c0_i32 = arith.constant 0 : i32
    %0 = arith.cmpi eq, %arg1, %c0_i32 : i32
    %1 = arith.extui %0 : i1 to i32
    %c0_i32_0 = arith.constant 0 : i32
    %2 = arith.cmpi ne, %1, %c0_i32_0 : i32
    scf.if %2 {
      %cst_10 = arith.constant 0.000000e+00 : f32
      %12 = vector.broadcast %cst_10 : f32 to vector<512x128xf32>
      %c0_11 = arith.constant 0 : index
      %c0_12 = arith.constant 0 : index
      %13 = vector.load %arg7[%c0_11, %c0_12] : memref<512x128xf32, #tpu.memory_space<vmem>>, vector<512x128xf32>
      tpu.vector_store %arg7[%c0_11, %c0_12], %12 {strides = array<i32>} : memref<512x128xf32, #tpu.memory_space<vmem>>, vector<512x128xf32>,
    } else {
    }
    %c0 = arith.constant 0 : index
    %c0_1 = arith.constant 0 : index
    %3 = vector.load %arg7[%c0, %c0_1] : memref<512x128xf32, #tpu.memory_space<vmem>>, vector<512x128xf32>
    %c0_2 = arith.constant 0 : index
    %c0_3 = arith.constant 0 : index
    %4 = vector.load %arg2[%c0_2, %c0_3] : memref<512x128xbf16, #tpu.memory_space<vmem>>, vector<512x128xbf16>
    %c0_4 = arith.constant 0 : index
    %c0_5 = arith.constant 0 : index
    %5 = vector.load %arg3[%c0_4, %c0_5] : memref<128x128xbf16, #tpu.memory_space<vmem>>, vector<128x128xbf16>
    %cst = arith.constant dense<0.000000e+00> : vector<512x128xf32>
    %6 = tpu.matmul %4, %5, %cst {dimension_numbers = #tpu.dot_dimension_numbers<[1], [0], [0], [1], [0, 0, 1, 1], [], []>} : vector<512x128xbf16>, vector<128x128xbf16>, vector<512x128xf32> -> vector<512x128xf32>
    %7 = arith.addf %3, %6 : vector<512x128xf32>
    %c0_6 = arith.constant 0 : index
    %c0_7 = arith.constant 0 : index
    %8 = vector.load %arg7[%c0_6, %c0_7] : memref<512x128xf32, #tpu.memory_space<vmem>>, vector<512x128xf32>
    tpu.vector_store %arg7[%c0_6, %c0_7], %7 {strides = array<i32>} : memref<512x128xf32, #tpu.memory_space<vmem>>, vector<512x128xf32>,
    %c0_i32_8 = arith.constant 0 : i32
    %9 = arith.cmpi eq, %arg1, %c0_i32_8 : i32
    %10 = arith.extui %9 : i1 to i32
    %c0_i32_9 = arith.constant 0 : i32
    %11 = arith.cmpi ne, %10, %c0_i32_9 : i32
    scf.if %11 {
      %c0_10 = arith.constant 0 : index
      %c0_11 = arith.constant 0 : index
      %12 = vector.load %arg7[%c0_10, %c0_11] : memref<512x128xf32, #tpu.memory_space<vmem>>, vector<512x128xf32>
      %c0_12 = arith.constant 0 : index
      %c0_13 = arith.constant 0 : index
      %13 = vector.load %arg4[%c0_12, %c0_13] : memref<1x128xf32, #tpu.memory_space<vmem>>, vector<1x128xf32>
      %14 = vector.broadcast %13 : vector<1x128xf32> to vector<512x128xf32>
      %15 = arith.addf %12, %14 : vector<512x128xf32>
      %cst_14 = arith.constant 0.000000e+00 : f32
      %16 = vector.broadcast %cst_14 : f32 to vector<512x128xf32>
      %17 = arith.cmpf oge, %15, %16 : vector<512x128xf32>
      %cst_15 = arith.constant 2.000000e-01 : f32
      %18 = vector.broadcast %cst_15 : f32 to vector<512x128xf32>
      %19 = arith.mulf %18, %15 : vector<512x128xf32>
      %20 = arith.select %17, %15, %19 : vector<512x128xi1>, vector<512x128xf32>
      %c0_16 = arith.constant 0 : index
      %c0_17 = arith.constant 0 : index
      %21 = vector.load %arg7[%c0_16, %c0_17] : memref<512x128xf32, #tpu.memory_space<vmem>>, vector<512x128xf32>
      tpu.vector_store %arg7[%c0_16, %c0_17], %20 {strides = array<i32>} : memref<512x128xf32, #tpu.memory_space<vmem>>, vector<512x128xf32>,
    } else {
    }
    return
  }
  func.func @transform_0(%arg0: i32, %arg1: i32) -> (i32, i32) {
    %c0_i32 = arith.constant 0 : i32
    return %arg0, %arg1 : i32, i32
  }
  func.func @transform_1(%arg0: i32, %arg1: i32) -> (i32, i32) {
    %c0_i32 = arith.constant 0 : i32
    %c0_i32_0 = arith.constant 0 : i32
    return %arg1, %c0_i32 : i32, i32
  }
  func.func @transform_2(%arg0: i32, %arg1: i32) -> (i32, i32) {
    %c0_i32 = arith.constant 0 : i32
    %c0_i32_0 = arith.constant 0 : i32
    %c0_i32_1 = arith.constant 0 : i32
    return %c0_i32, %c0_i32_0 : i32, i32
  }
  func.func @transform_3(%arg0: i32, %arg1: i32) -> (i32, i32) {
    %c0_i32 = arith.constant 0 : i32
    %c0_i32_0 = arith.constant 0 : i32
    %c0_i32_1 = arith.constant 0 : i32
    return %c0_i32, %c0_i32_0 : i32, i32
  }
  func.func @transform_4(%arg0: i32, %arg1: i32) -> (i32, i32) {
    %c0_i32 = arith.constant 0 : i32
    %c0_i32_0 = arith.constant 0 : i32
    %c0_i32_1 = arith.constant 0 : i32
    return %c0_i32, %c0_i32_0 : i32, i32
  }
  func.func @transform_5(%arg0: i32, %arg1: i32) -> (i32, i32) {
    %c0_i32 = arith.constant 0 : i32
    %c0_i32_0 = arith.constant 0 : i32
    return %arg0, %c0_i32 : i32, i32
  }
}

module attributes {stable_mosaic.version = 11 : i64} {
  func.func @_fused_matmul_kernel(%arg0: i32, %arg1: i32, %arg2: memref<128x1024xbf16, #tpu.memory_space<vmem>>, %arg3: memref<1024x128xbf16, #tpu.memory_space<vmem>>, %arg4: memref<1x128xf32, #tpu.memory_space<vmem>>, %arg5: memref<1x128xf32, #tpu.memory_space<vmem>>, %arg6: memref<1x128xf32, #tpu.memory_space<vmem>>, %arg7: memref<128x128xf32, #tpu.memory_space<vmem>>) attributes {dimension_semantics = [#tpu.dimension_semantics<parallel>, #tpu.dimension_semantics<arbitrary>], iteration_bounds = array<i64: 1, 1>, scalar_prefetch = 0 : i64, scratch_operands = 0 : i64, tpu.core_type = #tpu.core_type<tc>, window_params = [{transform_indices = @transform_0, window_bounds = array<i64: 128, 1024>}, {transform_indices = @transform_1, window_bounds = array<i64: 1024, 128>}, {pipeline_mode = #tpu.pipeline_mode<synchronous>, transform_indices = @transform_2, window_bounds = array<i64: 1, 128>}, {pipeline_mode = #tpu.pipeline_mode<synchronous>, transform_indices = @transform_3, window_bounds = array<i64: 1, 128>}, {pipeline_mode = #tpu.pipeline_mode<synchronous>, transform_indices = @transform_4, window_bounds = array<i64: 1, 128>}, {transform_indices = @transform_5, window_bounds = array<i64: 128, 128>}]} {
    %c0_i32 = arith.constant 0 : i32
    %0 = arith.cmpi eq, %arg1, %c0_i32 : i32
    %1 = arith.extui %0 : i1 to i32
    %c0_i32_0 = arith.constant 0 : i32
    %2 = arith.cmpi ne, %1, %c0_i32_0 : i32
    scf.if %2 {
      %cst_10 = arith.constant 0.000000e+00 : f32
      %12 = vector.broadcast %cst_10 : f32 to vector<128x128xf32>
      %c0_11 = arith.constant 0 : index
      %c0_12 = arith.constant 0 : index
      %13 = vector.load %arg7[%c0_11, %c0_12] : memref<128x128xf32, #tpu.memory_space<vmem>>, vector<128x128xf32>
      tpu.vector_store %arg7[%c0_11, %c0_12], %12 {strides = array<i32>} : memref<128x128xf32, #tpu.memory_space<vmem>>, vector<128x128xf32>,
    } else {
    }
    %c0 = arith.constant 0 : index
    %c0_1 = arith.constant 0 : index
    %3 = vector.load %arg7[%c0, %c0_1] : memref<128x128xf32, #tpu.memory_space<vmem>>, vector<128x128xf32>
    %c0_2 = arith.constant 0 : index
    %c0_3 = arith.constant 0 : index
    %4 = vector.load %arg2[%c0_2, %c0_3] : memref<128x1024xbf16, #tpu.memory_space<vmem>>, vector<128x1024xbf16>
    %c0_4 = arith.constant 0 : index
    %c0_5 = arith.constant 0 : index
    %5 = vector.load %arg3[%c0_4, %c0_5] : memref<1024x128xbf16, #tpu.memory_space<vmem>>, vector<1024x128xbf16>
    %cst = arith.constant dense<0.000000e+00> : vector<128x128xf32>
    %6 = tpu.matmul %4, %5, %cst {dimension_numbers = #tpu.dot_dimension_numbers<[1], [0], [0], [1], [0, 0, 1, 1], [], []>} : vector<128x1024xbf16>, vector<1024x128xbf16>, vector<128x128xf32> -> vector<128x128xf32>
    %7 = arith.addf %3, %6 : vector<128x128xf32>
    %c0_6 = arith.constant 0 : index
    %c0_7 = arith.constant 0 : index
    %8 = vector.load %arg7[%c0_6, %c0_7] : memref<128x128xf32, #tpu.memory_space<vmem>>, vector<128x128xf32>
    tpu.vector_store %arg7[%c0_6, %c0_7], %7 {strides = array<i32>} : memref<128x128xf32, #tpu.memory_space<vmem>>, vector<128x128xf32>,
    %c0_i32_8 = arith.constant 0 : i32
    %9 = arith.cmpi eq, %arg1, %c0_i32_8 : i32
    %10 = arith.extui %9 : i1 to i32
    %c0_i32_9 = arith.constant 0 : i32
    %11 = arith.cmpi ne, %10, %c0_i32_9 : i32
    scf.if %11 {
      %c0_10 = arith.constant 0 : index
      %c0_11 = arith.constant 0 : index
      %12 = vector.load %arg7[%c0_10, %c0_11] : memref<128x128xf32, #tpu.memory_space<vmem>>, vector<128x128xf32>
      %c0_12 = arith.constant 0 : index
      %c0_13 = arith.constant 0 : index
      %13 = vector.load %arg4[%c0_12, %c0_13] : memref<1x128xf32, #tpu.memory_space<vmem>>, vector<1x128xf32>
      %14 = vector.broadcast %13 : vector<1x128xf32> to vector<128x128xf32>
      %15 = arith.addf %12, %14 : vector<128x128xf32>
      %cst_14 = arith.constant dense<0.000000e+00> : vector<128xf32>
      %16 = vector.multi_reduction <add>, %15, %cst_14 [0] : vector<128x128xf32> to vector<128xf32>
      %17 = vector.shape_cast %16 : vector<128xf32> to vector<1x128xf32>
      %cst_15 = arith.constant 1.280000e+02 : f32
      %18 = vector.broadcast %cst_15 : f32 to vector<1x128xf32>
      %19 = arith.divf %17, %18 : vector<1x128xf32>
      %20 = arith.mulf %15, %15 : vector<128x128xf32>
      %cst_16 = arith.constant dense<0.000000e+00> : vector<128xf32>
      %21 = vector.multi_reduction <add>, %20, %cst_16 [0] : vector<128x128xf32> to vector<128xf32>
      %22 = vector.shape_cast %21 : vector<128xf32> to vector<1x128xf32>
      %cst_17 = arith.constant 1.280000e+02 : f32
      %23 = vector.broadcast %cst_17 : f32 to vector<1x128xf32>
      %24 = arith.divf %22, %23 : vector<1x128xf32>
      %25 = arith.mulf %19, %19 : vector<1x128xf32>
      %26 = arith.subf %24, %25 : vector<1x128xf32>
      %cst_18 = arith.constant 0.000000e+00 : f32
      %27 = vector.broadcast %cst_18 : f32 to vector<1x128xf32>
      %28 = arith.maximumf %26, %27 : vector<1x128xf32>
      %29 = vector.broadcast %19 : vector<1x128xf32> to vector<128x128xf32>
      %30 = arith.subf %15, %29 : vector<128x128xf32>
      %cst_19 = arith.constant 9.99999974E-6 : f32
      %31 = vector.broadcast %cst_19 : f32 to vector<1x128xf32>
      %32 = arith.addf %28, %31 : vector<1x128xf32>
      %33 = math.rsqrt %32 : vector<1x128xf32>
      %34 = vector.broadcast %33 : vector<1x128xf32> to vector<128x128xf32>
      %35 = arith.mulf %30, %34 : vector<128x128xf32>
      %c0_20 = arith.constant 0 : index
      %c0_21 = arith.constant 0 : index
      %36 = vector.load %arg5[%c0_20, %c0_21] : memref<1x128xf32, #tpu.memory_space<vmem>>, vector<1x128xf32>
      %37 = vector.broadcast %36 : vector<1x128xf32> to vector<128x128xf32>
      %38 = arith.mulf %35, %37 : vector<128x128xf32>
      %c0_22 = arith.constant 0 : index
      %c0_23 = arith.constant 0 : index
      %39 = vector.load %arg6[%c0_22, %c0_23] : memref<1x128xf32, #tpu.memory_space<vmem>>, vector<1x128xf32>
      %40 = vector.broadcast %39 : vector<1x128xf32> to vector<128x128xf32>
      %41 = arith.addf %38, %40 : vector<128x128xf32>
      %cst_24 = arith.constant 0.000000e+00 : f32
      %42 = vector.broadcast %cst_24 : f32 to vector<128x128xf32>
      %43 = arith.cmpf oge, %41, %42 : vector<128x128xf32>
      %cst_25 = arith.constant 2.000000e-01 : f32
      %44 = vector.broadcast %cst_25 : f32 to vector<128x128xf32>
      %45 = arith.mulf %44, %41 : vector<128x128xf32>
      %46 = arith.select %43, %41, %45 : vector<128x128xi1>, vector<128x128xf32>
      %c0_26 = arith.constant 0 : index
      %c0_27 = arith.constant 0 : index
      %47 = vector.load %arg7[%c0_26, %c0_27] : memref<128x128xf32, #tpu.memory_space<vmem>>, vector<128x128xf32>
      tpu.vector_store %arg7[%c0_26, %c0_27], %46 {strides = array<i32>} : memref<128x128xf32, #tpu.memory_space<vmem>>, vector<128x128xf32>,
    } else {
    }
    return
  }
  func.func @transform_0(%arg0: i32, %arg1: i32) -> (i32, i32) {
    %c0_i32 = arith.constant 0 : i32
    return %arg0, %arg1 : i32, i32
  }
  func.func @transform_1(%arg0: i32, %arg1: i32) -> (i32, i32) {
    %c0_i32 = arith.constant 0 : i32
    %c0_i32_0 = arith.constant 0 : i32
    return %arg1, %c0_i32 : i32, i32
  }
  func.func @transform_2(%arg0: i32, %arg1: i32) -> (i32, i32) {
    %c0_i32 = arith.constant 0 : i32
    %c0_i32_0 = arith.constant 0 : i32
    %c0_i32_1 = arith.constant 0 : i32
    return %c0_i32, %c0_i32_0 : i32, i32
  }
  func.func @transform_3(%arg0: i32, %arg1: i32) -> (i32, i32) {
    %c0_i32 = arith.constant 0 : i32
    %c0_i32_0 = arith.constant 0 : i32
    %c0_i32_1 = arith.constant 0 : i32
    return %c0_i32, %c0_i32_0 : i32, i32
  }
  func.func @transform_4(%arg0: i32, %arg1: i32) -> (i32, i32) {
    %c0_i32 = arith.constant 0 : i32
    %c0_i32_0 = arith.constant 0 : i32
    %c0_i32_1 = arith.constant 0 : i32
    return %c0_i32, %c0_i32_0 : i32, i32
  }
  func.func @transform_5(%arg0: i32, %arg1: i32) -> (i32, i32) {
    %c0_i32 = arith.constant 0 : i32
    %c0_i32_0 = arith.constant 0 : i32
    return %arg0, %c0_i32 : i32, i32
  }
}

module attributes {stable_mosaic.version = 11 : i64} {
  func.func @_fused_matmul_kernel(%arg0: i32, %arg1: i32, %arg2: memref<32x2048xbf16, #tpu.memory_space<vmem>>, %arg3: memref<2048x256xbf16, #tpu.memory_space<vmem>>, %arg4: memref<1x256xf32, #tpu.memory_space<vmem>>, %arg5: memref<1x256xf32, #tpu.memory_space<vmem>>, %arg6: memref<1x256xf32, #tpu.memory_space<vmem>>, %arg7: memref<32x256xf32, #tpu.memory_space<vmem>>) attributes {dimension_semantics = [#tpu.dimension_semantics<parallel>, #tpu.dimension_semantics<arbitrary>], iteration_bounds = array<i64: 1, 1>, scalar_prefetch = 0 : i64, scratch_operands = 0 : i64, tpu.core_type = #tpu.core_type<tc>, window_params = [{transform_indices = @transform_0, window_bounds = array<i64: 32, 2048>}, {transform_indices = @transform_1, window_bounds = array<i64: 2048, 256>}, {pipeline_mode = #tpu.pipeline_mode<synchronous>, transform_indices = @transform_2, window_bounds = array<i64: 1, 256>}, {pipeline_mode = #tpu.pipeline_mode<synchronous>, transform_indices = @transform_3, window_bounds = array<i64: 1, 256>}, {pipeline_mode = #tpu.pipeline_mode<synchronous>, transform_indices = @transform_4, window_bounds = array<i64: 1, 256>}, {transform_indices = @transform_5, window_bounds = array<i64: 32, 256>}]} {
    %c0_i32 = arith.constant 0 : i32
    %0 = arith.cmpi eq, %arg1, %c0_i32 : i32
    %1 = arith.extui %0 : i1 to i32
    %c0_i32_0 = arith.constant 0 : i32
    %2 = arith.cmpi ne, %1, %c0_i32_0 : i32
    scf.if %2 {
      %cst_10 = arith.constant 0.000000e+00 : f32
      %12 = vector.broadcast %cst_10 : f32 to vector<32x256xf32>
      %c0_11 = arith.constant 0 : index
      %c0_12 = arith.constant 0 : index
      %13 = vector.load %arg7[%c0_11, %c0_12] : memref<32x256xf32, #tpu.memory_space<vmem>>, vector<32x256xf32>
      tpu.vector_store %arg7[%c0_11, %c0_12], %12 {strides = array<i32>} : memref<32x256xf32, #tpu.memory_space<vmem>>, vector<32x256xf32>,
    } else {
    }
    %c0 = arith.constant 0 : index
    %c0_1 = arith.constant 0 : index
    %3 = vector.load %arg7[%c0, %c0_1] : memref<32x256xf32, #tpu.memory_space<vmem>>, vector<32x256xf32>
    %c0_2 = arith.constant 0 : index
    %c0_3 = arith.constant 0 : index
    %4 = vector.load %arg2[%c0_2, %c0_3] : memref<32x2048xbf16, #tpu.memory_space<vmem>>, vector<32x2048xbf16>
    %c0_4 = arith.constant 0 : index
    %c0_5 = arith.constant 0 : index
    %5 = vector.load %arg3[%c0_4, %c0_5] : memref<2048x256xbf16, #tpu.memory_space<vmem>>, vector<2048x256xbf16>
    %cst = arith.constant dense<0.000000e+00> : vector<32x256xf32>
    %6 = tpu.matmul %4, %5, %cst {dimension_numbers = #tpu.dot_dimension_numbers<[1], [0], [0], [1], [0, 0, 1, 1], [], []>} : vector<32x2048xbf16>, vector<2048x256xbf16>, vector<32x256xf32> -> vector<32x256xf32>
    %7 = arith.addf %3, %6 : vector<32x256xf32>
    %c0_6 = arith.constant 0 : index
    %c0_7 = arith.constant 0 : index
    %8 = vector.load %arg7[%c0_6, %c0_7] : memref<32x256xf32, #tpu.memory_space<vmem>>, vector<32x256xf32>
    tpu.vector_store %arg7[%c0_6, %c0_7], %7 {strides = array<i32>} : memref<32x256xf32, #tpu.memory_space<vmem>>, vector<32x256xf32>,
    %c0_i32_8 = arith.constant 0 : i32
    %9 = arith.cmpi eq, %arg1, %c0_i32_8 : i32
    %10 = arith.extui %9 : i1 to i32
    %c0_i32_9 = arith.constant 0 : i32
    %11 = arith.cmpi ne, %10, %c0_i32_9 : i32
    scf.if %11 {
      %c0_10 = arith.constant 0 : index
      %c0_11 = arith.constant 0 : index
      %12 = vector.load %arg7[%c0_10, %c0_11] : memref<32x256xf32, #tpu.memory_space<vmem>>, vector<32x256xf32>
      %c0_12 = arith.constant 0 : index
      %c0_13 = arith.constant 0 : index
      %13 = vector.load %arg4[%c0_12, %c0_13] : memref<1x256xf32, #tpu.memory_space<vmem>>, vector<1x256xf32>
      %14 = vector.broadcast %13 : vector<1x256xf32> to vector<32x256xf32>
      %15 = arith.addf %12, %14 : vector<32x256xf32>
      %cst_14 = arith.constant dense<0.000000e+00> : vector<256xf32>
      %16 = vector.multi_reduction <add>, %15, %cst_14 [0] : vector<32x256xf32> to vector<256xf32>
      %17 = vector.shape_cast %16 : vector<256xf32> to vector<1x256xf32>
      %cst_15 = arith.constant 3.200000e+01 : f32
      %18 = vector.broadcast %cst_15 : f32 to vector<1x256xf32>
      %19 = arith.divf %17, %18 : vector<1x256xf32>
      %20 = arith.mulf %15, %15 : vector<32x256xf32>
      %cst_16 = arith.constant dense<0.000000e+00> : vector<256xf32>
      %21 = vector.multi_reduction <add>, %20, %cst_16 [0] : vector<32x256xf32> to vector<256xf32>
      %22 = vector.shape_cast %21 : vector<256xf32> to vector<1x256xf32>
      %cst_17 = arith.constant 3.200000e+01 : f32
      %23 = vector.broadcast %cst_17 : f32 to vector<1x256xf32>
      %24 = arith.divf %22, %23 : vector<1x256xf32>
      %25 = arith.mulf %19, %19 : vector<1x256xf32>
      %26 = arith.subf %24, %25 : vector<1x256xf32>
      %cst_18 = arith.constant 0.000000e+00 : f32
      %27 = vector.broadcast %cst_18 : f32 to vector<1x256xf32>
      %28 = arith.maximumf %26, %27 : vector<1x256xf32>
      %29 = vector.broadcast %19 : vector<1x256xf32> to vector<32x256xf32>
      %30 = arith.subf %15, %29 : vector<32x256xf32>
      %cst_19 = arith.constant 9.99999974E-6 : f32
      %31 = vector.broadcast %cst_19 : f32 to vector<1x256xf32>
      %32 = arith.addf %28, %31 : vector<1x256xf32>
      %33 = math.rsqrt %32 : vector<1x256xf32>
      %34 = vector.broadcast %33 : vector<1x256xf32> to vector<32x256xf32>
      %35 = arith.mulf %30, %34 : vector<32x256xf32>
      %c0_20 = arith.constant 0 : index
      %c0_21 = arith.constant 0 : index
      %36 = vector.load %arg5[%c0_20, %c0_21] : memref<1x256xf32, #tpu.memory_space<vmem>>, vector<1x256xf32>
      %37 = vector.broadcast %36 : vector<1x256xf32> to vector<32x256xf32>
      %38 = arith.mulf %35, %37 : vector<32x256xf32>
      %c0_22 = arith.constant 0 : index
      %c0_23 = arith.constant 0 : index
      %39 = vector.load %arg6[%c0_22, %c0_23] : memref<1x256xf32, #tpu.memory_space<vmem>>, vector<1x256xf32>
      %40 = vector.broadcast %39 : vector<1x256xf32> to vector<32x256xf32>
      %41 = arith.addf %38, %40 : vector<32x256xf32>
      %cst_24 = arith.constant 0.000000e+00 : f32
      %42 = vector.broadcast %cst_24 : f32 to vector<32x256xf32>
      %43 = arith.subf %42, %41 : vector<32x256xf32>
      %44 = math.exp %43 : vector<32x256xf32>
      %cst_25 = arith.constant 1.000000e+00 : f32
      %45 = vector.broadcast %cst_25 : f32 to vector<32x256xf32>
      %46 = arith.addf %45, %44 : vector<32x256xf32>
      %cst_26 = arith.constant 1.000000e+00 : f32
      %47 = vector.broadcast %cst_26 : f32 to vector<32x256xf32>
      %48 = arith.divf %47, %46 : vector<32x256xf32>
      %c0_27 = arith.constant 0 : index
      %c0_28 = arith.constant 0 : index
      %49 = vector.load %arg7[%c0_27, %c0_28] : memref<32x256xf32, #tpu.memory_space<vmem>>, vector<32x256xf32>
      tpu.vector_store %arg7[%c0_27, %c0_28], %48 {strides = array<i32>} : memref<32x256xf32, #tpu.memory_space<vmem>>, vector<32x256xf32>,
    } else {
    }
    return
  }
  func.func @transform_0(%arg0: i32, %arg1: i32) -> (i32, i32) {
    %c0_i32 = arith.constant 0 : i32
    return %arg0, %arg1 : i32, i32
  }
  func.func @transform_1(%arg0: i32, %arg1: i32) -> (i32, i32) {
    %c0_i32 = arith.constant 0 : i32
    %c0_i32_0 = arith.constant 0 : i32
    return %arg1, %c0_i32 : i32, i32
  }
  func.func @transform_2(%arg0: i32, %arg1: i32) -> (i32, i32) {
    %c0_i32 = arith.constant 0 : i32
    %c0_i32_0 = arith.constant 0 : i32
    %c0_i32_1 = arith.constant 0 : i32
    return %c0_i32, %c0_i32_0 : i32, i32
  }
  func.func @transform_3(%arg0: i32, %arg1: i32) -> (i32, i32) {
    %c0_i32 = arith.constant 0 : i32
    %c0_i32_0 = arith.constant 0 : i32
    %c0_i32_1 = arith.constant 0 : i32
    return %c0_i32, %c0_i32_0 : i32, i32
  }
  func.func @transform_4(%arg0: i32, %arg1: i32) -> (i32, i32) {
    %c0_i32 = arith.constant 0 : i32
    %c0_i32_0 = arith.constant 0 : i32
    %c0_i32_1 = arith.constant 0 : i32
    return %c0_i32, %c0_i32_0 : i32, i32
  }
  func.func @transform_5(%arg0: i32, %arg1: i32) -> (i32, i32) {
    %c0_i32 = arith.constant 0 : i32
    %c0_i32_0 = arith.constant 0 : i32
    return %arg0, %c0_i32 : i32, i32
  }
}

</mosaic_0001>

<bundles_post_ra>
// kernel: discriminator_forward.3
= control target key start
LH: loop header
LB: loop body
LE: loop exit
PB: predicated region body
PF: predicated region fallthrough
CT: control target
= control target key end

     0   :  { %s1801_s1 = inlined_call_operand.vmem [shape: bf16[128,128], index: 1, kind: input, shape index: {}]   ;;  %s1802_s3 = inlined_call_operand.vmem [shape: f32[1,128], index: 3, kind: input, shape index: {}]   ;;  %s1803_s4 = inlined_call_operand.vmem [shape: f32[1,128], index: 4, kind: input, shape index: {}]   ;;  %s1804_s2 = inlined_call_operand.vmem [shape: f32[1,128], index: 2, kind: input, shape index: {}]   ;;  %s1805_s0 = inlined_call_operand.vmem [shape: bf16[512,128], index: 0, kind: input, shape index: {}]   ;;  %s1806_s5 = inlined_call_operand.vmem [shape: f32[512,128], index: 5, kind: output, shape index: {}]  }
   0x1   :  { %v1363_v0 = vld [vmem:[%s1801_s1 + $0x38] sm:$0xff]  ;;  %v1362_v1 = vld [vmem:[%s1801_s1 + $0x30] sm:$0xff]  ;;  %v1361_v2 = vld [vmem:[%s1801_s1 + $0x28] sm:$0xff] }
   0x2   :  { %472 = vmatpush.bf16.msra.mxu0 %v1363_v0  ;;  %1364 = vmatpush.bf16.msra.mxu1 %v1363_v0  ;;  %v1360_v3 = vld [vmem:[%s1801_s1 + $0x20] sm:$0xff]  ;;  %v1359_v4 = vld [vmem:[%s1801_s1 + $0x18] sm:$0xff]  ;;  %v1358_v5 = vld [vmem:[%s1801_s1 + $0x10] sm:$0xff] }
   0x3   :  { %1365 = vmatpush.bf16.msra.mxu2 %v1363_v0  ;;  %1366 = vmatpush.bf16.msra.mxu3 %v1363_v0  ;;  %v1357_v6 = vld [vmem:[%s1801_s1 + $0x8] sm:$0xff]  ;;  %v1356_v7 = vld [vmem:[%s1801_s1] sm:$0xff]  ;;  %v1326_v16 = vld [vmem:[%s1805_s0 + $0x10] sm:$0xff] }
   0x4   :  { %v1324_v8 = vld [vmem:[%s1805_s0] sm:$0xff]  ;;  %v1325_v12 = vld [vmem:[%s1805_s0 + $0x8] sm:$0xff]  ;;  %v1334_v17 = vld [vmem:[%s1805_s0 + $0x50] sm:$0xff] }
   0x5   :  { %v1332_v9 = vld [vmem:[%s1805_s0 + $0x40] sm:$0xff]  ;;  %v1333_v13 = vld [vmem:[%s1805_s0 + $0x48] sm:$0xff]  ;;  %v1342_v18 = vld [vmem:[%s1805_s0 + $0x90] sm:$0xff] }
   0x6   :  { %473 = vmatpush.bf16.msra.mxu0 %v1362_v1  ;;  %1367 = vmatpush.bf16.msra.mxu1 %v1362_v1  ;;  %v1340_v10 = vld [vmem:[%s1805_s0 + $0x80] sm:$0xff]  ;;  %v1341_v14 = vld [vmem:[%s1805_s0 + $0x88] sm:$0xff]  ;;  %v1350_v19 = vld [vmem:[%s1805_s0 + $0xd0] sm:$0xff] }
   0x7   :  { %1368 = vmatpush.bf16.msra.mxu2 %v1362_v1  ;;  %1369 = vmatpush.bf16.msra.mxu3 %v1362_v1  ;;  %v1348_v11 = vld [vmem:[%s1805_s0 + $0xc0] sm:$0xff]  ;;  %v1349_v15 = vld [vmem:[%s1805_s0 + $0xc8] sm:$0xff]  ;;  %v1327_v20 = vld [vmem:[%s1805_s0 + $0x18] sm:$0xff] }
   0x8   :  { %v1335_v21 = vld [vmem:[%s1805_s0 + $0x58] sm:$0xff]  ;;  %v1328_v24 = vld [vmem:[%s1805_s0 + $0x20] sm:$0xff]  ;;  %v1329_v28 = vld [vmem:[%s1805_s0 + $0x28] sm:$0xff] }
   0x9   :  { %v1343_v22 = vld [vmem:[%s1805_s0 + $0x98] sm:$0xff]  ;;  %v1336_v25 = vld [vmem:[%s1805_s0 + $0x60] sm:$0xff]  ;;  %v1337_v29 = vld [vmem:[%s1805_s0 + $0x68] sm:$0xff] }
   0xa   :  { %474 = vmatpush.bf16.msra.mxu0 %v1361_v2  ;;  %1370 = vmatpush.bf16.msra.mxu1 %v1361_v2  ;;  %v1351_v23 = vld [vmem:[%s1805_s0 + $0xd8] sm:$0xff]  ;;  %v1344_v26 = vld [vmem:[%s1805_s0 + $0xa0] sm:$0xff]  ;;  %v1345_v30 = vld [vmem:[%s1805_s0 + $0xa8] sm:$0xff] }
   0xb   :  { %1371 = vmatpush.bf16.msra.mxu2 %v1361_v2  ;;  %1372 = vmatpush.bf16.msra.mxu3 %v1361_v2  ;;  %v1352_v27 = vld [vmem:[%s1805_s0 + $0xe0] sm:$0xff]  ;;  %v1353_v31 = vld [vmem:[%s1805_s0 + $0xe8] sm:$0xff]  ;;  %v1330_v32 = vld [vmem:[%s1805_s0 + $0x30] sm:$0xff] }
   0xc   :  { %v1338_v33 = vld [vmem:[%s1805_s0 + $0x70] sm:$0xff]  ;;  %v1331_v36 = vld [vmem:[%s1805_s0 + $0x38] sm:$0xff]  ;;  %v1543_v40 = vld [vmem:[%s1804_s2] ss:$0 sm:$0xff] }
   0xd   :  { %v1346_v34 = vld [vmem:[%s1805_s0 + $0xb0] sm:$0xff]  ;;  %v1339_v37 = vld [vmem:[%s1805_s0 + $0x78] sm:$0xff] }
   0xe   :  { %475 = vmatpush.bf16.msra.mxu0 %v1360_v3  ;;  %1373 = vmatpush.bf16.msra.mxu1 %v1360_v3  ;;  %v1354_v35 = vld [vmem:[%s1805_s0 + $0xf0] sm:$0xff]  ;;  %v1347_v38 = vld [vmem:[%s1805_s0 + $0xb8] sm:$0xff] }
   0xf   :  { %1374 = vmatpush.bf16.msra.mxu2 %v1360_v3  ;;  %1375 = vmatpush.bf16.msra.mxu3 %v1360_v3  ;;  %v1355_v39 = vld [vmem:[%s1805_s0 + $0xf8] sm:$0xff] }
  0x12   :  { %476 = vmatpush.bf16.msra.mxu0 %v1359_v4  ;;  %1376 = vmatpush.bf16.msra.mxu1 %v1359_v4 }
  0x13   :  { %1377 = vmatpush.bf16.msra.mxu2 %v1359_v4  ;;  %1378 = vmatpush.bf16.msra.mxu3 %v1359_v4 }
  0x16   :  { %477 = vmatpush.bf16.msra.mxu0 %v1358_v5  ;;  %1379 = vmatpush.bf16.msra.mxu1 %v1358_v5 }
  0x17   :  { %1380 = vmatpush.bf16.msra.mxu2 %v1358_v5  ;;  %1381 = vmatpush.bf16.msra.mxu3 %v1358_v5 }
  0x1a   :  { %478 = vmatpush.bf16.msra.mxu0 %v1357_v6  ;;  %1382 = vmatpush.bf16.msra.mxu1 %v1357_v6 }
  0x1b   :  { %1383 = vmatpush.bf16.msra.mxu2 %v1357_v6  ;;  %1384 = vmatpush.bf16.msra.mxu3 %v1357_v6 }
  0x1e   :  { %479 = vmatpush.bf16.msra.mxu0 %v1356_v7  ;;  %1385 = vmatpush.bf16.msra.mxu1 %v1356_v7 }
  0x1f   :  { %1386 = vmatpush.bf16.msra.mxu2 %v1356_v7  ;;  %1387 = vmatpush.bf16.msra.mxu3 %v1356_v7 }
  0x21   :  { %480 = vmatmul.bf16.vlgmr.msra.gmra.mxu0 %v1324_v8  ;;  %520 = vmatmul.bf16.vlgmr.msra.gmra.mxu1 %v1332_v9 }
  0x22   :  { %560 = vmatmul.bf16.vlgmr.msra.gmra.mxu2 %v1340_v10  ;;  %600 = vmatmul.bf16.vlgmr.msra.gmra.mxu3 %v1348_v11 }
  0x31   :  { %485 = vmatmul.bf16.gmra.mxu0 %v1325_v12  ;;  %525 = vmatmul.bf16.gmra.mxu1 %v1333_v13 }
  0x32   :  { %565 = vmatmul.bf16.gmra.mxu2 %v1341_v14  ;;  %605 = vmatmul.bf16.gmra.mxu3 %v1349_v15 }
  0x41   :  { %490 = vmatmul.bf16.gmra.mxu0 %v1326_v16  ;;  %530 = vmatmul.bf16.gmra.mxu1 %v1334_v17 }
  0x42   :  { %570 = vmatmul.bf16.gmra.mxu2 %v1342_v18  ;;  %610 = vmatmul.bf16.gmra.mxu3 %v1350_v19 }
  0x51   :  { %495 = vmatmul.bf16.gmra.mxu0 %v1327_v20  ;;  %535 = vmatmul.bf16.gmra.mxu1 %v1335_v21 }
  0x52   :  { %575 = vmatmul.bf16.gmra.mxu2 %v1343_v22  ;;  %615 = vmatmul.bf16.gmra.mxu3 %v1351_v23 }
  0x61   :  { %500 = vmatmul.bf16.gmra.mxu0 %v1328_v24  ;;  %540 = vmatmul.bf16.gmra.mxu1 %v1336_v25 }
  0x62   :  { %580 = vmatmul.bf16.gmra.mxu2 %v1344_v26  ;;  %620 = vmatmul.bf16.gmra.mxu3 %v1352_v27 }
  0x71   :  { %505 = vmatmul.bf16.gmra.mxu0 %v1329_v28  ;;  %545 = vmatmul.bf16.gmra.mxu1 %v1337_v29 }
  0x72   :  { %585 = vmatmul.bf16.gmra.mxu2 %v1345_v30  ;;  %625 = vmatmul.bf16.gmra.mxu3 %v1353_v31 }
  0x81   :  { %510 = vmatmul.bf16.gmra.mxu0 %v1330_v32  ;;  %550 = vmatmul.bf16.gmra.mxu1 %v1338_v33 }
  0x82   :  { %590 = vmatmul.bf16.gmra.mxu2 %v1346_v34  ;;  %630 = vmatmul.bf16.gmra.mxu3 %v1354_v35 }
  0x91   :  { %515 = vmatmul.bf16.gmra.mxu0 %v1331_v36  ;;  %555 = vmatmul.bf16.gmra.mxu1 %v1339_v37 }
  0x92   :  { %595 = vmatmul.bf16.gmra.mxu2 %v1347_v38  ;;  %635 = vmatmul.bf16.gmra.mxu3 %v1355_v39 }
  0x9e   :  { %v481_v41 = vpop.f32.mrf.mxu0  ;;  %v521_v42 = vpop.f32.mrf.mxu1 }
  0x9f   :  { %v840_v43 = vadd.f32 %v1543_v40, %v481_v41  ;;  %v856_v44 = vadd.f32 %v1543_v40, %v521_v42 }
  0xa1   :  { %vm904_vm0 = vcmp.ge.f32.partialorder %v840_v43, 0.0  ;;  %v968_v45 = vmul.f32 0.2, %v840_v43  ;;  %vm920_vm1 = vcmp.ge.f32.partialorder %v856_v44, 0.0  ;;  %v984_v46 = vmul.f32 0.2, %v856_v44 }
  0xa3   :  { %v1032_v47 = vsel %vm904_vm0, %v840_v43, %v968_v45  ;;  %v1048_v48 = vsel %vm920_vm1, %v856_v44, %v984_v46 }
  0xa4   :  { %1096 = vst [vmem:[%s1806_s5] sm:$0xff] %v1032_v47 }
  0xa5   :  { %v561_v49 = vpop.f32.mrf.mxu2  ;;  %v601_v50 = vpop.f32.mrf.mxu3  ;;  %1112 = vst [vmem:[%s1806_s5 + $0x80] sm:$0xff] %v1048_v48 }
  0xa6   :  { %v483_v51 = vpop.f32.mrf.mxu0  ;;  %v523_v52 = vpop.f32.mrf.mxu1  ;;  %v872_v53 = vadd.f32 %v1543_v40, %v561_v49  ;;  %v888_v54 = vadd.f32 %v1543_v40, %v601_v50 }
  0xa7   :  { %v841_v55 = vadd.f32 %v1543_v40, %v483_v51  ;;  %v857_v56 = vadd.f32 %v1543_v40, %v523_v52 }
  0xa8   :  { %vm936_vm2 = vcmp.ge.f32.partialorder %v872_v53, 0.0  ;;  %v1000_v57 = vmul.f32 0.2, %v872_v53  ;;  %vm952_vm3 = vcmp.ge.f32.partialorder %v888_v54, 0.0  ;;  %v1016_v58 = vmul.f32 0.2, %v888_v54 }
  0xa9   :  { %vm905_vm4 = vcmp.ge.f32.partialorder %v841_v55, 0.0  ;;  %v969_v59 = vmul.f32 0.2, %v841_v55  ;;  %vm921_vm5 = vcmp.ge.f32.partialorder %v857_v56, 0.0  ;;  %v985_v60 = vmul.f32 0.2, %v857_v56 }
  0xaa   :  { %v1064_v61 = vsel %vm936_vm2, %v872_v53, %v1000_v57  ;;  %v1080_v62 = vsel %vm952_vm3, %v888_v54, %v1016_v58 }
  0xab   :  { %1128 = vst [vmem:[%s1806_s5 + $0x100] sm:$0xff] %v1064_v61  ;;  %v1033_v63 = vsel %vm905_vm4, %v841_v55, %v969_v59  ;;  %v1049_v0 = vsel %vm921_vm5, %v857_v56, %v985_v60 }
  0xac   :  { %1144 = vst [vmem:[%s1806_s5 + $0x180] sm:$0xff] %v1080_v62 }
  0xad   :  { %v563_v1 = vpop.f32.mrf.mxu2  ;;  %v603_v2 = vpop.f32.mrf.mxu3  ;;  %1097 = vst [vmem:[%s1806_s5 + $0x8] sm:$0xff] %v1033_v63 }
  0xae   :  { %v486_v3 = vpop.f32.mrf.mxu0  ;;  %v526_v4 = vpop.f32.mrf.mxu1  ;;  %1113 = vst [vmem:[%s1806_s5 + $0x88] sm:$0xff] %v1049_v0  ;;  %v873_v5 = vadd.f32 %v1543_v40, %v563_v1  ;;  %v889_v6 = vadd.f32 %v1543_v40, %v603_v2 }
  0xaf   :  { %v842_v7 = vadd.f32 %v1543_v40, %v486_v3  ;;  %v858_v8 = vadd.f32 %v1543_v40, %v526_v4 }
  0xb0   :  { %vm937_vm6 = vcmp.ge.f32.partialorder %v873_v5, 0.0  ;;  %v1001_v9 = vmul.f32 0.2, %v873_v5  ;;  %vm953_vm7 = vcmp.ge.f32.partialorder %v889_v6, 0.0  ;;  %v1017_v10 = vmul.f32 0.2, %v889_v6 }
  0xb1   :  { %vm906_vm8 = vcmp.ge.f32.partialorder %v842_v7, 0.0  ;;  %v970_v11 = vmul.f32 0.2, %v842_v7  ;;  %vm922_vm9 = vcmp.ge.f32.partialorder %v858_v8, 0.0  ;;  %v986_v12 = vmul.f32 0.2, %v858_v8 }
  0xb2   :  { %v1065_v13 = vsel %vm937_vm6, %v873_v5, %v1001_v9  ;;  %v1081_v14 = vsel %vm953_vm7, %v889_v6, %v1017_v10 }
  0xb3   :  { %1129 = vst [vmem:[%s1806_s5 + $0x108] sm:$0xff] %v1065_v13  ;;  %v1034_v15 = vsel %vm906_vm8, %v842_v7, %v970_v11  ;;  %v1050_v16 = vsel %vm922_vm9, %v858_v8, %v986_v12 }
  0xb4   :  { %1145 = vst [vmem:[%s1806_s5 + $0x188] sm:$0xff] %v1081_v14 }
  0xb5   :  { %v566_v17 = vpop.f32.mrf.mxu2  ;;  %v606_v18 = vpop.f32.mrf.mxu3  ;;  %1098 = vst [vmem:[%s1806_s5 + $0x10] sm:$0xff] %v1034_v15 }
  0xb6   :  { %v488_v19 = vpop.f32.mrf.mxu0  ;;  %v528_v20 = vpop.f32.mrf.mxu1  ;;  %1114 = vst [vmem:[%s1806_s5 + $0x90] sm:$0xff] %v1050_v16  ;;  %v874_v21 = vadd.f32 %v1543_v40, %v566_v17  ;;  %v890_v22 = vadd.f32 %v1543_v40, %v606_v18 }
  0xb7   :  { %v843_v23 = vadd.f32 %v1543_v40, %v488_v19  ;;  %v859_v24 = vadd.f32 %v1543_v40, %v528_v20 }
  0xb8   :  { %vm938_vm10 = vcmp.ge.f32.partialorder %v874_v21, 0.0  ;;  %v1002_v25 = vmul.f32 0.2, %v874_v21  ;;  %vm954_vm11 = vcmp.ge.f32.partialorder %v890_v22, 0.0  ;;  %v1018_v26 = vmul.f32 0.2, %v890_v22 }
  0xb9   :  { %vm907_vm12 = vcmp.ge.f32.partialorder %v843_v23, 0.0  ;;  %v971_v27 = vmul.f32 0.2, %v843_v23  ;;  %vm923_vm13 = vcmp.ge.f32.partialorder %v859_v24, 0.0  ;;  %v987_v28 = vmul.f32 0.2, %v859_v24 }
  0xba   :  { %v1066_v29 = vsel %vm938_vm10, %v874_v21, %v1002_v25  ;;  %v1082_v30 = vsel %vm954_vm11, %v890_v22, %v1018_v26 }
  0xbb   :  { %1130 = vst [vmem:[%s1806_s5 + $0x110] sm:$0xff] %v1066_v29  ;;  %v1035_v31 = vsel %vm907_vm12, %v843_v23, %v971_v27  ;;  %v1051_v32 = vsel %vm923_vm13, %v859_v24, %v987_v28 }
  0xbc   :  { %1146 = vst [vmem:[%s1806_s5 + $0x190] sm:$0xff] %v1082_v30 }
  0xbd   :  { %v568_v33 = vpop.f32.mrf.mxu2  ;;  %v608_v34 = vpop.f32.mrf.mxu3  ;;  %1099 = vst [vmem:[%s1806_s5 + $0x18] sm:$0xff] %v1035_v31 }
  0xbe   :  { %v491_v35 = vpop.f32.mrf.mxu0  ;;  %v531_v36 = vpop.f32.mrf.mxu1  ;;  %1115 = vst [vmem:[%s1806_s5 + $0x98] sm:$0xff] %v1051_v32  ;;  %v875_v37 = vadd.f32 %v1543_v40, %v568_v33  ;;  %v891_v38 = vadd.f32 %v1543_v40, %v608_v34 }
  0xbf   :  { %v844_v39 = vadd.f32 %v1543_v40, %v491_v35  ;;  %v860_v41 = vadd.f32 %v1543_v40, %v531_v36 }
  0xc0   :  { %vm939_vm14 = vcmp.ge.f32.partialorder %v875_v37, 0.0  ;;  %v1003_v42 = vmul.f32 0.2, %v875_v37  ;;  %vm955_vm15 = vcmp.ge.f32.partialorder %v891_v38, 0.0  ;;  %v1019_v43 = vmul.f32 0.2, %v891_v38 }
  0xc1   :  { %vm908_vm0 = vcmp.ge.f32.partialorder %v844_v39, 0.0  ;;  %v972_v44 = vmul.f32 0.2, %v844_v39  ;;  %vm924_vm1 = vcmp.ge.f32.partialorder %v860_v41, 0.0  ;;  %v988_v45 = vmul.f32 0.2, %v860_v41 }
  0xc2   :  { %v1067_v46 = vsel %vm939_vm14, %v875_v37, %v1003_v42  ;;  %v1083_v47 = vsel %vm955_vm15, %v891_v38, %v1019_v43 }
  0xc3   :  { %1131 = vst [vmem:[%s1806_s5 + $0x118] sm:$0xff] %v1067_v46  ;;  %v1036_v48 = vsel %vm908_vm0, %v844_v39, %v972_v44  ;;  %v1052_v49 = vsel %vm924_vm1, %v860_v41, %v988_v45 }
  0xc4   :  { %1147 = vst [vmem:[%s1806_s5 + $0x198] sm:$0xff] %v1083_v47 }
  0xc5   :  { %v571_v50 = vpop.f32.mrf.mxu2  ;;  %v611_v51 = vpop.f32.mrf.mxu3  ;;  %1100 = vst [vmem:[%s1806_s5 + $0x20] sm:$0xff] %v1036_v48 }
  0xc6   :  { %v493_v52 = vpop.f32.mrf.mxu0  ;;  %v533_v53 = vpop.f32.mrf.mxu1  ;;  %1116 = vst [vmem:[%s1806_s5 + $0xa0] sm:$0xff] %v1052_v49  ;;  %v876_v54 = vadd.f32 %v1543_v40, %v571_v50  ;;  %v892_v55 = vadd.f32 %v1543_v40, %v611_v51 }
  0xc7   :  { %v845_v56 = vadd.f32 %v1543_v40, %v493_v52  ;;  %v861_v57 = vadd.f32 %v1543_v40, %v533_v53 }
  0xc8   :  { %vm940_vm2 = vcmp.ge.f32.partialorder %v876_v54, 0.0  ;;  %v1004_v58 = vmul.f32 0.2, %v876_v54  ;;  %vm956_vm3 = vcmp.ge.f32.partialorder %v892_v55, 0.0  ;;  %v1020_v59 = vmul.f32 0.2, %v892_v55 }
  0xc9   :  { %vm909_vm4 = vcmp.ge.f32.partialorder %v845_v56, 0.0  ;;  %v973_v60 = vmul.f32 0.2, %v845_v56  ;;  %vm925_vm5 = vcmp.ge.f32.partialorder %v861_v57, 0.0  ;;  %v989_v61 = vmul.f32 0.2, %v861_v57 }
  0xca   :  { %v1068_v62 = vsel %vm940_vm2, %v876_v54, %v1004_v58  ;;  %v1084_v63 = vsel %vm956_vm3, %v892_v55, %v1020_v59 }
  0xcb   :  { %1132 = vst [vmem:[%s1806_s5 + $0x120] sm:$0xff] %v1068_v62  ;;  %v1037_v0 = vsel %vm909_vm4, %v845_v56, %v973_v60  ;;  %v1053_v1 = vsel %vm925_vm5, %v861_v57, %v989_v61 }
  0xcc   :  { %1148 = vst [vmem:[%s1806_s5 + $0x1a0] sm:$0xff] %v1084_v63 }
  0xcd   :  { %v573_v2 = vpop.f32.mrf.mxu2  ;;  %v613_v3 = vpop.f32.mrf.mxu3  ;;  %1101 = vst [vmem:[%s1806_s5 + $0x28] sm:$0xff] %v1037_v0 }
  0xce   :  { %v496_v4 = vpop.f32.mrf.mxu0  ;;  %v536_v5 = vpop.f32.mrf.mxu1  ;;  %1117 = vst [vmem:[%s1806_s5 + $0xa8] sm:$0xff] %v1053_v1  ;;  %v877_v6 = vadd.f32 %v1543_v40, %v573_v2  ;;  %v893_v7 = vadd.f32 %v1543_v40, %v613_v3 }
  0xcf   :  { %v846_v8 = vadd.f32 %v1543_v40, %v496_v4  ;;  %v862_v9 = vadd.f32 %v1543_v40, %v536_v5 }
  0xd0   :  { %vm941_vm6 = vcmp.ge.f32.partialorder %v877_v6, 0.0  ;;  %v1005_v10 = vmul.f32 0.2, %v877_v6  ;;  %vm957_vm7 = vcmp.ge.f32.partialorder %v893_v7, 0.0  ;;  %v1021_v11 = vmul.f32 0.2, %v893_v7 }
  0xd1   :  { %vm910_vm8 = vcmp.ge.f32.partialorder %v846_v8, 0.0  ;;  %v974_v12 = vmul.f32 0.2, %v846_v8  ;;  %vm926_vm9 = vcmp.ge.f32.partialorder %v862_v9, 0.0  ;;  %v990_v13 = vmul.f32 0.2, %v862_v9 }
  0xd2   :  { %v1069_v14 = vsel %vm941_vm6, %v877_v6, %v1005_v10  ;;  %v1085_v15 = vsel %vm957_vm7, %v893_v7, %v1021_v11 }
  0xd3   :  { %1133 = vst [vmem:[%s1806_s5 + $0x128] sm:$0xff] %v1069_v14  ;;  %v1038_v16 = vsel %vm910_vm8, %v846_v8, %v974_v12  ;;  %v1054_v17 = vsel %vm926_vm9, %v862_v9, %v990_v13 }
  0xd4   :  { %1149 = vst [vmem:[%s1806_s5 + $0x1a8] sm:$0xff] %v1085_v15 }
  0xd5   :  { %v576_v18 = vpop.f32.mrf.mxu2  ;;  %v616_v19 = vpop.f32.mrf.mxu3  ;;  %1102 = vst [vmem:[%s1806_s5 + $0x30] sm:$0xff] %v1038_v16 }
  0xd6   :  { %v498_v20 = vpop.f32.mrf.mxu0  ;;  %v538_v21 = vpop.f32.mrf.mxu1  ;;  %1118 = vst [vmem:[%s1806_s5 + $0xb0] sm:$0xff] %v1054_v17  ;;  %v878_v22 = vadd.f32 %v1543_v40, %v576_v18  ;;  %v894_v23 = vadd.f32 %v1543_v40, %v616_v19 }
  0xd7   :  { %v847_v24 = vadd.f32 %v1543_v40, %v498_v20  ;;  %v863_v25 = vadd.f32 %v1543_v40, %v538_v21 }
  0xd8   :  { %vm942_vm10 = vcmp.ge.f32.partialorder %v878_v22, 0.0  ;;  %v1006_v26 = vmul.f32 0.2, %v878_v22  ;;  %vm958_vm11 = vcmp.ge.f32.partialorder %v894_v23, 0.0  ;;  %v1022_v27 = vmul.f32 0.2, %v894_v23 }
  0xd9   :  { %vm911_vm12 = vcmp.ge.f32.partialorder %v847_v24, 0.0  ;;  %v975_v28 = vmul.f32 0.2, %v847_v24  ;;  %vm927_vm13 = vcmp.ge.f32.partialorder %v863_v25, 0.0  ;;  %v991_v29 = vmul.f32 0.2, %v863_v25 }
  0xda   :  { %v1070_v30 = vsel %vm942_vm10, %v878_v22, %v1006_v26  ;;  %v1086_v31 = vsel %vm958_vm11, %v894_v23, %v1022_v27 }
  0xdb   :  { %1134 = vst [vmem:[%s1806_s5 + $0x130] sm:$0xff] %v1070_v30  ;;  %v1039_v32 = vsel %vm911_vm12, %v847_v24, %v975_v28  ;;  %v1055_v33 = vsel %vm927_vm13, %v863_v25, %v991_v29 }
  0xdc   :  { %1150 = vst [vmem:[%s1806_s5 + $0x1b0] sm:$0xff] %v1086_v31 }
  0xdd   :  { %v578_v34 = vpop.f32.mrf.mxu2  ;;  %v618_v35 = vpop.f32.mrf.mxu3  ;;  %1103 = vst [vmem:[%s1806_s5 + $0x38] sm:$0xff] %v1039_v32 }
  0xde   :  { %v501_v36 = vpop.f32.mrf.mxu0  ;;  %v541_v37 = vpop.f32.mrf.mxu1  ;;  %1119 = vst [vmem:[%s1806_s5 + $0xb8] sm:$0xff] %v1055_v33  ;;  %v879_v38 = vadd.f32 %v1543_v40, %v578_v34  ;;  %v895_v39 = vadd.f32 %v1543_v40, %v618_v35 }
  0xdf   :  { %v848_v41 = vadd.f32 %v1543_v40, %v501_v36  ;;  %v864_v42 = vadd.f32 %v1543_v40, %v541_v37 }
  0xe0   :  { %vm943_vm14 = vcmp.ge.f32.partialorder %v879_v38, 0.0  ;;  %v1007_v43 = vmul.f32 0.2, %v879_v38  ;;  %vm959_vm15 = vcmp.ge.f32.partialorder %v895_v39, 0.0  ;;  %v1023_v44 = vmul.f32 0.2, %v895_v39 }
  0xe1   :  { %vm912_vm0 = vcmp.ge.f32.partialorder %v848_v41, 0.0  ;;  %v976_v45 = vmul.f32 0.2, %v848_v41  ;;  %vm928_vm1 = vcmp.ge.f32.partialorder %v864_v42, 0.0  ;;  %v992_v46 = vmul.f32 0.2, %v864_v42 }
  0xe2   :  { %v1071_v47 = vsel %vm943_vm14, %v879_v38, %v1007_v43  ;;  %v1087_v48 = vsel %vm959_vm15, %v895_v39, %v1023_v44 }
  0xe3   :  { %1135 = vst [vmem:[%s1806_s5 + $0x138] sm:$0xff] %v1071_v47  ;;  %v1040_v49 = vsel %vm912_vm0, %v848_v41, %v976_v45  ;;  %v1056_v50 = vsel %vm928_vm1, %v864_v42, %v992_v46 }
  0xe4   :  { %1151 = vst [vmem:[%s1806_s5 + $0x1b8] sm:$0xff] %v1087_v48 }
  0xe5   :  { %v581_v51 = vpop.f32.mrf.mxu2  ;;  %v621_v52 = vpop.f32.mrf.mxu3  ;;  %1104 = vst [vmem:[%s1806_s5 + $0x40] sm:$0xff] %v1040_v49 }
  0xe6   :  { %v503_v53 = vpop.f32.mrf.mxu0  ;;  %v543_v54 = vpop.f32.mrf.mxu1  ;;  %1120 = vst [vmem:[%s1806_s5 + $0xc0] sm:$0xff] %v1056_v50  ;;  %v880_v55 = vadd.f32 %v1543_v40, %v581_v51  ;;  %v896_v56 = vadd.f32 %v1543_v40, %v621_v52 }
  0xe7   :  { %v849_v57 = vadd.f32 %v1543_v40, %v503_v53  ;;  %v865_v58 = vadd.f32 %v1543_v40, %v543_v54 }
  0xe8   :  { %vm944_vm2 = vcmp.ge.f32.partialorder %v880_v55, 0.0  ;;  %v1008_v59 = vmul.f32 0.2, %v880_v55  ;;  %vm960_vm3 = vcmp.ge.f32.partialorder %v896_v56, 0.0  ;;  %v1024_v60 = vmul.f32 0.2, %v896_v56 }
  0xe9   :  { %vm913_vm4 = vcmp.ge.f32.partialorder %v849_v57, 0.0  ;;  %v977_v61 = vmul.f32 0.2, %v849_v57  ;;  %vm929_vm5 = vcmp.ge.f32.partialorder %v865_v58, 0.0  ;;  %v993_v62 = vmul.f32 0.2, %v865_v58 }
  0xea   :  { %v1072_v63 = vsel %vm944_vm2, %v880_v55, %v1008_v59  ;;  %v1088_v0 = vsel %vm960_vm3, %v896_v56, %v1024_v60 }
  0xeb   :  { %1136 = vst [vmem:[%s1806_s5 + $0x140] sm:$0xff] %v1072_v63  ;;  %v1041_v1 = vsel %vm913_vm4, %v849_v57, %v977_v61  ;;  %v1057_v2 = vsel %vm929_vm5, %v865_v58, %v993_v62 }
  0xec   :  { %1152 = vst [vmem:[%s1806_s5 + $0x1c0] sm:$0xff] %v1088_v0 }
  0xed   :  { %v583_v3 = vpop.f32.mrf.mxu2  ;;  %v623_v4 = vpop.f32.mrf.mxu3  ;;  %1105 = vst [vmem:[%s1806_s5 + $0x48] sm:$0xff] %v1041_v1 }
  0xee   :  { %v506_v5 = vpop.f32.mrf.mxu0  ;;  %v546_v6 = vpop.f32.mrf.mxu1  ;;  %1121 = vst [vmem:[%s1806_s5 + $0xc8] sm:$0xff] %v1057_v2  ;;  %v881_v7 = vadd.f32 %v1543_v40, %v583_v3  ;;  %v897_v8 = vadd.f32 %v1543_v40, %v623_v4 }
  0xef   :  { %v850_v9 = vadd.f32 %v1543_v40, %v506_v5  ;;  %v866_v10 = vadd.f32 %v1543_v40, %v546_v6 }
  0xf0   :  { %vm945_vm6 = vcmp.ge.f32.partialorder %v881_v7, 0.0  ;;  %v1009_v11 = vmul.f32 0.2, %v881_v7  ;;  %vm961_vm7 = vcmp.ge.f32.partialorder %v897_v8, 0.0  ;;  %v1025_v12 = vmul.f32 0.2, %v897_v8 }
  0xf1   :  { %vm914_vm8 = vcmp.ge.f32.partialorder %v850_v9, 0.0  ;;  %v978_v13 = vmul.f32 0.2, %v850_v9  ;;  %vm930_vm9 = vcmp.ge.f32.partialorder %v866_v10, 0.0  ;;  %v994_v14 = vmul.f32 0.2, %v866_v10 }
  0xf2   :  { %v1073_v15 = vsel %vm945_vm6, %v881_v7, %v1009_v11  ;;  %v1089_v16 = vsel %vm961_vm7, %v897_v8, %v1025_v12 }
  0xf3   :  { %1137 = vst [vmem:[%s1806_s5 + $0x148] sm:$0xff] %v1073_v15  ;;  %v1042_v17 = vsel %vm914_vm8, %v850_v9, %v978_v13  ;;  %v1058_v18 = vsel %vm930_vm9, %v866_v10, %v994_v14 }
  0xf4   :  { %1153 = vst [vmem:[%s1806_s5 + $0x1c8] sm:$0xff] %v1089_v16 }
  0xf5   :  { %v586_v19 = vpop.f32.mrf.mxu2  ;;  %v626_v20 = vpop.f32.mrf.mxu3  ;;  %1106 = vst [vmem:[%s1806_s5 + $0x50] sm:$0xff] %v1042_v17 }
  0xf6   :  { %v508_v21 = vpop.f32.mrf.mxu0  ;;  %v548_v22 = vpop.f32.mrf.mxu1  ;;  %1122 = vst [vmem:[%s1806_s5 + $0xd0] sm:$0xff] %v1058_v18  ;;  %v882_v23 = vadd.f32 %v1543_v40, %v586_v19  ;;  %v898_v24 = vadd.f32 %v1543_v40, %v626_v20 }
  0xf7   :  { %v851_v25 = vadd.f32 %v1543_v40, %v508_v21  ;;  %v867_v26 = vadd.f32 %v1543_v40, %v548_v22 }
  0xf8   :  { %vm946_vm10 = vcmp.ge.f32.partialorder %v882_v23, 0.0  ;;  %v1010_v27 = vmul.f32 0.2, %v882_v23  ;;  %vm962_vm11 = vcmp.ge.f32.partialorder %v898_v24, 0.0  ;;  %v1026_v28 = vmul.f32 0.2, %v898_v24 }
  0xf9   :  { %vm915_vm12 = vcmp.ge.f32.partialorder %v851_v25, 0.0  ;;  %v979_v29 = vmul.f32 0.2, %v851_v25  ;;  %vm931_vm13 = vcmp.ge.f32.partialorder %v867_v26, 0.0  ;;  %v995_v30 = vmul.f32 0.2, %v867_v26 }
  0xfa   :  { %v1074_v31 = vsel %vm946_vm10, %v882_v23, %v1010_v27  ;;  %v1090_v32 = vsel %vm962_vm11, %v898_v24, %v1026_v28 }
  0xfb   :  { %1138 = vst [vmem:[%s1806_s5 + $0x150] sm:$0xff] %v1074_v31  ;;  %v1043_v33 = vsel %vm915_vm12, %v851_v25, %v979_v29  ;;  %v1059_v34 = vsel %vm931_vm13, %v867_v26, %v995_v30 }
  0xfc   :  { %1154 = vst [vmem:[%s1806_s5 + $0x1d0] sm:$0xff] %v1090_v32 }
  0xfd   :  { %v588_v35 = vpop.f32.mrf.mxu2  ;;  %v628_v36 = vpop.f32.mrf.mxu3  ;;  %1107 = vst [vmem:[%s1806_s5 + $0x58] sm:$0xff] %v1043_v33 }
  0xfe   :  { %v511_v37 = vpop.f32.mrf.mxu0  ;;  %v551_v38 = vpop.f32.mrf.mxu1  ;;  %1123 = vst [vmem:[%s1806_s5 + $0xd8] sm:$0xff] %v1059_v34  ;;  %v883_v39 = vadd.f32 %v1543_v40, %v588_v35  ;;  %v899_v41 = vadd.f32 %v1543_v40, %v628_v36 }
  0xff   :  { %v852_v42 = vadd.f32 %v1543_v40, %v511_v37  ;;  %v868_v43 = vadd.f32 %v1543_v40, %v551_v38 }
 0x100   :  { %vm947_vm14 = vcmp.ge.f32.partialorder %v883_v39, 0.0  ;;  %v1011_v44 = vmul.f32 0.2, %v883_v39  ;;  %vm963_vm15 = vcmp.ge.f32.partialorder %v899_v41, 0.0  ;;  %v1027_v45 = vmul.f32 0.2, %v899_v41 }
 0x101   :  { %vm916_vm0 = vcmp.ge.f32.partialorder %v852_v42, 0.0  ;;  %v980_v46 = vmul.f32 0.2, %v852_v42  ;;  %vm932_vm1 = vcmp.ge.f32.partialorder %v868_v43, 0.0  ;;  %v996_v47 = vmul.f32 0.2, %v868_v43 }
 0x102   :  { %v1075_v48 = vsel %vm947_vm14, %v883_v39, %v1011_v44  ;;  %v1091_v49 = vsel %vm963_vm15, %v899_v41, %v1027_v45 }
 0x103   :  { %1139 = vst [vmem:[%s1806_s5 + $0x158] sm:$0xff] %v1075_v48  ;;  %v1044_v50 = vsel %vm916_vm0, %v852_v42, %v980_v46  ;;  %v1060_v51 = vsel %vm932_vm1, %v868_v43, %v996_v47 }
 0x104   :  { %1155 = vst [vmem:[%s1806_s5 + $0x1d8] sm:$0xff] %v1091_v49 }
 0x105   :  { %v591_v52 = vpop.f32.mrf.mxu2  ;;  %v631_v53 = vpop.f32.mrf.mxu3  ;;  %1108 = vst [vmem:[%s1806_s5 + $0x60] sm:$0xff] %v1044_v50 }
 0x106   :  { %v513_v54 = vpop.f32.mrf.mxu0  ;;  %v553_v55 = vpop.f32.mrf.mxu1  ;;  %1124 = vst [vmem:[%s1806_s5 + $0xe0] sm:$0xff] %v1060_v51  ;;  %v884_v56 = vadd.f32 %v1543_v40, %v591_v52  ;;  %v900_v57 = vadd.f32 %v1543_v40, %v631_v53 }
 0x107   :  { %v853_v58 = vadd.f32 %v1543_v40, %v513_v54  ;;  %v869_v59 = vadd.f32 %v1543_v40, %v553_v55 }
 0x108   :  { %vm948_vm2 = vcmp.ge.f32.partialorder %v884_v56, 0.0  ;;  %v1012_v60 = vmul.f32 0.2, %v884_v56  ;;  %vm964_vm3 = vcmp.ge.f32.partialorder %v900_v57, 0.0  ;;  %v1028_v61 = vmul.f32 0.2, %v900_v57 }
 0x109   :  { %vm917_vm4 = vcmp.ge.f32.partialorder %v853_v58, 0.0  ;;  %v981_v62 = vmul.f32 0.2, %v853_v58  ;;  %vm933_vm5 = vcmp.ge.f32.partialorder %v869_v59, 0.0  ;;  %v997_v63 = vmul.f32 0.2, %v869_v59 }
 0x10a   :  { %v1076_v0 = vsel %vm948_vm2, %v884_v56, %v1012_v60  ;;  %v1092_v1 = vsel %vm964_vm3, %v900_v57, %v1028_v61 }
 0x10b   :  { %1140 = vst [vmem:[%s1806_s5 + $0x160] sm:$0xff] %v1076_v0  ;;  %v1045_v2 = vsel %vm917_vm4, %v853_v58, %v981_v62  ;;  %v1061_v3 = vsel %vm933_vm5, %v869_v59, %v997_v63 }
 0x10c   :  { %1156 = vst [vmem:[%s1806_s5 + $0x1e0] sm:$0xff] %v1092_v1 }
 0x10d   :  { %v593_v4 = vpop.f32.mrf.mxu2  ;;  %v633_v5 = vpop.f32.mrf.mxu3  ;;  %1109 = vst [vmem:[%s1806_s5 + $0x68] sm:$0xff] %v1045_v2 }
 0x10e   :  { %v516_v6 = vpop.f32.mrf.mxu0  ;;  %v556_v7 = vpop.f32.mrf.mxu1  ;;  %1125 = vst [vmem:[%s1806_s5 + $0xe8] sm:$0xff] %v1061_v3  ;;  %v885_v8 = vadd.f32 %v1543_v40, %v593_v4  ;;  %v901_v9 = vadd.f32 %v1543_v40, %v633_v5 }
 0x10f   :  { %v854_v10 = vadd.f32 %v1543_v40, %v516_v6  ;;  %v870_v11 = vadd.f32 %v1543_v40, %v556_v7 }
 0x110   :  { %vm949_vm6 = vcmp.ge.f32.partialorder %v885_v8, 0.0  ;;  %v1013_v12 = vmul.f32 0.2, %v885_v8  ;;  %vm965_vm7 = vcmp.ge.f32.partialorder %v901_v9, 0.0  ;;  %v1029_v13 = vmul.f32 0.2, %v901_v9 }
 0x111   :  { %vm918_vm8 = vcmp.ge.f32.partialorder %v854_v10, 0.0  ;;  %v982_v14 = vmul.f32 0.2, %v854_v10  ;;  %vm934_vm9 = vcmp.ge.f32.partialorder %v870_v11, 0.0  ;;  %v998_v15 = vmul.f32 0.2, %v870_v11 }
 0x112   :  { %v1077_v16 = vsel %vm949_vm6, %v885_v8, %v1013_v12  ;;  %v1093_v17 = vsel %vm965_vm7, %v901_v9, %v1029_v13 }
 0x113   :  { %1141 = vst [vmem:[%s1806_s5 + $0x168] sm:$0xff] %v1077_v16  ;;  %v1046_v18 = vsel %vm918_vm8, %v854_v10, %v982_v14  ;;  %v1062_v19 = vsel %vm934_vm9, %v870_v11, %v998_v15 }
 0x114   :  { %1157 = vst [vmem:[%s1806_s5 + $0x1e8] sm:$0xff] %v1093_v17 }
 0x115   :  { %v596_v20 = vpop.f32.mrf.mxu2  ;;  %v636_v21 = vpop.f32.mrf.mxu3  ;;  %1110 = vst [vmem:[%s1806_s5 + $0x70] sm:$0xff] %v1046_v18 }
 0x116   :  { %v518_v22 = vpop.f32.mrf.mxu0  ;;  %v558_v23 = vpop.f32.mrf.mxu1  ;;  %1126 = vst [vmem:[%s1806_s5 + $0xf0] sm:$0xff] %v1062_v19  ;;  %v886_v24 = vadd.f32 %v1543_v40, %v596_v20  ;;  %v902_v25 = vadd.f32 %v1543_v40, %v636_v21 }
 0x117   :  { %v855_v26 = vadd.f32 %v1543_v40, %v518_v22  ;;  %v871_v27 = vadd.f32 %v1543_v40, %v558_v23 }
 0x118   :  { %vm950_vm10 = vcmp.ge.f32.partialorder %v886_v24, 0.0  ;;  %v1014_v28 = vmul.f32 0.2, %v886_v24  ;;  %vm966_vm11 = vcmp.ge.f32.partialorder %v902_v25, 0.0  ;;  %v1030_v29 = vmul.f32 0.2, %v902_v25 }
 0x119   :  { %vm919_vm12 = vcmp.ge.f32.partialorder %v855_v26, 0.0  ;;  %v983_v30 = vmul.f32 0.2, %v855_v26  ;;  %vm935_vm13 = vcmp.ge.f32.partialorder %v871_v27, 0.0  ;;  %v999_v31 = vmul.f32 0.2, %v871_v27 }
 0x11a   :  { %v1078_v32 = vsel %vm950_vm10, %v886_v24, %v1014_v28  ;;  %v1094_v33 = vsel %vm966_vm11, %v902_v25, %v1030_v29 }
 0x11b   :  { %1142 = vst [vmem:[%s1806_s5 + $0x170] sm:$0xff] %v1078_v32  ;;  %v1047_v34 = vsel %vm919_vm12, %v855_v26, %v983_v30  ;;  %v1063_v35 = vsel %vm935_vm13, %v871_v27, %v999_v31 }
 0x11c   :  { %1158 = vst [vmem:[%s1806_s5 + $0x1f0] sm:$0xff] %v1094_v33 }
 0x11d   :  { %v598_v36 = vpop.f32.mrf.mxu2  ;;  %v638_v37 = vpop.f32.mrf.mxu3  ;;  %1111 = vst [vmem:[%s1806_s5 + $0x78] sm:$0xff] %v1047_v34 }
 0x11e   :  { %1127 = vst [vmem:[%s1806_s5 + $0xf8] sm:$0xff] %v1063_v35  ;;  %v887_v38 = vadd.f32 %v1543_v40, %v598_v36  ;;  %v903_v39 = vadd.f32 %v1543_v40, %v638_v37 }
 0x120   :  { %vm951_vm14 = vcmp.ge.f32.partialorder %v887_v38, 0.0  ;;  %v1015_v41 = vmul.f32 0.2, %v887_v38  ;;  %vm967_vm15 = vcmp.ge.f32.partialorder %v903_v39, 0.0  ;;  %v1031_v42 = vmul.f32 0.2, %v903_v39 }
 0x122   :  { %v1079_v43 = vsel %vm951_vm14, %v887_v38, %v1015_v41  ;;  %v1095_v44 = vsel %vm967_vm15, %v903_v39, %v1031_v42 }
 0x123   :  { %1143 = vst [vmem:[%s1806_s5 + $0x178] sm:$0xff] %v1079_v43 }
 0x124   :  { %1159 = vst [vmem:[%s1806_s5 + $0x1f8] sm:$0xff] %v1095_v44 }

// kernel: discriminator_forward.4
= control target key start
LH: loop header
LB: loop body
LE: loop exit
PB: predicated region body
PF: predicated region fallthrough
CT: control target
= control target key end

     0   :  { %s3134_s1 = inlined_call_operand.vmem [shape: bf16[1024,128], index: 1, kind: input, shape index: {}]   ;;  %s3135_s0 = inlined_call_operand.vmem [shape: bf16[128,1024], index: 0, kind: input, shape index: {}]   ;;  %s3136_s2 = inlined_call_operand.vmem [shape: f32[1,128], index: 2, kind: input, shape index: {}]   ;;  %s3137_s3 = inlined_call_operand.vmem [shape: f32[1,128], index: 3, kind: input, shape index: {}]   ;;  %s3138_s4 = inlined_call_operand.vmem [shape: f32[1,128], index: 4, kind: input, shape index: {}]   ;;  %s3139_s5 = inlined_call_operand.vmem [shape: f32[128,128], index: 5, kind: output, shape index: {}]  }
   0x1   :  { %v2219_v0 = vld [vmem:[%s3134_s1 + $0x38] sm:$0xff]  ;;  %v2218_v4 = vld [vmem:[%s3134_s1 + $0x30] sm:$0xff]  ;;  %v2217_v8 = vld [vmem:[%s3134_s1 + $0x28] sm:$0xff] }
   0x2   :  { %v2227_v1 = vld [vmem:[%s3134_s1 + $0x78] sm:$0xff]  ;;  %952 = vmatpush.bf16.msra.mxu0 %v2219_v0  ;;  %v2226_v5 = vld [vmem:[%s3134_s1 + $0x70] sm:$0xff]  ;;  %v2225_v9 = vld [vmem:[%s3134_s1 + $0x68] sm:$0xff] }
   0x3   :  { %v2235_v2 = vld [vmem:[%s3134_s1 + $0xb8] sm:$0xff]  ;;  %1001 = vmatpush.bf16.msra.mxu1 %v2227_v1  ;;  %v2234_v6 = vld [vmem:[%s3134_s1 + $0xb0] sm:$0xff]  ;;  %v2233_v10 = vld [vmem:[%s3134_s1 + $0xa8] sm:$0xff] }
   0x4   :  { %v2243_v3 = vld [vmem:[%s3134_s1 + $0xf8] sm:$0xff]  ;;  %1050 = vmatpush.bf16.msra.mxu2 %v2235_v2  ;;  %v2242_v7 = vld [vmem:[%s3134_s1 + $0xf0] sm:$0xff]  ;;  %v2241_v11 = vld [vmem:[%s3134_s1 + $0xe8] sm:$0xff] }
   0x5   :  { %1099 = vmatpush.bf16.msra.mxu3 %v2243_v3  ;;  %v2216_v12 = vld [vmem:[%s3134_s1 + $0x20] sm:$0xff]  ;;  %v2215_v16 = vld [vmem:[%s3134_s1 + $0x18] sm:$0xff]  ;;  %v2214_v20 = vld [vmem:[%s3134_s1 + $0x10] sm:$0xff] }
   0x6   :  { %953 = vmatpush.bf16.msra.mxu0 %v2218_v4  ;;  %v2224_v13 = vld [vmem:[%s3134_s1 + $0x60] sm:$0xff]  ;;  %v2223_v17 = vld [vmem:[%s3134_s1 + $0x58] sm:$0xff]  ;;  %v2222_v21 = vld [vmem:[%s3134_s1 + $0x50] sm:$0xff] }
   0x7   :  { %1002 = vmatpush.bf16.msra.mxu1 %v2226_v5  ;;  %v2232_v14 = vld [vmem:[%s3134_s1 + $0xa0] sm:$0xff]  ;;  %v2231_v18 = vld [vmem:[%s3134_s1 + $0x98] sm:$0xff]  ;;  %v2230_v22 = vld [vmem:[%s3134_s1 + $0x90] sm:$0xff] }
   0x8   :  { %1051 = vmatpush.bf16.msra.mxu2 %v2234_v6  ;;  %v2240_v15 = vld [vmem:[%s3134_s1 + $0xe0] sm:$0xff]  ;;  %v2239_v19 = vld [vmem:[%s3134_s1 + $0xd8] sm:$0xff]  ;;  %v2238_v23 = vld [vmem:[%s3134_s1 + $0xd0] sm:$0xff] }
   0x9   :  { %1100 = vmatpush.bf16.msra.mxu3 %v2242_v7  ;;  %v2213_v24 = vld [vmem:[%s3134_s1 + $0x8] sm:$0xff]  ;;  %v2212_v28 = vld [vmem:[%s3134_s1] sm:$0xff]  ;;  %v2267_v40 = vld [vmem:[%s3134_s1 + $0x1b8] sm:$0xff] }
   0xa   :  { %954 = vmatpush.bf16.msra.mxu0 %v2217_v8  ;;  %v2221_v25 = vld [vmem:[%s3134_s1 + $0x48] sm:$0xff]  ;;  %v2220_v29 = vld [vmem:[%s3134_s1 + $0x40] sm:$0xff]  ;;  %v2251_v41 = vld [vmem:[%s3134_s1 + $0x138] sm:$0xff] }
   0xb   :  { %1003 = vmatpush.bf16.msra.mxu1 %v2225_v9  ;;  %v2229_v26 = vld [vmem:[%s3134_s1 + $0x88] sm:$0xff]  ;;  %v2228_v30 = vld [vmem:[%s3134_s1 + $0x80] sm:$0xff]  ;;  %v2275_v46 = vld [vmem:[%s3134_s1 + $0x1f8] sm:$0xff] }
   0xc   :  { %1052 = vmatpush.bf16.msra.mxu2 %v2233_v10  ;;  %v2237_v27 = vld [vmem:[%s3134_s1 + $0xc8] sm:$0xff]  ;;  %v2236_v31 = vld [vmem:[%s3134_s1 + $0xc0] sm:$0xff]  ;;  %v2259_v47 = vld [vmem:[%s3134_s1 + $0x178] sm:$0xff] }
   0xd   :  { %1101 = vmatpush.bf16.msra.mxu3 %v2241_v11  ;;  %v1638_v32 = vld [vmem:[%s3135_s0] sm:$0xf]  ;;  %v2148_v34 = vld [vmem:[%s3135_s0 + $0x4] sm:$0xf]  ;;  %v1646_v36 = vld [vmem:[%s3135_s0 + $0x8] sm:$0xf] }
   0xe   :  { %955 = vmatpush.bf16.msra.mxu0 %v2216_v12  ;;  %v2152_v33 = vld [vmem:[%s3135_s0 + $0x1c] sm:$0xf0]  ;;  %v1640_v35 = vld [vmem:[%s3135_s0 + $0x20] sm:$0xf0]  ;;  %v2153_v37 = vld [vmem:[%s3135_s0 + $0x24] sm:$0xf0] }
   0xf   :  { %1004 = vmatpush.bf16.msra.mxu1 %v2224_v13  ;;  %v2149_v38 = vld [vmem:[%s3135_s0 + $0xc] sm:$0xf]  ;;  %v1639_v42 = vor.u32 %v2152_v33, %v1638_v32  ;;  %v1643_v43 = vor.u32 %v2148_v34, %v1640_v35  ;;  %v1647_v44 = vor.u32 %v2153_v37, %v1646_v36  ;;  %v2266_v48 = vld [vmem:[%s3134_s1 + $0x1b0] sm:$0xff]  ;;  %v1670_v56 = vld [vmem:[%s3135_s0 + $0x40] sm:$0xf] }
  0x10   :  { %1053 = vmatpush.bf16.msra.mxu2 %v2232_v14  ;;  %v1648_v39 = vld [vmem:[%s3135_s0 + $0x28] sm:$0xf0]  ;;  %v2250_v49 = vld [vmem:[%s3134_s1 + $0x130] sm:$0xff]  ;;  %v2160_v57 = vld [vmem:[%s3135_s0 + $0x5c] sm:$0xf0] }
  0x11   :  { %1102 = vmatpush.bf16.msra.mxu3 %v2240_v15  ;;  %v1651_v45 = vor.u32 %v2149_v38, %v1648_v39  ;;  %v2274_v50 = vld [vmem:[%s3134_s1 + $0x1f0] sm:$0xff]  ;;  %v2265_v52 = vld [vmem:[%s3134_s1 + $0x1a8] sm:$0xff]  ;;  %v2156_v58 = vld [vmem:[%s3135_s0 + $0x44] sm:$0xf]  ;;  %v1671_v0 = vor.u32 %v2160_v57, %v1670_v56 }
  0x12   :  { %956 = vmatpush.bf16.msra.mxu0 %v2215_v16  ;;  %v2258_v51 = vld [vmem:[%s3134_s1 + $0x170] sm:$0xff]  ;;  %v2249_v53 = vld [vmem:[%s3134_s1 + $0x128] sm:$0xff]  ;;  %v1672_v59 = vld [vmem:[%s3135_s0 + $0x60] sm:$0xf0] }
  0x13   :  { %1005 = vmatpush.bf16.msra.mxu1 %v2223_v17  ;;  %v2273_v54 = vld [vmem:[%s3134_s1 + $0x1e8] sm:$0xff]  ;;  %v1675_v1 = vor.u32 %v2156_v58, %v1672_v59  ;;  %v2264_v4 = vld [vmem:[%s3134_s1 + $0x1a0] sm:$0xff]  ;;  %v2262_v36 = vld [vmem:[%s3134_s1 + $0x190] sm:$0xff] }
  0x14   :  { %1054 = vmatpush.bf16.msra.mxu2 %v2231_v18  ;;  %v2257_v55 = vld [vmem:[%s3134_s1 + $0x168] sm:$0xff]  ;;  %v2248_v5 = vld [vmem:[%s3134_s1 + $0x120] sm:$0xff]  ;;  %v2246_v37 = vld [vmem:[%s3134_s1 + $0x110] sm:$0xff] }
  0x15   :  { %1103 = vmatpush.bf16.msra.mxu3 %v2239_v19  ;;  %v1678_v60 = vld [vmem:[%s3135_s0 + $0x48] sm:$0xf]  ;;  %v2157_v62 = vld [vmem:[%s3135_s0 + $0x4c] sm:$0xf]  ;;  %v2272_v6 = vld [vmem:[%s3134_s1 + $0x1e0] sm:$0xff] }
  0x16   :  { %957 = vmatpush.bf16.msra.mxu0 %v2214_v20  ;;  %v2161_v61 = vld [vmem:[%s3135_s0 + $0x64] sm:$0xf0]  ;;  %v1680_v63 = vld [vmem:[%s3135_s0 + $0x68] sm:$0xf0]  ;;  %v2256_v7 = vld [vmem:[%s3134_s1 + $0x160] sm:$0xff] }
  0x17   :  { %1006 = vmatpush.bf16.msra.mxu1 %v2222_v21  ;;  %v1679_v2 = vor.u32 %v2161_v61, %v1678_v60  ;;  %v1683_v3 = vor.u32 %v2157_v62, %v1680_v63  ;;  %v1702_v8 = vld [vmem:[%s3135_s0 + $0x80] sm:$0xf]  ;;  %v2164_v10 = vld [vmem:[%s3135_s0 + $0x84] sm:$0xf]  ;;  %v1710_v12 = vld [vmem:[%s3135_s0 + $0x88] sm:$0xf] }
  0x18   :  { %1055 = vmatpush.bf16.msra.mxu2 %v2230_v22  ;;  %v2168_v9 = vld [vmem:[%s3135_s0 + $0x9c] sm:$0xf0]  ;;  %v1704_v11 = vld [vmem:[%s3135_s0 + $0xa0] sm:$0xf0]  ;;  %v2169_v13 = vld [vmem:[%s3135_s0 + $0xa4] sm:$0xf0] }
  0x19   :  { %1104 = vmatpush.bf16.msra.mxu3 %v2238_v23  ;;  %v2165_v14 = vld [vmem:[%s3135_s0 + $0x8c] sm:$0xf]  ;;  %v1703_v16 = vor.u32 %v2168_v9, %v1702_v8  ;;  %v1707_v17 = vor.u32 %v2164_v10, %v1704_v11  ;;  %v1711_v18 = vor.u32 %v2169_v13, %v1710_v12  ;;  %v2263_v20 = vld [vmem:[%s3134_s1 + $0x198] sm:$0xff]  ;;  %v2270_v38 = vld [vmem:[%s3134_s1 + $0x1d0] sm:$0xff] }
  0x1a   :  { %958 = vmatpush.bf16.msra.mxu0 %v2213_v24  ;;  %v1712_v15 = vld [vmem:[%s3135_s0 + $0xa8] sm:$0xf0]  ;;  %v2247_v21 = vld [vmem:[%s3134_s1 + $0x118] sm:$0xff]  ;;  %v1734_v24 = vld [vmem:[%s3135_s0 + $0xc0] sm:$0xf] }
  0x1b   :  { %1007 = vmatpush.bf16.msra.mxu1 %v2221_v25  ;;  %v1715_v19 = vor.u32 %v2165_v14, %v1712_v15  ;;  %v2271_v22 = vld [vmem:[%s3134_s1 + $0x1d8] sm:$0xff]  ;;  %v2176_v25 = vld [vmem:[%s3135_s0 + $0xdc] sm:$0xf0]  ;;  %v2254_v39 = vld [vmem:[%s3134_s1 + $0x150] sm:$0xff] }
  0x1c   :  { %1056 = vmatpush.bf16.msra.mxu2 %v2229_v26  ;;  %v2255_v23 = vld [vmem:[%s3134_s1 + $0x158] sm:$0xff]  ;;  %v2172_v26 = vld [vmem:[%s3135_s0 + $0xc4] sm:$0xf]  ;;  %v1735_v32 = vor.u32 %v2176_v25, %v1734_v24  ;;  %v1798_v56 = vld [vmem:[%s3135_s0 + $0x140] sm:$0xf] }
  0x1d   :  { %1105 = vmatpush.bf16.msra.mxu3 %v2237_v27  ;;  %v1736_v27 = vld [vmem:[%s3135_s0 + $0xe0] sm:$0xf0]  ;;  %v2192_v57 = vld [vmem:[%s3135_s0 + $0x15c] sm:$0xf0]  ;;  %v1806_v60 = vld [vmem:[%s3135_s0 + $0x148] sm:$0xf] }
  0x1e   :  { %959 = vmatpush.bf16.msra.mxu0 %v2212_v28  ;;  %v1742_v28 = vld [vmem:[%s3135_s0 + $0xc8] sm:$0xf]  ;;  %v1739_v33 = vor.u32 %v2172_v26, %v1736_v27  ;;  %v2188_v58 = vld [vmem:[%s3135_s0 + $0x144] sm:$0xf]  ;;  %v2189_v62 = vld [vmem:[%s3135_s0 + $0x14c] sm:$0xf] }
  0x1f   :  { %1008 = vmatpush.bf16.msra.mxu1 %v2220_v29  ;;  %v2177_v29 = vld [vmem:[%s3135_s0 + $0xe4] sm:$0xf0]  ;;  %v1800_v59 = vld [vmem:[%s3135_s0 + $0x160] sm:$0xf0]  ;;  %v1808_v63 = vld [vmem:[%s3135_s0 + $0x168] sm:$0xf0] }
  0x20   :  { %1057 = vmatpush.bf16.msra.mxu2 %v2228_v30  ;;  %v2173_v30 = vld [vmem:[%s3135_s0 + $0xcc] sm:$0xf]  ;;  %v1743_v34 = vor.u32 %v2177_v29, %v1742_v28  ;;  %v2193_v61 = vld [vmem:[%s3135_s0 + $0x164] sm:$0xf0]  ;;  %v1830_v8 = vld [vmem:[%s3135_s0 + $0x180] sm:$0xf] }
  0x21   :  { %1106 = vmatpush.bf16.msra.mxu3 %v2236_v31  ;;  %960 = vmatmul.bf16.vlgmr.msra.gmra.mxu0 %v1639_v42  ;;  %v1744_v31 = vld [vmem:[%s3135_s0 + $0xe8] sm:$0xf0]  ;;  %v2180_v42 = vld [vmem:[%s3135_s0 + $0x104] sm:$0xf]  ;;  %v2200_v9 = vld [vmem:[%s3135_s0 + $0x19c] sm:$0xf0] }
  0x22   :  { %1148 = vmatpush.bf16.msrb.mxu0 %v2251_v41  ;;  %1009 = vmatmul.bf16.vlgmr.msra.gmra.mxu1 %v1643_v43  ;;  %v1747_v35 = vor.u32 %v2173_v30, %v1744_v31  ;;  %v2184_v41 = vld [vmem:[%s3135_s0 + $0x11c] sm:$0xf0]  ;;  %v1768_v43 = vld [vmem:[%s3135_s0 + $0x120] sm:$0xf0]  ;;  %v1838_v12 = vld [vmem:[%s3135_s0 + $0x188] sm:$0xf] }
  0x23   :  { %1058 = vmatmul.bf16.vlgmr.msra.gmra.mxu2 %v1647_v44  ;;  %1197 = vmatpush.bf16.msrb.mxu1 %v2259_v47  ;;  %v1774_v44 = vld [vmem:[%s3135_s0 + $0x108] sm:$0xf]  ;;  %v1776_v47 = vld [vmem:[%s3135_s0 + $0x128] sm:$0xf0]  ;;  %v2196_v10 = vld [vmem:[%s3135_s0 + $0x184] sm:$0xf] }
  0x24   :  { %1246 = vmatpush.bf16.msrb.mxu2 %v2267_v40  ;;  %1107 = vmatmul.bf16.vlgmr.msra.gmra.mxu3 %v1651_v45  ;;  %v1766_v40 = vld [vmem:[%s3135_s0 + $0x100] sm:$0xf]  ;;  %v2185_v45 = vld [vmem:[%s3135_s0 + $0x124] sm:$0xf0]  ;;  %v1832_v11 = vld [vmem:[%s3135_s0 + $0x1a0] sm:$0xf0] }
  0x25   :  { %1295 = vmatpush.bf16.msrb.mxu3 %v2275_v46  ;;  %v2181_v46 = vld [vmem:[%s3135_s0 + $0x10c] sm:$0xf]  ;;  %v2201_v13 = vld [vmem:[%s3135_s0 + $0x1a4] sm:$0xf0] }
  0x26   :  { %1149 = vmatpush.bf16.msrb.mxu0 %v2250_v49  ;;  %v1771_v49 = vor.u32 %v2180_v42, %v1768_v43  ;;  %v2197_v14 = vld [vmem:[%s3135_s0 + $0x18c] sm:$0xf]  ;;  %v1870_v24 = vld [vmem:[%s3135_s0 + $0x1c8] sm:$0xf] }
  0x27   :  { %1198 = vmatpush.bf16.msrb.mxu1 %v2258_v51  ;;  %v1779_v51 = vor.u32 %v2181_v46, %v1776_v47  ;;  %v1840_v15 = vld [vmem:[%s3135_s0 + $0x1a8] sm:$0xf0]  ;;  %v2209_v25 = vld [vmem:[%s3135_s0 + $0x1e4] sm:$0xf0] }
  0x28   :  { %1247 = vmatpush.bf16.msrb.mxu2 %v2266_v48  ;;  %v1767_v48 = vor.u32 %v2184_v41, %v1766_v40  ;;  %v2205_v26 = vld [vmem:[%s3135_s0 + $0x1cc] sm:$0xf]  ;;  %v1871_v30 = vor.u32 %v2209_v25, %v1870_v24 }
  0x29   :  { %1296 = vmatpush.bf16.msrb.mxu3 %v2274_v50  ;;  %v1775_v50 = vor.u32 %v2185_v45, %v1774_v44  ;;  %v1872_v27 = vld [vmem:[%s3135_s0 + $0x1e8] sm:$0xf0] }
  0x2a   :  { %1150 = vmatpush.bf16.msrb.mxu0 %v2249_v53  ;;  %v2245_v53 = vld [vmem:[%s3134_s1 + $0x108] sm:$0xff]  ;;  %v1875_v31 = vor.u32 %v2205_v26, %v1872_v27 }
  0x2b   :  { %1199 = vmatpush.bf16.msrb.mxu1 %v2257_v55  ;;  %v2253_v55 = vld [vmem:[%s3134_s1 + $0x148] sm:$0xff] }
  0x2c   :  { %1248 = vmatpush.bf16.msrb.mxu2 %v2265_v52  ;;  %v2261_v52 = vld [vmem:[%s3134_s1 + $0x188] sm:$0xff] }
  0x2d   :  { %1297 = vmatpush.bf16.msrb.mxu3 %v2273_v54  ;;  %v2269_v54 = vld [vmem:[%s3134_s1 + $0x1c8] sm:$0xff] }
  0x2e   :  { %1151 = vmatpush.bf16.msrb.mxu0 %v2248_v5  ;;  %v2244_v5 = vld [vmem:[%s3134_s1 + $0x100] sm:$0xff] }
  0x2f   :  { %1200 = vmatpush.bf16.msrb.mxu1 %v2256_v7  ;;  %v2252_v7 = vld [vmem:[%s3134_s1 + $0x140] sm:$0xff] }
  0x30   :  { %1249 = vmatpush.bf16.msrb.mxu2 %v2264_v4  ;;  %v2260_v4 = vld [vmem:[%s3134_s1 + $0x180] sm:$0xff] }
  0x31   :  { %965 = vmatmul.bf16.gmra.mxu0 %v1671_v0  ;;  %1298 = vmatpush.bf16.msrb.mxu3 %v2272_v6  ;;  %v1799_v0 = vor.u32 %v2192_v57, %v1798_v56  ;;  %v2268_v6 = vld [vmem:[%s3134_s1 + $0x1c0] sm:$0xff]  ;;  %v2158_v56 = vld [vmem:[%s3135_s0 + $0x54] sm:$0xf] }
  0x32   :  { %1014 = vmatmul.bf16.gmra.mxu1 %v1675_v1  ;;  %1152 = vmatpush.bf16.msrb.mxu0 %v2247_v21  ;;  %v1803_v1 = vor.u32 %v2188_v58, %v1800_v59  ;;  %v2208_v21 = vld [vmem:[%s3135_s0 + $0x1dc] sm:$0xf0]  ;;  %v1688_v57 = vld [vmem:[%s3135_s0 + $0x70] sm:$0xf0]  ;;  %v1694_v58 = vld [vmem:[%s3135_s0 + $0x58] sm:$0xf] }
  0x33   :  { %1063 = vmatmul.bf16.gmra.mxu2 %v1679_v2  ;;  %1201 = vmatpush.bf16.msrb.mxu1 %v2255_v23  ;;  %v1807_v2 = vor.u32 %v2193_v61, %v1806_v60  ;;  %v1864_v23 = vld [vmem:[%s3135_s0 + $0x1e0] sm:$0xf0]  ;;  %v2163_v59 = vld [vmem:[%s3135_s0 + $0x74] sm:$0xf0]  ;;  %v2159_v60 = vld [vmem:[%s3135_s0 + $0x5c] sm:$0xf] }
  0x34   :  { %1112 = vmatmul.bf16.gmra.mxu3 %v1683_v3  ;;  %1250 = vmatpush.bf16.msrb.mxu2 %v2263_v20  ;;  %v1811_v3 = vor.u32 %v2189_v62, %v1808_v63  ;;  %v1862_v20 = vld [vmem:[%s3135_s0 + $0x1c0] sm:$0xf]  ;;  %v1696_v61 = vld [vmem:[%s3135_s0 + $0x78] sm:$0xf0] }
  0x35   :  { %1299 = vmatpush.bf16.msrb.mxu3 %v2271_v22  ;;  %v2204_v22 = vld [vmem:[%s3135_s0 + $0x1c4] sm:$0xf]  ;;  %v1863_v28 = vor.u32 %v2208_v21, %v1862_v20  ;;  %v1726_v20 = vld [vmem:[%s3135_s0 + $0x98] sm:$0xf] }
  0x36   :  { %1153 = vmatpush.bf16.msrb.mxu0 %v2246_v37  ;;  %v1867_v29 = vor.u32 %v2204_v22, %v1864_v23  ;;  %v2155_v37 = vld [vmem:[%s3135_s0 + $0x34] sm:$0xf0]  ;;  %v2167_v22 = vld [vmem:[%s3135_s0 + $0x9c] sm:$0xf] }
  0x37   :  { %1202 = vmatpush.bf16.msrb.mxu1 %v2254_v39  ;;  %v1664_v39 = vld [vmem:[%s3135_s0 + $0x38] sm:$0xf0]  ;;  %v2171_v21 = vld [vmem:[%s3135_s0 + $0xb4] sm:$0xf0] }
  0x38   :  { %1251 = vmatpush.bf16.msrb.mxu2 %v2262_v36  ;;  %v1662_v36 = vld [vmem:[%s3135_s0 + $0x18] sm:$0xf]  ;;  %v1728_v23 = vld [vmem:[%s3135_s0 + $0xb8] sm:$0xf0] }
  0x39   :  { %1300 = vmatpush.bf16.msrb.mxu3 %v2270_v38  ;;  %v2151_v38 = vld [vmem:[%s3135_s0 + $0x1c] sm:$0xf]  ;;  %v1663_v44 = vor.u32 %v2155_v37, %v1662_v36 }
  0x3a   :  { %1154 = vmatpush.bf16.msrb.mxu0 %v2245_v53  ;;  %v1667_v45 = vor.u32 %v2151_v38, %v1664_v39 }
  0x3b   :  { %1203 = vmatpush.bf16.msrb.mxu1 %v2253_v55  ;;  %v2162_v55 = vld [vmem:[%s3135_s0 + $0x6c] sm:$0xf0] }
  0x3c   :  { %1252 = vmatpush.bf16.msrb.mxu2 %v2261_v52 }
  0x3d   :  { %1301 = vmatpush.bf16.msrb.mxu3 %v2269_v54  ;;  %v1686_v54 = vld [vmem:[%s3135_s0 + $0x50] sm:$0xf] }
  0x3e   :  { %1155 = vmatpush.bf16.msrb.mxu0 %v2244_v5  ;;  %v1695_v5 = vor.u32 %v2163_v59, %v1694_v58 }
  0x3f   :  { %1204 = vmatpush.bf16.msrb.mxu1 %v2252_v7 }
  0x40   :  { %1253 = vmatpush.bf16.msrb.mxu2 %v2260_v4 }
  0x41   :  { %970 = vmatmul.bf16.gmra.mxu0 %v1703_v16  ;;  %1302 = vmatpush.bf16.msrb.mxu3 %v2268_v6  ;;  %v1831_v16 = vor.u32 %v2200_v9, %v1830_v8  ;;  %v1699_v6 = vor.u32 %v2159_v60, %v1696_v61 }
  0x42   :  { %1019 = vmatmul.bf16.gmra.mxu1 %v1707_v17  ;;  %v1835_v17 = vor.u32 %v2196_v10, %v1832_v11 }
  0x43   :  { %1068 = vmatmul.bf16.gmra.mxu2 %v1711_v18  ;;  %v1839_v18 = vor.u32 %v2201_v13, %v1838_v12 }
  0x44   :  { %1117 = vmatmul.bf16.gmra.mxu3 %v1715_v19  ;;  %v1843_v19 = vor.u32 %v2197_v14, %v1840_v15 }
  0x51   :  { %975 = vmatmul.bf16.gmra.mxu0 %v1735_v32  ;;  %v1654_v32 = vld [vmem:[%s3135_s0 + $0x10] sm:$0xf] }
  0x52   :  { %1024 = vmatmul.bf16.gmra.mxu1 %v1739_v33  ;;  %v2154_v33 = vld [vmem:[%s3135_s0 + $0x2c] sm:$0xf0] }
  0x53   :  { %1073 = vmatmul.bf16.gmra.mxu2 %v1743_v34  ;;  %v2150_v34 = vld [vmem:[%s3135_s0 + $0x14] sm:$0xf]  ;;  %v1655_v40 = vor.u32 %v2154_v33, %v1654_v32  ;;  %v1731_v32 = vor.u32 %v2167_v22, %v1728_v23 }
  0x54   :  { %1122 = vmatmul.bf16.gmra.mxu3 %v1747_v35  ;;  %v1656_v35 = vld [vmem:[%s3135_s0 + $0x30] sm:$0xf0] }
  0x55   :  { %v1659_v41 = vor.u32 %v2150_v34, %v1656_v35 }
  0x61   :  { %980 = vmatmul.bf16.gmra.mxu0 %v1767_v48 }
  0x62   :  { %1029 = vmatmul.bf16.gmra.mxu1 %v1771_v49 }
  0x63   :  { %1078 = vmatmul.bf16.gmra.mxu2 %v1775_v50 }
  0x64   :  { %1127 = vmatmul.bf16.gmra.mxu3 %v1779_v51 }
  0x71   :  { %985 = vmatmul.bf16.gmra.mxu0 %v1799_v0  ;;  %v1687_v0 = vor.u32 %v2162_v55, %v1686_v54 }
  0x72   :  { %1034 = vmatmul.bf16.gmra.mxu1 %v1803_v1  ;;  %v1691_v1 = vor.u32 %v2158_v56, %v1688_v57 }
  0x73   :  { %1083 = vmatmul.bf16.gmra.mxu2 %v1807_v2 }
  0x74   :  { %1132 = vmatmul.bf16.gmra.mxu3 %v1811_v3 }
  0x81   :  { %990 = vmatmul.bf16.gmra.mxu0 %v1831_v16  ;;  %v1718_v16 = vld [vmem:[%s3135_s0 + $0x90] sm:$0xf] }
  0x82   :  { %1039 = vmatmul.bf16.gmra.mxu1 %v1835_v17  ;;  %v2170_v17 = vld [vmem:[%s3135_s0 + $0xac] sm:$0xf0] }
  0x83   :  { %1088 = vmatmul.bf16.gmra.mxu2 %v1839_v18  ;;  %v2166_v18 = vld [vmem:[%s3135_s0 + $0x94] sm:$0xf]  ;;  %v1719_v26 = vor.u32 %v2170_v17, %v1718_v16 }
  0x84   :  { %1137 = vmatmul.bf16.gmra.mxu3 %v1843_v19  ;;  %v1720_v19 = vld [vmem:[%s3135_s0 + $0xb0] sm:$0xf0] }
  0x85   :  { %v1723_v27 = vor.u32 %v2166_v18, %v1720_v19 }
  0x91   :  { %995 = vmatmul.bf16.gmra.mxu0 %v1863_v28 }
  0x92   :  { %1044 = vmatmul.bf16.gmra.mxu1 %v1867_v29 }
  0x93   :  { %1093 = vmatmul.bf16.gmra.mxu2 %v1871_v30 }
  0x94   :  { %1142 = vmatmul.bf16.gmra.mxu3 %v1875_v31  ;;  %v1727_v31 = vor.u32 %v2171_v21, %v1726_v20 }
  0x9e   :  { %v961_v42 = vpop.f32.mrf.mxu0 }
  0x9f   :  { %v1010_v43 = vpop.f32.mrf.mxu1 }
  0xa0   :  { %v1011_v46 = vadd.f32 %v1010_v43, %v961_v42  ;;  %v1750_v42 = vld [vmem:[%s3135_s0 + $0xd0] sm:$0xf] }
  0xa1   :  { %1156 = vmatmul.bf16.vlgmr.msrb.gmra.mxu0 %v1655_v40  ;;  %v2178_v43 = vld [vmem:[%s3135_s0 + $0xec] sm:$0xf0] }
  0xa2   :  { %1205 = vmatmul.bf16.vlgmr.msrb.gmra.mxu1 %v1659_v41 }
  0xa3   :  { %1254 = vmatmul.bf16.vlgmr.msrb.gmra.mxu2 %v1663_v44  ;;  %v2174_v44 = vld [vmem:[%s3135_s0 + $0xd4] sm:$0xf] }
  0xa4   :  { %1303 = vmatmul.bf16.vlgmr.msrb.gmra.mxu3 %v1667_v45  ;;  %v1752_v45 = vld [vmem:[%s3135_s0 + $0xf0] sm:$0xf0] }
  0xa5   :  { %v1755_v54 = vor.u32 %v2174_v44, %v1752_v45 }
  0xa6   :  { %v1059_v47 = vpop.f32.mrf.mxu2  ;;  %v963_v50 = vpop.f32.mrf.mxu0 }
  0xa7   :  { %v1108_v48 = vpop.f32.mrf.mxu3  ;;  %v1060_v49 = vadd.f32 %v1059_v47, %v1011_v46  ;;  %v1012_v51 = vpop.f32.mrf.mxu1  ;;  %v1758_v46 = vld [vmem:[%s3135_s0 + $0xd8] sm:$0xf] }
  0xa8   :  { %v1013_v52 = vadd.f32 %v1012_v51, %v963_v50  ;;  %v2179_v47 = vld [vmem:[%s3135_s0 + $0xf4] sm:$0xf0] }
  0xa9   :  { %v2724_v53 = vadd.f32 %v1108_v48, %v1060_v49  ;;  %v2175_v48 = vld [vmem:[%s3135_s0 + $0xdc] sm:$0xf]  ;;  %v1759_v58 = vor.u32 %v2179_v47, %v1758_v46 }
  0xaa   :  { %v1760_v49 = vld [vmem:[%s3135_s0 + $0xf8] sm:$0xf0] }
  0xab   :  { %v1763_v59 = vor.u32 %v2175_v48, %v1760_v49 }
  0xae   :  { %v1061_v62 = vpop.f32.mrf.mxu2  ;;  %v966_v3 = vpop.f32.mrf.mxu0 }
  0xaf   :  { %v1110_v63 = vpop.f32.mrf.mxu3  ;;  %v1062_v2 = vadd.f32 %v1061_v62, %v1013_v52  ;;  %v1015_v4 = vpop.f32.mrf.mxu1  ;;  %v1751_v52 = vor.u32 %v2178_v43, %v1750_v42  ;;  %v1824_v42 = vld [vmem:[%s3135_s0 + $0x178] sm:$0xf0] }
  0xb0   :  { %v1016_v7 = vadd.f32 %v1015_v4, %v966_v3 }
  0xb1   :  { %v2750_v8 = vadd.f32 %v1110_v63, %v1062_v2  ;;  %1161 = vmatmul.bf16.gmra.mxu0 %v1687_v0 }
  0xb2   :  { %1210 = vmatmul.bf16.gmra.mxu1 %v1691_v1 }
  0xb3   :  { %1259 = vmatmul.bf16.gmra.mxu2 %v1695_v5  ;;  %v1782_v5 = vld [vmem:[%s3135_s0 + $0x110] sm:$0xf] }
  0xb4   :  { %1308 = vmatmul.bf16.gmra.mxu3 %v1699_v6  ;;  %v2186_v6 = vld [vmem:[%s3135_s0 + $0x12c] sm:$0xf0] }
  0xb5   :  { %v1783_v17 = vor.u32 %v2186_v6, %v1782_v5  ;;  %v2203_v5 = vld [vmem:[%s3135_s0 + $0x1b4] sm:$0xf0]  ;;  %v2199_v6 = vld [vmem:[%s3135_s0 + $0x19c] sm:$0xf] }
  0xb6   :  { %v1064_v9 = vpop.f32.mrf.mxu2  ;;  %v968_v12 = vpop.f32.mrf.mxu0 }
  0xb7   :  { %v1113_v10 = vpop.f32.mrf.mxu3  ;;  %v1065_v11 = vadd.f32 %v1064_v9, %v1016_v7  ;;  %v1017_v13 = vpop.f32.mrf.mxu1  ;;  %v2182_v7 = vld [vmem:[%s3135_s0 + $0x114] sm:$0xf] }
  0xb8   :  { %v1018_v14 = vadd.f32 %v1017_v13, %v968_v12  ;;  %v1784_v9 = vld [vmem:[%s3135_s0 + $0x130] sm:$0xf0]  ;;  %v2183_v12 = vld [vmem:[%s3135_s0 + $0x11c] sm:$0xf] }
  0xb9   :  { %v2752_v15 = vadd.f32 %v1113_v10, %v1065_v11  ;;  %v1790_v10 = vld [vmem:[%s3135_s0 + $0x118] sm:$0xf]  ;;  %v1792_v13 = vld [vmem:[%s3135_s0 + $0x138] sm:$0xf0]  ;;  %v1787_v18 = vor.u32 %v2182_v7, %v1784_v9 }
  0xba   :  { %v2187_v11 = vld [vmem:[%s3135_s0 + $0x134] sm:$0xf0]  ;;  %v1795_v23 = vor.u32 %v2183_v12, %v1792_v13  ;;  %v1856_v7 = vld [vmem:[%s3135_s0 + $0x1b8] sm:$0xf0] }
  0xbb   :  { %v1791_v22 = vor.u32 %v2187_v11, %v1790_v10 }
  0xbe   :  { %v1066_v24 = vpop.f32.mrf.mxu2  ;;  %v971_v29 = vpop.f32.mrf.mxu0 }
  0xbf   :  { %v1115_v25 = vpop.f32.mrf.mxu3  ;;  %v1067_v28 = vadd.f32 %v1066_v24, %v1018_v14  ;;  %v1020_v30 = vpop.f32.mrf.mxu1 }
  0xc0   :  { %v1021_v33 = vadd.f32 %v1020_v30, %v971_v29 }
  0xc1   :  { %v2778_v34 = vadd.f32 %v1115_v25, %v1067_v28  ;;  %1166 = vmatmul.bf16.gmra.mxu0 %v1719_v26 }
  0xc2   :  { %1215 = vmatmul.bf16.gmra.mxu1 %v1723_v27 }
  0xc3   :  { %1264 = vmatmul.bf16.gmra.mxu2 %v1727_v31 }
  0xc4   :  { %1313 = vmatmul.bf16.gmra.mxu3 %v1731_v32 }
  0xc6   :  { %v1069_v35 = vpop.f32.mrf.mxu2  ;;  %v973_v38 = vpop.f32.mrf.mxu0 }
  0xc7   :  { %v1118_v36 = vpop.f32.mrf.mxu3  ;;  %v1070_v37 = vadd.f32 %v1069_v35, %v1021_v33  ;;  %v1022_v39 = vpop.f32.mrf.mxu1  ;;  %v1814_v33 = vld [vmem:[%s3135_s0 + $0x150] sm:$0xf] }
  0xc8   :  { %v1023_v40 = vadd.f32 %v1022_v39, %v973_v38  ;;  %v2194_v35 = vld [vmem:[%s3135_s0 + $0x16c] sm:$0xf0]  ;;  %v1822_v38 = vld [vmem:[%s3135_s0 + $0x158] sm:$0xf] }
  0xc9   :  { %v2780_v41 = vadd.f32 %v1118_v36, %v1070_v37  ;;  %v2190_v36 = vld [vmem:[%s3135_s0 + $0x154] sm:$0xf]  ;;  %v2195_v39 = vld [vmem:[%s3135_s0 + $0x174] sm:$0xf0]  ;;  %v1815_v45 = vor.u32 %v2194_v35, %v1814_v33 }
  0xca   :  { %v1816_v37 = vld [vmem:[%s3135_s0 + $0x170] sm:$0xf0]  ;;  %v1886_v35 = vld [vmem:[%s3135_s0 + $0x1d8] sm:$0xf] }
  0xcb   :  { %v1819_v46 = vor.u32 %v2190_v36, %v1816_v37  ;;  %v1880_v33 = vld [vmem:[%s3135_s0 + $0x1f0] sm:$0xf0]  ;;  %v2211_v36 = vld [vmem:[%s3135_s0 + $0x1f4] sm:$0xf0]  ;;  %v2207_v37 = vld [vmem:[%s3135_s0 + $0x1dc] sm:$0xf] }
  0xce   :  { %v1071_v50 = vpop.f32.mrf.mxu2  ;;  %v976_v56 = vpop.f32.mrf.mxu0 }
  0xcf   :  { %v1120_v51 = vpop.f32.mrf.mxu3  ;;  %v1072_v55 = vadd.f32 %v1071_v50, %v1023_v40  ;;  %v1025_v57 = vpop.f32.mrf.mxu1  ;;  %v2191_v40 = vld [vmem:[%s3135_s0 + $0x15c] sm:$0xf]  ;;  %v1823_v50 = vor.u32 %v2195_v39, %v1822_v38 }
  0xd0   :  { %v1026_v60 = vadd.f32 %v1025_v57, %v976_v56  ;;  %v1888_v38 = vld [vmem:[%s3135_s0 + $0x1f8] sm:$0xf0] }
  0xd1   :  { %v2806_v61 = vadd.f32 %v1120_v51, %v1072_v55  ;;  %1171 = vmatmul.bf16.gmra.mxu0 %v1751_v52  ;;  %v1827_v51 = vor.u32 %v2191_v40, %v1824_v42 }
  0xd2   :  { %1220 = vmatmul.bf16.gmra.mxu1 %v1755_v54 }
  0xd3   :  { %1269 = vmatmul.bf16.gmra.mxu2 %v1759_v58 }
  0xd4   :  { %1318 = vmatmul.bf16.gmra.mxu3 %v1763_v59 }
  0xd6   :  { %v1074_v62 = vpop.f32.mrf.mxu2  ;;  %v978_v1 = vpop.f32.mrf.mxu0 }
  0xd7   :  { %v1123_v63 = vpop.f32.mrf.mxu3  ;;  %v1075_v0 = vadd.f32 %v1074_v62, %v1026_v60  ;;  %v1027_v2 = vpop.f32.mrf.mxu1 }
  0xd8   :  { %v1028_v3 = vadd.f32 %v1027_v2, %v978_v1  ;;  %v2198_v1 = vld [vmem:[%s3135_s0 + $0x194] sm:$0xf] }
  0xd9   :  { %v2808_v4 = vadd.f32 %v1123_v63, %v1075_v0  ;;  %v1846_v63 = vld [vmem:[%s3135_s0 + $0x190] sm:$0xf]  ;;  %v1848_v2 = vld [vmem:[%s3135_s0 + $0x1b0] sm:$0xf0] }
  0xda   :  { %v2202_v0 = vld [vmem:[%s3135_s0 + $0x1ac] sm:$0xf0]  ;;  %v1851_v12 = vor.u32 %v2198_v1, %v1848_v2 }
  0xdb   :  { %v1847_v11 = vor.u32 %v2202_v0, %v1846_v63 }
  0xde   :  { %v1076_v14 = vpop.f32.mrf.mxu2  ;;  %v981_v20 = vpop.f32.mrf.mxu0 }
  0xdf   :  { %v1125_v16 = vpop.f32.mrf.mxu3  ;;  %v1077_v19 = vadd.f32 %v1076_v14, %v1028_v3  ;;  %v1030_v21 = vpop.f32.mrf.mxu1  ;;  %v1854_v3 = vld [vmem:[%s3135_s0 + $0x198] sm:$0xf] }
  0xe0   :  { %v1031_v24 = vadd.f32 %v1030_v21, %v981_v20 }
  0xe1   :  { %v2834_v25 = vadd.f32 %v1125_v16, %v1077_v19  ;;  %1176 = vmatmul.bf16.gmra.mxu0 %v1783_v17  ;;  %v1855_v17 = vor.u32 %v2203_v5, %v1854_v3 }
  0xe2   :  { %1225 = vmatmul.bf16.gmra.mxu1 %v1787_v18  ;;  %v1859_v18 = vor.u32 %v2199_v6, %v1856_v7 }
  0xe3   :  { %1274 = vmatmul.bf16.gmra.mxu2 %v1791_v22 }
  0xe4   :  { %1323 = vmatmul.bf16.gmra.mxu3 %v1795_v23 }
  0xe6   :  { %v1079_v26 = vpop.f32.mrf.mxu2  ;;  %v983_v29 = vpop.f32.mrf.mxu0 }
  0xe7   :  { %v1128_v27 = vpop.f32.mrf.mxu3  ;;  %v1080_v28 = vadd.f32 %v1079_v26, %v1031_v24  ;;  %v1032_v30 = vpop.f32.mrf.mxu1 }
  0xe8   :  { %v1033_v31 = vadd.f32 %v1032_v30, %v983_v29  ;;  %v1878_v29 = vld [vmem:[%s3135_s0 + $0x1d0] sm:$0xf] }
  0xe9   :  { %v2836_v32 = vadd.f32 %v1128_v27, %v1080_v28  ;;  %v2210_v30 = vld [vmem:[%s3135_s0 + $0x1ec] sm:$0xf0] }
  0xea   :  { %v1879_v42 = vor.u32 %v2210_v30, %v1878_v29 }
  0xee   :  { %v1081_v43 = vpop.f32.mrf.mxu2  ;;  %v986_v48 = vpop.f32.mrf.mxu0 }
  0xef   :  { %v1130_v44 = vpop.f32.mrf.mxu3  ;;  %v1082_v47 = vadd.f32 %v1081_v43, %v1033_v31  ;;  %v1035_v49 = vpop.f32.mrf.mxu1  ;;  %v2206_v31 = vld [vmem:[%s3135_s0 + $0x1d4] sm:$0xf] }
  0xf0   :  { %v1036_v52 = vadd.f32 %v1035_v49, %v986_v48  ;;  %v1883_v43 = vor.u32 %v2206_v31, %v1880_v33  ;;  %v1891_v48 = vor.u32 %v2207_v37, %v1888_v38 }
  0xf1   :  { %v2862_v54 = vadd.f32 %v1130_v44, %v1082_v47  ;;  %1181 = vmatmul.bf16.gmra.mxu0 %v1815_v45  ;;  %v1887_v47 = vor.u32 %v2211_v36, %v1886_v35 }
  0xf2   :  { %1230 = vmatmul.bf16.gmra.mxu1 %v1819_v46 }
  0xf3   :  { %1279 = vmatmul.bf16.gmra.mxu2 %v1823_v50 }
  0xf4   :  { %1328 = vmatmul.bf16.gmra.mxu3 %v1827_v51 }
  0xf6   :  { %v1084_v55 = vpop.f32.mrf.mxu2  ;;  %v988_v58 = vpop.f32.mrf.mxu0 }
  0xf7   :  { %v1133_v56 = vpop.f32.mrf.mxu3  ;;  %v1085_v57 = vadd.f32 %v1084_v55, %v1036_v52  ;;  %v1037_v59 = vpop.f32.mrf.mxu1 }
  0xf8   :  { %v1038_v60 = vadd.f32 %v1037_v59, %v988_v58 }
  0xf9   :  { %v2864_v62 = vadd.f32 %v1133_v56, %v1085_v57 }
  0xfe   :  { %v1086_v9 = vpop.f32.mrf.mxu2  ;;  %v991_v14 = vpop.f32.mrf.mxu0 }
  0xff   :  { %v1135_v10 = vpop.f32.mrf.mxu3  ;;  %v1087_v13 = vadd.f32 %v1086_v9, %v1038_v60  ;;  %v1040_v16 = vpop.f32.mrf.mxu1 }
 0x100   :  { %v1041_v19 = vadd.f32 %v1040_v16, %v991_v14 }
 0x101   :  { %v2890_v20 = vadd.f32 %v1135_v10, %v1087_v13  ;;  %1186 = vmatmul.bf16.gmra.mxu0 %v1847_v11 }
 0x102   :  { %1235 = vmatmul.bf16.gmra.mxu1 %v1851_v12 }
 0x103   :  { %1284 = vmatmul.bf16.gmra.mxu2 %v1855_v17 }
 0x104   :  { %1333 = vmatmul.bf16.gmra.mxu3 %v1859_v18 }
 0x106   :  { %v1089_v21 = vpop.f32.mrf.mxu2  ;;  %v993_v24 = vpop.f32.mrf.mxu0 }
 0x107   :  { %v1138_v22 = vpop.f32.mrf.mxu3  ;;  %v1090_v23 = vadd.f32 %v1089_v21, %v1041_v19  ;;  %v1042_v26 = vpop.f32.mrf.mxu1 }
 0x108   :  { %v1043_v27 = vadd.f32 %v1042_v26, %v993_v24 }
 0x109   :  { %v2892_v28 = vadd.f32 %v1138_v22, %v1090_v23 }
 0x10e   :  { %v1091_v39 = vpop.f32.mrf.mxu2  ;;  %v996_v45 = vpop.f32.mrf.mxu0 }
 0x10f   :  { %v1140_v40 = vpop.f32.mrf.mxu3  ;;  %v1092_v44 = vadd.f32 %v1091_v39, %v1043_v27  ;;  %v1045_v46 = vpop.f32.mrf.mxu1 }
 0x110   :  { %v1046_v49 = vadd.f32 %v1045_v46, %v996_v45 }
 0x111   :  { %v2918_v50 = vadd.f32 %v1140_v40, %v1092_v44  ;;  %1191 = vmatmul.bf16.gmra.mxu0 %v1879_v42 }
 0x112   :  { %1240 = vmatmul.bf16.gmra.mxu1 %v1883_v43 }
 0x113   :  { %1289 = vmatmul.bf16.gmra.mxu2 %v1887_v47 }
 0x114   :  { %1338 = vmatmul.bf16.gmra.mxu3 %v1891_v48 }
 0x116   :  { %v1094_v51 = vpop.f32.mrf.mxu2  ;;  %v998_v56 = vpop.f32.mrf.mxu0 }
 0x117   :  { %v1143_v52 = vpop.f32.mrf.mxu3  ;;  %v1095_v55 = vadd.f32 %v1094_v51, %v1046_v49  ;;  %v1047_v57 = vpop.f32.mrf.mxu1 }
 0x118   :  { %v1048_v58 = vadd.f32 %v1047_v57, %v998_v56 }
 0x119   :  { %v2920_v59 = vadd.f32 %v1143_v52, %v1095_v55 }
 0x11e   :  { %v1096_v60 = vpop.f32.mrf.mxu2  ;;  %v1157_v1 = vpop.f32.mrf.mxu0 }
 0x11f   :  { %v1145_v63 = vpop.f32.mrf.mxu3  ;;  %v1097_v0 = vadd.f32 %v1096_v60, %v1048_v58  ;;  %v1206_v2 = vpop.f32.mrf.mxu1  ;;  %v1158_v3 = vadd.f32 %v1157_v1, %v2724_v53 }
 0x121   :  { %v2923_v5 = vadd.f32 %v1145_v63, %v1097_v0  ;;  %v1207_v6 = vadd.f32 %v1206_v2, %v1158_v3  ;;  %v2934_v3 = vld [vmem:[%s3136_s2] ss:$0 sm:$0xff] }
 0x126   :  { %v1255_v7 = vpop.f32.mrf.mxu2  ;;  %v1159_v11 = vpop.f32.mrf.mxu0 }
 0x127   :  { %v1304_v9 = vpop.f32.mrf.mxu3  ;;  %v1256_v10 = vadd.f32 %v1255_v7, %v1207_v6  ;;  %v1208_v12 = vpop.f32.mrf.mxu1  ;;  %v1160_v13 = vadd.f32 %v1159_v11, %v2750_v8 }
 0x129   :  { %v1305_v14 = vadd.f32 %v1304_v9, %v1256_v10  ;;  %v1209_v16 = vadd.f32 %v1208_v12, %v1160_v13 }
 0x12e   :  { %v1257_v17 = vpop.f32.mrf.mxu2  ;;  %v1162_v21 = vpop.f32.mrf.mxu0 }
 0x12f   :  { %v1306_v18 = vpop.f32.mrf.mxu3  ;;  %v1258_v19 = vadd.f32 %v1257_v17, %v1209_v16  ;;  %v1211_v22 = vpop.f32.mrf.mxu1  ;;  %v1163_v23 = vadd.f32 %v1162_v21, %v2752_v15 }
 0x131   :  { %v1307_v53 = vadd.f32 %v1306_v18, %v1258_v19  ;;  %v1212_v24 = vadd.f32 %v1211_v22, %v1163_v23 }
 0x133   :  { %v2938_v9 = vadd.f32 %v2934_v3, %v1307_v53 }
 0x135   :  { %v1445_v13 = vmul.f32 %v2938_v9, %v2938_v9 }
 0x136   :  { %v1260_v26 = vpop.f32.mrf.mxu2  ;;  %v1164_v30 = vpop.f32.mrf.mxu0 }
 0x137   :  { %v1309_v27 = vpop.f32.mrf.mxu3  ;;  %v1261_v29 = vadd.f32 %v1260_v26, %v1212_v24  ;;  %v1213_v31 = vpop.f32.mrf.mxu1  ;;  %v1165_v33 = vadd.f32 %v1164_v30, %v2778_v34 }
 0x139   :  { %v1310_v35 = vadd.f32 %v1309_v27, %v1261_v29  ;;  %v1214_v8 = vadd.f32 %v1213_v31, %v1165_v33 }
 0x13b   :  { %v2944_v10 = vadd.f32 %v2934_v3, %v1310_v35 }
 0x13d   :  { %v1446_v22 = vmul.f32 %v2944_v10, %v2944_v10 }
 0x13e   :  { %v1262_v36 = vpop.f32.mrf.mxu2  ;;  %v1167_v39 = vpop.f32.mrf.mxu0 }
 0x13f   :  { %v1311_v37 = vpop.f32.mrf.mxu3  ;;  %v1263_v38 = vadd.f32 %v1262_v36, %v1214_v8  ;;  %v1216_v40 = vpop.f32.mrf.mxu1  ;;  %v1168_v42 = vadd.f32 %v1167_v39, %v2780_v41 }
 0x141   :  { %v1312_v43 = vadd.f32 %v1311_v37, %v1263_v38  ;;  %v1217_v15 = vadd.f32 %v1216_v40, %v1168_v42 }
 0x143   :  { %v2949_v16 = vadd.f32 %v2934_v3, %v1312_v43 }
 0x145   :  { %v1447_v29 = vmul.f32 %v2949_v16, %v2949_v16 }
 0x146   :  { %v1265_v44 = vpop.f32.mrf.mxu2  ;;  %v1169_v47 = vpop.f32.mrf.mxu0 }
 0x147   :  { %v1314_v45 = vpop.f32.mrf.mxu3  ;;  %v1266_v46 = vadd.f32 %v1265_v44, %v1217_v15  ;;  %v1218_v48 = vpop.f32.mrf.mxu1  ;;  %v1170_v56 = vadd.f32 %v1169_v47, %v2806_v61 }
 0x149   :  { %v1315_v49 = vadd.f32 %v1314_v45, %v1266_v46  ;;  %v1219_v58 = vadd.f32 %v1218_v48, %v1170_v56 }
 0x14b   :  { %v2956_v23 = vadd.f32 %v2934_v3, %v1315_v49 }
 0x14d   :  { %v1448_v35 = vmul.f32 %v2956_v23, %v2956_v23 }
 0x14e   :  { %v1267_v51 = vpop.f32.mrf.mxu2  ;;  %v1172_v34 = vpop.f32.mrf.mxu0 }
 0x14f   :  { %v1316_v52 = vpop.f32.mrf.mxu3  ;;  %v1221_v55 = vpop.f32.mrf.mxu1  ;;  %v1173_v57 = vadd.f32 %v1172_v34, %v2808_v4  ;;  %v1268_v41 = vadd.f32 %v1267_v51, %v1219_v58  ;;  %v2941_v4 = vadd.f32 %v2934_v3, %v1305_v14 }
 0x151   :  { %v1222_v0 = vadd.f32 %v1221_v55, %v1173_v57  ;;  %v1317_v61 = vadd.f32 %v1316_v52, %v1268_v41  ;;  %v1444_v14 = vmul.f32 %v2941_v4, %v2941_v4  ;;  %v1415_v53 = vadd.f32 %v2938_v9, %v2941_v4 }
 0x153   :  { %v1460_v27 = vadd.f32 %v1445_v13, %v1444_v14  ;;  %v1416_v30 = vadd.f32 %v1415_v53, %v2944_v10  ;;  %v2965_v31 = vadd.f32 %v2934_v3, %v1317_v61 }
 0x155   :  { %v1461_v33 = vadd.f32 %v1460_v27, %v1446_v22  ;;  %v1417_v37 = vadd.f32 %v1416_v30, %v2949_v16  ;;  %v1449_v45 = vmul.f32 %v2965_v31, %v2965_v31 }
 0x156   :  { %v1270_v60 = vpop.f32.mrf.mxu2  ;;  %v1174_v1 = vpop.f32.mrf.mxu0 }
 0x157   :  { %v1319_v63 = vpop.f32.mrf.mxu3  ;;  %v1223_v2 = vpop.f32.mrf.mxu1  ;;  %v1271_v6 = vadd.f32 %v1270_v60, %v1222_v0  ;;  %v1175_v7 = vadd.f32 %v1174_v1, %v2834_v25  ;;  %v1462_v39 = vadd.f32 %v1461_v33, %v1447_v29  ;;  %v1418_v44 = vadd.f32 %v1417_v37, %v2956_v23 }
 0x159   :  { %v1320_v11 = vadd.f32 %v1319_v63, %v1271_v6  ;;  %v1224_v12 = vadd.f32 %v1223_v2, %v1175_v7  ;;  %v1463_v46 = vadd.f32 %v1462_v39, %v1448_v35  ;;  %v1419_v49 = vadd.f32 %v1418_v44, %v2965_v31 }
 0x15b   :  { %v2970_v8 = vadd.f32 %v2934_v3, %v1320_v11  ;;  %v1464_v55 = vadd.f32 %v1463_v46, %v1449_v45 }
 0x15d   :  { %v1450_v51 = vmul.f32 %v2970_v8, %v2970_v8  ;;  %v1420_v52 = vadd.f32 %v1419_v49, %v2970_v8 }
 0x15e   :  { %v1272_v17 = vpop.f32.mrf.mxu2  ;;  %v1177_v19 = vpop.f32.mrf.mxu0 }
 0x15f   :  { %v1321_v25 = vpop.f32.mrf.mxu3  ;;  %v1273_v18 = vadd.f32 %v1272_v17, %v1224_v12  ;;  %v1226_v21 = vpop.f32.mrf.mxu1  ;;  %v1178_v26 = vadd.f32 %v1177_v19, %v2836_v32  ;;  %v1465_v60 = vadd.f32 %v1464_v55, %v1450_v51 }
 0x161   :  { %v1322_v24 = vadd.f32 %v1321_v25, %v1273_v18  ;;  %v1227_v36 = vadd.f32 %v1226_v21, %v1178_v26 }
 0x163   :  { %v2974_v40 = vadd.f32 %v2934_v3, %v1322_v24 }
 0x165   :  { %v1451_v34 = vmul.f32 %v2974_v40, %v2974_v40  ;;  %v1421_v58 = vadd.f32 %v1420_v52, %v2974_v40 }
 0x166   :  { %v1275_v32 = vpop.f32.mrf.mxu2  ;;  %v1179_v43 = vpop.f32.mrf.mxu0 }
 0x167   :  { %v1324_v38 = vpop.f32.mrf.mxu3  ;;  %v1276_v42 = vadd.f32 %v1275_v32, %v1227_v36  ;;  %v1228_v15 = vpop.f32.mrf.mxu1  ;;  %v1180_v48 = vadd.f32 %v1179_v43, %v2862_v54  ;;  %v1466_v7 = vadd.f32 %v1465_v60, %v1451_v34 }
 0x169   :  { %v1325_v47 = vadd.f32 %v1324_v38, %v1276_v42  ;;  %v1229_v56 = vadd.f32 %v1228_v15, %v1180_v48 }
 0x16b   :  { %v2987_v57 = vadd.f32 %v2934_v3, %v1325_v47 }
 0x16d   :  { %v1422_v2 = vadd.f32 %v1421_v58, %v2987_v57  ;;  %v1452_v6 = vmul.f32 %v2987_v57, %v2987_v57 }
 0x16e   :  { %v1277_v63 = vpop.f32.mrf.mxu2  ;;  %v1182_v0 = vpop.f32.mrf.mxu0 }
 0x16f   :  { %v1326_v54 = vpop.f32.mrf.mxu3  ;;  %v1278_v41 = vadd.f32 %v1277_v63, %v1229_v56  ;;  %v1231_v1 = vpop.f32.mrf.mxu1  ;;  %v1183_v11 = vadd.f32 %v1182_v0, %v2864_v62  ;;  %v1467_v12 = vadd.f32 %v1466_v7, %v1452_v6 }
 0x171   :  { %v1327_v61 = vadd.f32 %v1326_v54, %v1278_v41  ;;  %v1232_v13 = vadd.f32 %v1231_v1, %v1183_v11 }
 0x173   :  { %v2995_v17 = vadd.f32 %v2934_v3, %v1327_v61 }
 0x175   :  { %v1423_v22 = vadd.f32 %v1422_v2, %v2995_v17  ;;  %v1453_v53 = vmul.f32 %v2995_v17, %v2995_v17 }
 0x176   :  { %v1280_v25 = vpop.f32.mrf.mxu2  ;;  %v1184_v21 = vpop.f32.mrf.mxu0 }
 0x177   :  { %v1329_v18 = vpop.f32.mrf.mxu3  ;;  %v1281_v19 = vadd.f32 %v1280_v25, %v1232_v13  ;;  %v1233_v14 = vpop.f32.mrf.mxu1  ;;  %v1185_v26 = vadd.f32 %v1184_v21, %v2890_v20  ;;  %v1468_v27 = vadd.f32 %v1467_v12, %v1453_v53 }
 0x179   :  { %v1330_v24 = vadd.f32 %v1329_v18, %v1281_v19  ;;  %v1234_v62 = vadd.f32 %v1233_v14, %v1185_v26 }
 0x17b   :  { %v3002_v29 = vadd.f32 %v2934_v3, %v1330_v24 }
 0x17d   :  { %v1424_v32 = vadd.f32 %v1423_v22, %v3002_v29  ;;  %v1454_v38 = vmul.f32 %v3002_v29, %v3002_v29  ;;  %v2285_v22 = vmov 128.0  }
 0x17e   :  { %v1282_v30 = vpop.f32.mrf.mxu2  ;;  %v1187_v36 = vpop.f32.mrf.mxu0  ;;  %2281 = vrcp.f32 %v2285_v22 }
 0x17f   :  { %v1331_v33 = vpop.f32.mrf.mxu3  ;;  %v1283_v35 = vadd.f32 %v1282_v30, %v1234_v62  ;;  %v1236_v37 = vpop.f32.mrf.mxu1  ;;  %v1188_v42 = vadd.f32 %v1187_v36, %v2892_v28  ;;  %v1469_v43 = vadd.f32 %v1468_v27, %v1454_v38 }
 0x181   :  { %v1332_v39 = vadd.f32 %v1331_v33, %v1283_v35  ;;  %v1237_v20 = vadd.f32 %v1236_v37, %v1188_v42 }
 0x183   :  { %v3009_v15 = vadd.f32 %v2934_v3, %v1332_v39 }
 0x184   :  { %v2282_v62 = vpop.eup %2281 }
 0x185   :  { %v1425_v48 = vadd.f32 %v1424_v32, %v3009_v15  ;;  %v1455_v49 = vmul.f32 %v3009_v15, %v3009_v15  ;;  %vm1441_vm0 = vweird.f32 %v2282_v62 }
 0x186   :  { %v1285_v44 = vpop.f32.mrf.mxu2  ;;  %v1189_v47 = vpop.f32.mrf.mxu0 }
 0x187   :  { %v1334_v45 = vpop.f32.mrf.mxu3  ;;  %v1286_v46 = vadd.f32 %v1285_v44, %v1237_v20  ;;  %v1238_v51 = vpop.f32.mrf.mxu1  ;;  %v1190_v34 = vadd.f32 %v1189_v47, %v2918_v50  ;;  %v1470_v55 = vadd.f32 %v1469_v43, %v1455_v49 }
 0x189   :  { %v1335_v52 = vadd.f32 %v1334_v45, %v1286_v46  ;;  %v1239_v28 = vadd.f32 %v1238_v51, %v1190_v34 }
 0x18b   :  { %v3016_v56 = vadd.f32 %v2934_v3, %v1335_v52 }
 0x18d   :  { %v1426_v41 = vadd.f32 %v1425_v48, %v3016_v56  ;;  %v1456_v0 = vmul.f32 %v3016_v56, %v3016_v56 }
 0x18e   :  { %v1287_v58 = vpop.f32.mrf.mxu2  ;;  %v1192_v54 = vpop.f32.mrf.mxu0 }
 0x18f   :  { %v1336_v60 = vpop.f32.mrf.mxu3  ;;  %v1288_v63 = vadd.f32 %v1287_v58, %v1239_v28  ;;  %v1193_v2 = vadd.f32 %v1192_v54, %v2920_v59  ;;  %v1471_v6 = vadd.f32 %v1470_v55, %v1456_v0  ;;  %v1241_v7 = vpop.f32.mrf.mxu1 }
 0x191   :  { %v1337_v1 = vadd.f32 %v1336_v60, %v1288_v63  ;;  %v1242_v50 = vadd.f32 %v1241_v7, %v1193_v2 }
 0x193   :  { %v3023_v61 = vadd.f32 %v2934_v3, %v1337_v1 }
 0x195   :  { %v1427_v18 = vadd.f32 %v1426_v41, %v3023_v61  ;;  %v1457_v19 = vmul.f32 %v3023_v61, %v3023_v61 }
 0x196   :  { %v1290_v11 = vpop.f32.mrf.mxu2  ;;  %v1194_v25 = vpop.f32.mrf.mxu0 }
 0x197   :  { %v1339_v12 = vpop.f32.mrf.mxu3  ;;  %v1291_v13 = vadd.f32 %v1290_v11, %v1242_v50  ;;  %v1195_v14 = vadd.f32 %v1194_v25, %v2923_v5  ;;  %v1472_v59 = vadd.f32 %v1471_v6, %v1457_v19  ;;  %v1243_v53 = vpop.f32.mrf.mxu1  ;;  %v1437_v5 = vmul.f32 128.0, %v2282_v62 }
 0x199   :  { %v1340_v21 = vadd.f32 %v1339_v12, %v1291_v13  ;;  %v1244_v24 = vadd.f32 %v1243_v53, %v1195_v14  ;;  %v1438_v39 = vsub.f32 1.0, %v1437_v5 }
 0x19b   :  { %v3030_v26 = vadd.f32 %v2934_v3, %v1340_v21  ;;  %v1439_v45 = vmul.f32 %v2282_v62, %v1438_v39 }
 0x19d   :  { %v1428_v33 = vadd.f32 %v1427_v18, %v3030_v26  ;;  %v1458_v35 = vmul.f32 %v3030_v26, %v3030_v26  ;;  %v1440_v51 = vadd.f32 %v2282_v62, %v1439_v45 }
 0x19e   :  { %v1292_v27 = vpop.f32.mrf.mxu2 }
 0x19f   :  { %v1293_v30 = vadd.f32 %v1292_v27, %v1244_v24  ;;  %v1341_v36 = vpop.f32.mrf.mxu3  ;;  %v1473_v32 = vadd.f32 %v1472_v59, %v1458_v35  ;;  %v1442_v28 = vsel %vm1441_vm0, %v2282_v62, %v1440_v51 }
 0x1a1   :  { %v1342_v37 = vadd.f32 %v1341_v36, %v1293_v30 }
 0x1a3   :  { %v3036_v38 = vadd.f32 %v2934_v3, %v1342_v37 }
 0x1a5   :  { %v1429_v42 = vadd.f32 %v1428_v33, %v3036_v38  ;;  %v1459_v43 = vmul.f32 %v3036_v38, %v3036_v38 }
 0x1a7   :  { %v1430_v20 = vrot.slane %v1429_v42, 4  ;;  %v1474_v44 = vadd.f32 %v1473_v32, %v1459_v43 }
 0x1a9   :  { %v1431_v46 = vadd.f32 %v1430_v20, %v1429_v42  ;;  %v1475_v47 = vrot.slane %v1474_v44, 4  ;;  %v3063_v20 = vld [vmem:[%s3138_s4] ss:$0 sm:$0xff] }
 0x1ab   :  { %v1432_v48 = vrot.slane %v1431_v46, 2  ;;  %v1476_v49 = vadd.f32 %v1475_v47, %v1474_v44 }
 0x1ad   :  { %v1433_v52 = vadd.f32 %v1432_v48, %v1431_v46  ;;  %v1477_v34 = vrot.slane %v1476_v49, 2 }
 0x1af   :  { %v1434_v55 = vrot.slane %v1433_v52, 1  ;;  %v1478_v3 = vadd.f32 %v1477_v34, %v1476_v49 }
 0x1b1   :  { %v1435_v58 = vadd.f32 %v1434_v55, %v1433_v52  ;;  %v1479_v60 = vrot.slane %v1478_v3, 1 }
 0x1b3   :  { %v1443_v63 = vmul.f32 %v1442_v28, %v1435_v58  ;;  %v1480_v54 = vadd.f32 %v1479_v60, %v1478_v3 }
 0x1b5   :  { %v1481_v41 = vmul.f32 %v1480_v54, %v1442_v28  ;;  %v1482_v0 = vmul.f32 %v1443_v63, %v1443_v63  ;;  %v1492_v2 = vsub.f32 %v2974_v40, %v1443_v63  ;;  %v1493_v6 = vsub.f32 %v2987_v57, %v1443_v63 }
 0x1b6   :  { %v1494_v7 = vsub.f32 %v2995_v17, %v1443_v63  ;;  %v1495_v50 = vsub.f32 %v3002_v29, %v1443_v63  ;;  %v1496_v11 = vsub.f32 %v3009_v15, %v1443_v63  ;;  %v1497_v12 = vsub.f32 %v3016_v56, %v1443_v63 }
 0x1b7   :  { %v1483_v1 = vsub.f32 %v1481_v41, %v1482_v0  ;;  %v1498_v25 = vsub.f32 %v3023_v61, %v1443_v63  ;;  %v1499_v18 = vsub.f32 %v3030_v26, %v1443_v63  ;;  %v1500_v19 = vsub.f32 %v3036_v38, %v1443_v63 }
 0x1b8   :  { %v1485_v15 = vsub.f32 %v2941_v4, %v1443_v63  ;;  %v1486_v56 = vsub.f32 %v2938_v9, %v1443_v63  ;;  %v1487_v61 = vsub.f32 %v2944_v10, %v1443_v63  ;;  %v1488_v59 = vsub.f32 %v2949_v16, %v1443_v63 }
 0x1b9   :  { %v1484_v13 = vmax.f32 %v1483_v1, 0.0  ;;  %v1489_v53 = vsub.f32 %v2956_v23, %v1443_v63  ;;  %v1490_v24 = vsub.f32 %v2965_v31, %v1443_v63  ;;  %v1491_v26 = vsub.f32 %v2970_v8, %v1443_v63  ;;  %v2279_v31 = vld [vmem:[%s3137_s3] ss:$0 sm:$0xff] }
 0x1bb   :  { %v1501_v21 = vadd.f32 1e-05, %v1484_v13 }
 0x1bd   :  { %2283 = vrsqrt.f32 %v1501_v21  ;;  %vm1508_vm2 = vweird.f32 %v1501_v21 }
 0x1c3   :  { %v2284_v40 = vpop.eup %2283 }
 0x1c4   :  { %v1503_v14 = vmul.f32 %v2284_v40, %v1501_v21  ;;  %vm1509_vm1 = vweird.f32 %v2284_v40 }
 0x1c5   :  { %vm1510_vm3 = vmor %vm1508_vm2, %vm1509_vm1 }
 0x1c6   :  { %v1504_v57 = vmul.f32 %v2284_v40, %v1503_v14 }
 0x1c8   :  { %v1505_v22 = vmul.f32 0.5, %v1504_v57 }
 0x1ca   :  { %v1506_v17 = vsub.f32 1.5, %v1505_v22 }
 0x1cc   :  { %v1507_v29 = vmul.f32 %v2284_v40, %v1506_v17 }
 0x1ce   :  { %v1511_v27 = vsel %vm1510_vm3, %v2284_v40, %v1507_v29 }
 0x1cf   :  { %v1512_v62 = vmul.f32 %v1511_v27, %v1485_v15  ;;  %v1513_v30 = vmul.f32 %v1511_v27, %v1486_v56  ;;  %v1514_v33 = vmul.f32 %v1511_v27, %v1487_v61  ;;  %v1515_v35 = vmul.f32 %v1511_v27, %v1488_v59 }
 0x1d0   :  { %v1516_v36 = vmul.f32 %v1511_v27, %v1489_v53  ;;  %v1517_v4 = vmul.f32 %v1511_v27, %v1490_v24  ;;  %v1518_v37 = vmul.f32 %v1511_v27, %v1491_v26  ;;  %v1519_v9 = vmul.f32 %v1511_v27, %v1492_v2 }
 0x1d1   :  { %v1520_v32 = vmul.f32 %v1511_v27, %v1493_v6  ;;  %v1521_v10 = vmul.f32 %v1511_v27, %v1494_v7  ;;  %v1522_v5 = vmul.f32 %v1511_v27, %v1495_v50  ;;  %v1523_v16 = vmul.f32 %v1511_v27, %v1496_v11 }
 0x1d2   :  { %v1524_v38 = vmul.f32 %v1511_v27, %v1497_v12  ;;  %v1525_v39 = vmul.f32 %v1511_v27, %v1498_v25  ;;  %v1526_v23 = vmul.f32 %v1511_v27, %v1499_v18  ;;  %v1527_v42 = vmul.f32 %v1511_v27, %v1500_v19 }
 0x1d3   :  { %v1532_v8 = vmul.f32 %v2279_v31, %v1512_v62  ;;  %v1533_v43 = vmul.f32 %v2279_v31, %v1513_v30  ;;  %v1534_v44 = vmul.f32 %v2279_v31, %v1514_v33  ;;  %v1535_v45 = vmul.f32 %v2279_v31, %v1515_v35 }
 0x1d4   :  { %v1536_v46 = vmul.f32 %v2279_v31, %v1516_v36  ;;  %v1537_v47 = vmul.f32 %v2279_v31, %v1517_v4  ;;  %v1538_v48 = vmul.f32 %v2279_v31, %v1518_v37  ;;  %v1539_v49 = vmul.f32 %v2279_v31, %v1519_v9 }
 0x1d5   :  { %v1540_v51 = vmul.f32 %v2279_v31, %v1520_v32  ;;  %v1552_v52 = vadd.f32 %v3063_v20, %v1532_v8  ;;  %v1553_v34 = vadd.f32 %v3063_v20, %v1533_v43  ;;  %v1541_v55 = vmul.f32 %v2279_v31, %v1521_v10 }
 0x1d6   :  { %v1542_v3 = vmul.f32 %v2279_v31, %v1522_v5  ;;  %v1543_v28 = vmul.f32 %v2279_v31, %v1523_v16  ;;  %v1554_v58 = vadd.f32 %v3063_v20, %v1534_v44  ;;  %v1544_v60 = vmul.f32 %v2279_v31, %v1524_v38 }
 0x1d7   :  { %v1545_v63 = vmul.f32 %v2279_v31, %v1525_v39  ;;  %v1555_v54 = vadd.f32 %v3063_v20, %v1535_v45  ;;  %v1556_v41 = vadd.f32 %v3063_v20, %v1536_v46  ;;  %v1546_v0 = vmul.f32 %v2279_v31, %v1526_v23 }
 0x1d8   :  { %v1547_v1 = vmul.f32 %v2279_v31, %v1527_v42  ;;  %v1557_v2 = vadd.f32 %v3063_v20, %v1537_v47  ;;  %v1558_v6 = vadd.f32 %v3063_v20, %v1538_v48  ;;  %v1559_v7 = vadd.f32 %v3063_v20, %v1539_v49 }
 0x1d9   :  { %v1560_v50 = vadd.f32 %v3063_v20, %v1540_v51  ;;  %vm1568_vm4 = vcmp.ge.f32.partialorder %v1552_v52, 0.0  ;;  %vm1569_vm5 = vcmp.ge.f32.partialorder %v1553_v34, 0.0  ;;  %v1561_v11 = vadd.f32 %v3063_v20, %v1541_v55 }
 0x1da   :  { %v1584_v12 = vmul.f32 0.2, %v1552_v52  ;;  %v1585_v13 = vmul.f32 0.2, %v1553_v34  ;;  %v1586_v25 = vmul.f32 0.2, %v1554_v58  ;;  %v1562_v18 = vadd.f32 %v3063_v20, %v1542_v3 }
 0x1db   :  { %vm1570_vm6 = vcmp.ge.f32.partialorder %v1554_v58, 0.0  ;;  %v1587_v19 = vmul.f32 0.2, %v1555_v54  ;;  %v1588_v21 = vmul.f32 0.2, %v1556_v41  ;;  %vm1571_vm7 = vcmp.ge.f32.partialorder %v1555_v54, 0.0 }
 0x1dc   :  { %vm1572_vm8 = vcmp.ge.f32.partialorder %v1556_v41, 0.0  ;;  %v1589_v40 = vmul.f32 0.2, %v1557_v2  ;;  %v1600_v14 = vsel %vm1568_vm4, %v1552_v52, %v1584_v12  ;;  %v1563_v57 = vadd.f32 %v3063_v20, %v1543_v28 }
 0x1dd   :  { %vm1573_vm9 = vcmp.ge.f32.partialorder %v1557_v2, 0.0  ;;  %v1590_v22 = vmul.f32 0.2, %v1558_v6  ;;  %v1601_v17 = vsel %vm1569_vm5, %v1553_v34, %v1585_v13  ;;  %1616 = vst [vmem:[%s3139_s5] sm:$0xff] %v1600_v14  ;;  %v1564_v29 = vadd.f32 %v3063_v20, %v1544_v60 }
 0x1de   :  { %vm1574_vm10 = vcmp.ge.f32.partialorder %v1558_v6, 0.0  ;;  %v1591_v15 = vmul.f32 0.2, %v1559_v7  ;;  %v1602_v56 = vsel %vm1570_vm6, %v1554_v58, %v1586_v25  ;;  %vm1575_vm11 = vcmp.ge.f32.partialorder %v1559_v7, 0.0  ;;  %1617 = vst [vmem:[%s3139_s5 + $0x8] sm:$0xff] %v1601_v17 }
 0x1df   :  { %v1592_v61 = vmul.f32 0.2, %v1560_v50  ;;  %v1603_v59 = vsel %vm1571_vm7, %v1555_v54, %v1587_v19  ;;  %v1604_v53 = vsel %vm1572_vm8, %v1556_v41, %v1588_v21  ;;  %v1565_v24 = vadd.f32 %v3063_v20, %v1545_v63  ;;  %1618 = vst [vmem:[%s3139_s5 + $0x10] sm:$0xff] %v1602_v56 }
 0x1e0   :  { %vm1576_vm12 = vcmp.ge.f32.partialorder %v1560_v50, 0.0  ;;  %v1593_v26 = vmul.f32 0.2, %v1561_v11  ;;  %v1605_v27 = vsel %vm1573_vm9, %v1557_v2, %v1589_v40  ;;  %v1566_v62 = vadd.f32 %v3063_v20, %v1546_v0  ;;  %1619 = vst [vmem:[%s3139_s5 + $0x18] sm:$0xff] %v1603_v59 }
 0x1e1   :  { %vm1577_vm13 = vcmp.ge.f32.partialorder %v1561_v11, 0.0  ;;  %v1594_v30 = vmul.f32 0.2, %v1562_v18  ;;  %v1606_v33 = vsel %vm1574_vm10, %v1558_v6, %v1590_v22  ;;  %v1567_v35 = vadd.f32 %v3063_v20, %v1547_v1  ;;  %1620 = vst [vmem:[%s3139_s5 + $0x20] sm:$0xff] %v1604_v53 }
 0x1e2   :  { %vm1578_vm14 = vcmp.ge.f32.partialorder %v1562_v18, 0.0  ;;  %v1595_v36 = vmul.f32 0.2, %v1563_v57  ;;  %v1607_v4 = vsel %vm1575_vm11, %v1559_v7, %v1591_v15  ;;  %vm1579_vm15 = vcmp.ge.f32.partialorder %v1563_v57, 0.0  ;;  %1621 = vst [vmem:[%s3139_s5 + $0x28] sm:$0xff] %v1605_v27 }
 0x1e3   :  { %v1596_v37 = vmul.f32 0.2, %v1564_v29  ;;  %v1608_v9 = vsel %vm1576_vm12, %v1560_v50, %v1592_v61  ;;  %vm1580_vm0 = vcmp.ge.f32.partialorder %v1564_v29, 0.0  ;;  %v1597_v32 = vmul.f32 0.2, %v1565_v24  ;;  %1622 = vst [vmem:[%s3139_s5 + $0x30] sm:$0xff] %v1606_v33 }
 0x1e4   :  { %v1609_v10 = vsel %vm1577_vm13, %v1561_v11, %v1593_v26  ;;  %vm1581_vm1 = vcmp.ge.f32.partialorder %v1565_v24, 0.0  ;;  %v1598_v5 = vmul.f32 0.2, %v1566_v62  ;;  %v1610_v16 = vsel %vm1578_vm14, %v1562_v18, %v1594_v30  ;;  %1623 = vst [vmem:[%s3139_s5 + $0x38] sm:$0xff] %v1607_v4 }
 0x1e5   :  { %vm1582_vm2 = vcmp.ge.f32.partialorder %v1566_v62, 0.0  ;;  %v1599_v38 = vmul.f32 0.2, %v1567_v35  ;;  %v1611_v39 = vsel %vm1579_vm15, %v1563_v57, %v1595_v36  ;;  %1624 = vst [vmem:[%s3139_s5 + $0x40] sm:$0xff] %v1608_v9  ;;  %vm1583_vm3 = vcmp.ge.f32.partialorder %v1567_v35, 0.0 }
 0x1e6   :  { %v1612_v23 = vsel %vm1580_vm0, %v1564_v29, %v1596_v37  ;;  %1625 = vst [vmem:[%s3139_s5 + $0x48] sm:$0xff] %v1609_v10  ;;  %v1613_v42 = vsel %vm1581_vm1, %v1565_v24, %v1597_v32  ;;  %v1614_v31 = vsel %vm1582_vm2, %v1566_v62, %v1598_v5 }
 0x1e7   :  { %1626 = vst [vmem:[%s3139_s5 + $0x50] sm:$0xff] %v1610_v16  ;;  %v1615_v8 = vsel %vm1583_vm3, %v1567_v35, %v1599_v38 }
 0x1e8   :  { %1627 = vst [vmem:[%s3139_s5 + $0x58] sm:$0xff] %v1611_v39 }
 0x1e9   :  { %1628 = vst [vmem:[%s3139_s5 + $0x60] sm:$0xff] %v1612_v23 }
 0x1ea   :  { %1629 = vst [vmem:[%s3139_s5 + $0x68] sm:$0xff] %v1613_v42 }
 0x1eb   :  { %1630 = vst [vmem:[%s3139_s5 + $0x70] sm:$0xff] %v1614_v31 }
 0x1ec   :  { %1631 = vst [vmem:[%s3139_s5 + $0x78] sm:$0xff] %v1615_v8 }

// kernel: discriminator_forward.5
= control target key start
LH: loop header
LB: loop body
LE: loop exit
PB: predicated region body
PF: predicated region fallthrough
CT: control target
= control target key end

     0   :  { %s6367_s1 = inlined_call_operand.vmem [shape: bf16[2048,256], index: 1, kind: input, shape index: {}]   ;;  %s6368_s0 = inlined_call_operand.vmem [shape: bf16[32,2048], index: 0, kind: input, shape index: {}]   ;;  %s6369_s2 = inlined_call_operand.vmem [shape: f32[1,256], index: 2, kind: input, shape index: {}]   ;;  %s6370_s3 = inlined_call_operand.vmem [shape: f32[1,256], index: 3, kind: input, shape index: {}]   ;;  %s6371_s4 = inlined_call_operand.vmem [shape: f32[1,256], index: 4, kind: input, shape index: {}]   ;;  %s6372_s5 = inlined_call_operand.vmem [shape: f32[32,256], index: 5, kind: output, shape index: {}]  }
   0x1   :  { %v2894_v0 = vld [vmem:[%s6367_s1 + $0x70] sm:$0xf]  ;;  %v3907_v1 = vld [vmem:[%s6367_s1 + $0x74] sm:$0xf0]  ;;  %v2886_v11 = vld [vmem:[%s6367_s1 + $0x60] sm:$0xf] }
   0x2   :  { %v2958_v2 = vld [vmem:[%s6367_s1 + $0xf0] sm:$0xf]  ;;  %v2895_v3 = vor.u32 %v3907_v1, %v2894_v0  ;;  %v3923_v4 = vld [vmem:[%s6367_s1 + $0xf4] sm:$0xf0]  ;;  %v3905_v13 = vld [vmem:[%s6367_s1 + $0x64] sm:$0xf0] }
   0x3   :  { %v3022_v5 = vld [vmem:[%s6367_s1 + $0x170] sm:$0xf]  ;;  %v3939_v6 = vld [vmem:[%s6367_s1 + $0x174] sm:$0xf0]  ;;  %v2959_v7 = vor.u32 %v3923_v4, %v2958_v2  ;;  %v2950_v14 = vld [vmem:[%s6367_s1 + $0xe0] sm:$0xf]  ;;  %v2887_v16 = vor.u32 %v3905_v13, %v2886_v11 }
   0x4   :  { %v3023_v8 = vor.u32 %v3939_v6, %v3022_v5  ;;  %v3086_v9 = vld [vmem:[%s6367_s1 + $0x1f0] sm:$0xf]  ;;  %v3955_v10 = vld [vmem:[%s6367_s1 + $0x1f4] sm:$0xf0]  ;;  %1768 = vmatpush.bf16.msra.mxu0 %v2895_v3  ;;  %v3921_v15 = vld [vmem:[%s6367_s1 + $0xe4] sm:$0xf0] }
   0x5   :  { %v3087_v12 = vor.u32 %v3955_v10, %v3086_v9  ;;  %1787 = vmatpush.bf16.msra.mxu1 %v2959_v7  ;;  %v2951_v17 = vor.u32 %v3921_v15, %v2950_v14  ;;  %v3014_v18 = vld [vmem:[%s6367_s1 + $0x160] sm:$0xf]  ;;  %v3937_v19 = vld [vmem:[%s6367_s1 + $0x164] sm:$0xf0]  ;;  %v2878_v23 = vld [vmem:[%s6367_s1 + $0x50] sm:$0xf] }
   0x6   :  { %1806 = vmatpush.bf16.msra.mxu2 %v3023_v8  ;;  %v3078_v20 = vld [vmem:[%s6367_s1 + $0x1e0] sm:$0xf]  ;;  %v3015_v21 = vor.u32 %v3937_v19, %v3014_v18  ;;  %v3953_v22 = vld [vmem:[%s6367_s1 + $0x1e4] sm:$0xf0]  ;;  %v3903_v24 = vld [vmem:[%s6367_s1 + $0x54] sm:$0xf0] }
   0x7   :  { %1825 = vmatpush.bf16.msra.mxu3 %v3087_v12  ;;  %v3079_v25 = vor.u32 %v3953_v22, %v3078_v20  ;;  %v2942_v26 = vld [vmem:[%s6367_s1 + $0xd0] sm:$0xf]  ;;  %v3919_v27 = vld [vmem:[%s6367_s1 + $0xd4] sm:$0xf0]  ;;  %v2879_v29 = vor.u32 %v3903_v24, %v2878_v23  ;;  %v2870_v35 = vld [vmem:[%s6367_s1 + $0x40] sm:$0xf] }
   0x8   :  { %v3006_v28 = vld [vmem:[%s6367_s1 + $0x150] sm:$0xf]  ;;  %1769 = vmatpush.bf16.msra.mxu0 %v2887_v16  ;;  %v3935_v30 = vld [vmem:[%s6367_s1 + $0x154] sm:$0xf0]  ;;  %v2943_v33 = vor.u32 %v3919_v27, %v2942_v26  ;;  %v3901_v36 = vld [vmem:[%s6367_s1 + $0x44] sm:$0xf0] }
   0x9   :  { %v3070_v31 = vld [vmem:[%s6367_s1 + $0x1d0] sm:$0xf]  ;;  %v3951_v32 = vld [vmem:[%s6367_s1 + $0x1d4] sm:$0xf0]  ;;  %1788 = vmatpush.bf16.msra.mxu1 %v2951_v17  ;;  %v3007_v34 = vor.u32 %v3935_v30, %v3006_v28  ;;  %v2934_v37 = vld [vmem:[%s6367_s1 + $0xc0] sm:$0xf]  ;;  %v2871_v44 = vor.u32 %v3901_v36, %v2870_v35 }
   0xa   :  { %1807 = vmatpush.bf16.msra.mxu2 %v3015_v21  ;;  %v3071_v38 = vor.u32 %v3951_v32, %v3070_v31  ;;  %v3917_v39 = vld [vmem:[%s6367_s1 + $0xc4] sm:$0xf0]  ;;  %v2998_v40 = vld [vmem:[%s6367_s1 + $0x140] sm:$0xf]  ;;  %v2862_v47 = vld [vmem:[%s6367_s1 + $0x30] sm:$0xf] }
   0xb   :  { %1826 = vmatpush.bf16.msra.mxu3 %v3079_v25  ;;  %v3933_v41 = vld [vmem:[%s6367_s1 + $0x144] sm:$0xf0]  ;;  %v3062_v42 = vld [vmem:[%s6367_s1 + $0x1c0] sm:$0xf]  ;;  %v2935_v45 = vor.u32 %v3917_v39, %v2934_v37  ;;  %v3899_v48 = vld [vmem:[%s6367_s1 + $0x34] sm:$0xf0] }
   0xc   :  { %v3949_v43 = vld [vmem:[%s6367_s1 + $0x1c4] sm:$0xf0]  ;;  %1770 = vmatpush.bf16.msra.mxu0 %v2879_v29  ;;  %v2999_v46 = vor.u32 %v3933_v41, %v2998_v40  ;;  %v2926_v49 = vld [vmem:[%s6367_s1 + $0xb0] sm:$0xf]  ;;  %v3915_v51 = vld [vmem:[%s6367_s1 + $0xb4] sm:$0xf0]  ;;  %v2863_v56 = vor.u32 %v3899_v48, %v2862_v47 }
   0xd   :  { %1789 = vmatpush.bf16.msra.mxu1 %v2943_v33  ;;  %v3063_v50 = vor.u32 %v3949_v43, %v3062_v42  ;;  %v2990_v52 = vld [vmem:[%s6367_s1 + $0x130] sm:$0xf]  ;;  %v3931_v53 = vld [vmem:[%s6367_s1 + $0x134] sm:$0xf0]  ;;  %v2927_v57 = vor.u32 %v3915_v51, %v2926_v49  ;;  %v2854_v59 = vld [vmem:[%s6367_s1 + $0x20] sm:$0xf] }
   0xe   :  { %1808 = vmatpush.bf16.msra.mxu2 %v3007_v34  ;;  %v3054_v54 = vld [vmem:[%s6367_s1 + $0x1b0] sm:$0xf]  ;;  %v3947_v55 = vld [vmem:[%s6367_s1 + $0x1b4] sm:$0xf0]  ;;  %v2991_v58 = vor.u32 %v3931_v53, %v2990_v52  ;;  %v3897_v60 = vld [vmem:[%s6367_s1 + $0x24] sm:$0xf0] }
   0xf   :  { %1827 = vmatpush.bf16.msra.mxu3 %v3071_v38  ;;  %v2918_v61 = vld [vmem:[%s6367_s1 + $0xa0] sm:$0xf]  ;;  %v3055_v62 = vor.u32 %v3947_v55, %v3054_v54  ;;  %v3913_v63 = vld [vmem:[%s6367_s1 + $0xa4] sm:$0xf0]  ;;  %v2855_v4 = vor.u32 %v3897_v60, %v2854_v59  ;;  %v2846_v7 = vld [vmem:[%s6367_s1 + $0x10] sm:$0xf] }
  0x10   :  { %1771 = vmatpush.bf16.msra.mxu0 %v2871_v44  ;;  %v2982_v0 = vld [vmem:[%s6367_s1 + $0x120] sm:$0xf]  ;;  %v3929_v1 = vld [vmem:[%s6367_s1 + $0x124] sm:$0xf0]  ;;  %v2919_v5 = vor.u32 %v3913_v63, %v2918_v61  ;;  %v3895_v8 = vld [vmem:[%s6367_s1 + $0x14] sm:$0xf0] }
  0x11   :  { %1790 = vmatpush.bf16.msra.mxu1 %v2935_v45  ;;  %v3046_v2 = vld [vmem:[%s6367_s1 + $0x1a0] sm:$0xf]  ;;  %v3945_v3 = vld [vmem:[%s6367_s1 + $0x1a4] sm:$0xf0]  ;;  %v2983_v6 = vor.u32 %v3929_v1, %v2982_v0  ;;  %v2910_v9 = vld [vmem:[%s6367_s1 + $0x90] sm:$0xf]  ;;  %v2847_v17 = vor.u32 %v3895_v8, %v2846_v7 }
  0x12   :  { %1809 = vmatpush.bf16.msra.mxu2 %v2999_v46  ;;  %v3047_v10 = vor.u32 %v3945_v3, %v3046_v2  ;;  %v3911_v11 = vld [vmem:[%s6367_s1 + $0x94] sm:$0xf0]  ;;  %v2974_v12 = vld [vmem:[%s6367_s1 + $0x110] sm:$0xf]  ;;  %v2838_v16 = vld [vmem:[%s6367_s1] sm:$0xf] }
  0x13   :  { %1828 = vmatpush.bf16.msra.mxu3 %v3063_v50  ;;  %v3927_v13 = vld [vmem:[%s6367_s1 + $0x114] sm:$0xf0]  ;;  %v3038_v14 = vld [vmem:[%s6367_s1 + $0x190] sm:$0xf]  ;;  %v3893_v18 = vld [vmem:[%s6367_s1 + $0x4] sm:$0xf0]  ;;  %v2911_v21 = vor.u32 %v3911_v11, %v2910_v9 }
  0x14   :  { %1772 = vmatpush.bf16.msra.mxu0 %v2863_v56  ;;  %v3943_v15 = vld [vmem:[%s6367_s1 + $0x194] sm:$0xf0]  ;;  %v2902_v19 = vld [vmem:[%s6367_s1 + $0x80] sm:$0xf]  ;;  %v3909_v20 = vld [vmem:[%s6367_s1 + $0x84] sm:$0xf0]  ;;  %v2975_v22 = vor.u32 %v3927_v13, %v2974_v12  ;;  %v2839_v34 = vor.u32 %v3893_v18, %v2838_v16 }
  0x15   :  { %1791 = vmatpush.bf16.msra.mxu1 %v2927_v57  ;;  %v2966_v23 = vld [vmem:[%s6367_s1 + $0x100] sm:$0xf]  ;;  %v3925_v24 = vld [vmem:[%s6367_s1 + $0x104] sm:$0xf0]  ;;  %v3039_v26 = vor.u32 %v3943_v15, %v3038_v14  ;;  %v3860_v30 = vld [vmem:[%s6368_s0 + $0x4] sm:$0xf]  ;;  %v2903_v38 = vor.u32 %v3909_v20, %v2902_v19 }
  0x16   :  { %1810 = vmatpush.bf16.msra.mxu2 %v2991_v58  ;;  %v3030_v25 = vld [vmem:[%s6367_s1 + $0x180] sm:$0xf]  ;;  %v3941_v27 = vld [vmem:[%s6367_s1 + $0x184] sm:$0xf0]  ;;  %v2712_v31 = vld [vmem:[%s6368_s0 + $0x40] sm:$0xf0]  ;;  %v2967_v39 = vor.u32 %v3925_v24, %v2966_v23 }
  0x17   :  { %1829 = vmatpush.bf16.msra.mxu3 %v3055_v62  ;;  %v2710_v28 = vld [vmem:[%s6368_s0] sm:$0xf]  ;;  %v3278_v32 = vld [vmem:[%s6367_s1 + $0x370] sm:$0xf]  ;;  %v4003_v33 = vld [vmem:[%s6367_s1 + $0x374] sm:$0xf0]  ;;  %v3031_v43 = vor.u32 %v3941_v27, %v3030_v25  ;;  %v4467_v53 = vor.u32 %v3860_v30, %v2712_v31 }
  0x18   :  { %1773 = vmatpush.bf16.msra.mxu0 %v2855_v4  ;;  %v3868_v29 = vld [vmem:[%s6368_s0 + $0x3c] sm:$0xf0]  ;;  %v2718_v35 = vld [vmem:[%s6368_s0 + $0x8] sm:$0xf]  ;;  %v3214_v36 = vld [vmem:[%s6367_s1 + $0x2f0] sm:$0xf]  ;;  %v3279_v44 = vor.u32 %v4003_v33, %v3278_v32 }
  0x19   :  { %1792 = vmatpush.bf16.msra.mxu1 %v2919_v5  ;;  %v3987_v37 = vld [vmem:[%s6367_s1 + $0x2f4] sm:$0xf0]  ;;  %v3869_v40 = vld [vmem:[%s6368_s0 + $0x44] sm:$0xf0]  ;;  %v3861_v41 = vld [vmem:[%s6368_s0 + $0xc] sm:$0xf]  ;;  %v4456_v48 = vor.u32 %v3868_v29, %v2710_v28 }
  0x1a   :  { %1811 = vmatpush.bf16.msra.mxu2 %v2983_v6  ;;  %v2720_v42 = vld [vmem:[%s6368_s0 + $0x48] sm:$0xf0]  ;;  %v3150_v45 = vld [vmem:[%s6367_s1 + $0x270] sm:$0xf]  ;;  %v3971_v46 = vld [vmem:[%s6367_s1 + $0x274] sm:$0xf0]  ;;  %v3215_v49 = vor.u32 %v3987_v37, %v3214_v36  ;;  %v4469_v54 = vor.u32 %v3869_v40, %v2718_v35 }
  0x1b   :  { %1830 = vmatpush.bf16.msra.mxu3 %v3047_v10  ;;  %v3342_v47 = vld [vmem:[%s6367_s1 + $0x3f0] sm:$0xf]  ;;  %v4019_v50 = vld [vmem:[%s6367_s1 + $0x3f4] sm:$0xf0]  ;;  %v3270_v51 = vld [vmem:[%s6367_s1 + $0x360] sm:$0xf]  ;;  %v4477_v57 = vor.u32 %v3861_v41, %v2720_v42  ;;  %v3151_v58 = vor.u32 %v3971_v46, %v3150_v45 }
  0x1c   :  { %1774 = vmatpush.bf16.msra.mxu0 %v2847_v17  ;;  %v4001_v52 = vld [vmem:[%s6367_s1 + $0x364] sm:$0xf0]  ;;  %v3206_v55 = vld [vmem:[%s6367_s1 + $0x2e0] sm:$0xf]  ;;  %v3343_v59 = vor.u32 %v4019_v50, %v3342_v47  ;;  %v3262_v2 = vld [vmem:[%s6367_s1 + $0x350] sm:$0xf] }
  0x1d   :  { %1793 = vmatpush.bf16.msra.mxu1 %v2911_v21  ;;  %v3985_v56 = vld [vmem:[%s6367_s1 + $0x2e4] sm:$0xf0]  ;;  %v3271_v60 = vor.u32 %v4001_v52, %v3270_v51  ;;  %v3142_v61 = vld [vmem:[%s6367_s1 + $0x260] sm:$0xf]  ;;  %v3999_v3 = vld [vmem:[%s6367_s1 + $0x354] sm:$0xf0] }
  0x1e   :  { %1812 = vmatpush.bf16.msra.mxu2 %v2975_v22  ;;  %v3969_v62 = vld [vmem:[%s6367_s1 + $0x264] sm:$0xf0]  ;;  %v3334_v63 = vld [vmem:[%s6367_s1 + $0x3e0] sm:$0xf]  ;;  %v3207_v0 = vor.u32 %v3985_v56, %v3206_v55  ;;  %v3198_v4 = vld [vmem:[%s6367_s1 + $0x2d0] sm:$0xf]  ;;  %v3263_v8 = vor.u32 %v3999_v3, %v3262_v2 }
  0x1f   :  { %1831 = vmatpush.bf16.msra.mxu3 %v3039_v26  ;;  %v4017_v1 = vld [vmem:[%s6367_s1 + $0x3e4] sm:$0xf0]  ;;  %v3983_v5 = vld [vmem:[%s6367_s1 + $0x2d4] sm:$0xf0]  ;;  %v3143_v6 = vor.u32 %v3969_v62, %v3142_v61  ;;  %v3134_v9 = vld [vmem:[%s6367_s1 + $0x250] sm:$0xf] }
  0x20   :  { %1775 = vmatpush.bf16.msra.mxu0 %v2839_v34  ;;  %v3335_v7 = vor.u32 %v4017_v1, %v3334_v63  ;;  %v3967_v10 = vld [vmem:[%s6367_s1 + $0x254] sm:$0xf0]  ;;  %v3326_v11 = vld [vmem:[%s6367_s1 + $0x3d0] sm:$0xf]  ;;  %v3199_v12 = vor.u32 %v3983_v5, %v3198_v4  ;;  %v3254_v14 = vld [vmem:[%s6367_s1 + $0x340] sm:$0xf] }
  0x21   :  { %1794 = vmatpush.bf16.msra.mxu1 %v2903_v38  ;;  %v4015_v13 = vld [vmem:[%s6367_s1 + $0x3d4] sm:$0xf0]  ;;  %v3997_v15 = vld [vmem:[%s6367_s1 + $0x344] sm:$0xf0]  ;;  %v3190_v16 = vld [vmem:[%s6367_s1 + $0x2c0] sm:$0xf]  ;;  %v3135_v18 = vor.u32 %v3967_v10, %v3134_v9 }
  0x22   :  { %1813 = vmatpush.bf16.msra.mxu2 %v2967_v39  ;;  %v3981_v17 = vld [vmem:[%s6367_s1 + $0x2c4] sm:$0xf0]  ;;  %v3126_v19 = vld [vmem:[%s6367_s1 + $0x240] sm:$0xf]  ;;  %v3327_v22 = vor.u32 %v4015_v13, %v3326_v11  ;;  %v3255_v23 = vor.u32 %v3997_v15, %v3254_v14  ;;  %v3876_v28 = vld [vmem:[%s6368_s0 + $0x84] sm:$0xf] }
  0x23   :  { %1832 = vmatpush.bf16.msra.mxu3 %v3031_v43  ;;  %1776 = vmatmul.bf16.vlgmr.msra.gmra.mxu0 %v4456_v48  ;;  %v3965_v20 = vld [vmem:[%s6367_s1 + $0x244] sm:$0xf0]  ;;  %v3318_v21 = vld [vmem:[%s6367_s1 + $0x3c0] sm:$0xf]  ;;  %v3191_v27 = vor.u32 %v3981_v17, %v3190_v16  ;;  %v2776_v29 = vld [vmem:[%s6368_s0 + $0xc0] sm:$0xf0] }
  0x24   :  { %1795 = vmatmul.bf16.vlgmr.msra.gmra.mxu1 %v4467_v53  ;;  %1844 = vmatpush.bf16.msrb.mxu0 %v3151_v58  ;;  %v4013_v24 = vld [vmem:[%s6367_s1 + $0x3c4] sm:$0xf0]  ;;  %v2774_v25 = vld [vmem:[%s6368_s0 + $0x80] sm:$0xf]  ;;  %v3246_v30 = vld [vmem:[%s6367_s1 + $0x330] sm:$0xf]  ;;  %v3127_v35 = vor.u32 %v3965_v20, %v3126_v19  ;;  %v4599_v50 = vor.u32 %v3876_v28, %v2776_v29 }
  0x25   :  { %1863 = vmatpush.bf16.msrb.mxu1 %v3215_v49  ;;  %1814 = vmatmul.bf16.vlgmr.msra.gmra.mxu2 %v4469_v54  ;;  %v3884_v26 = vld [vmem:[%s6368_s0 + $0xbc] sm:$0xf0]  ;;  %v3995_v31 = vld [vmem:[%s6367_s1 + $0x334] sm:$0xf0]  ;;  %v2782_v32 = vld [vmem:[%s6368_s0 + $0x88] sm:$0xf]  ;;  %v3319_v39 = vor.u32 %v4013_v24, %v3318_v21 }
  0x26   :  { %1882 = vmatpush.bf16.msrb.mxu2 %v3279_v44  ;;  %1833 = vmatmul.bf16.vlgmr.msra.gmra.mxu3 %v4477_v57  ;;  %v3182_v33 = vld [vmem:[%s6367_s1 + $0x2b0] sm:$0xf]  ;;  %v3979_v34 = vld [vmem:[%s6367_s1 + $0x2b4] sm:$0xf0]  ;;  %v3885_v36 = vld [vmem:[%s6368_s0 + $0xc4] sm:$0xf0]  ;;  %v3247_v40 = vor.u32 %v3995_v31, %v3246_v30  ;;  %v4588_v44 = vor.u32 %v3884_v26, %v2774_v25 }
  0x27   :  { %1901 = vmatpush.bf16.msrb.mxu3 %v3343_v59  ;;  %v3877_v37 = vld [vmem:[%s6368_s0 + $0x8c] sm:$0xf]  ;;  %v3118_v41 = vld [vmem:[%s6367_s1 + $0x230] sm:$0xf]  ;;  %v3963_v42 = vld [vmem:[%s6367_s1 + $0x234] sm:$0xf0]  ;;  %v3183_v45 = vor.u32 %v3979_v34, %v3182_v33  ;;  %v4601_v51 = vor.u32 %v3885_v36, %v2782_v32 }
  0x28   :  { %1845 = vmatpush.bf16.msrb.mxu0 %v3143_v6  ;;  %v2784_v38 = vld [vmem:[%s6368_s0 + $0xc8] sm:$0xf0]  ;;  %v3310_v43 = vld [vmem:[%s6367_s1 + $0x3b0] sm:$0xf]  ;;  %v4011_v46 = vld [vmem:[%s6367_s1 + $0x3b4] sm:$0xf0]  ;;  %v3119_v58 = vor.u32 %v3963_v42, %v3118_v41 }
  0x29   :  { %1864 = vmatpush.bf16.msrb.mxu1 %v3207_v0  ;;  %v3238_v47 = vld [vmem:[%s6367_s1 + $0x320] sm:$0xf]  ;;  %v3993_v49 = vld [vmem:[%s6367_s1 + $0x324] sm:$0xf0]  ;;  %v4609_v56 = vor.u32 %v3877_v37, %v2784_v38  ;;  %v3311_v59 = vor.u32 %v4011_v46, %v3310_v43  ;;  %v3230_v2 = vld [vmem:[%s6367_s1 + $0x310] sm:$0xf] }
  0x2a   :  { %1883 = vmatpush.bf16.msrb.mxu2 %v3271_v60  ;;  %v3174_v52 = vld [vmem:[%s6367_s1 + $0x2a0] sm:$0xf]  ;;  %v3977_v55 = vld [vmem:[%s6367_s1 + $0x2a4] sm:$0xf0]  ;;  %v3239_v60 = vor.u32 %v3993_v49, %v3238_v47  ;;  %v3991_v3 = vld [vmem:[%s6367_s1 + $0x314] sm:$0xf0] }
  0x2b   :  { %1902 = vmatpush.bf16.msrb.mxu3 %v3335_v7  ;;  %v3110_v61 = vld [vmem:[%s6367_s1 + $0x220] sm:$0xf]  ;;  %v3961_v62 = vld [vmem:[%s6367_s1 + $0x224] sm:$0xf0]  ;;  %v3175_v0 = vor.u32 %v3977_v55, %v3174_v52  ;;  %v3166_v4 = vld [vmem:[%s6367_s1 + $0x290] sm:$0xf]  ;;  %v3231_v9 = vor.u32 %v3991_v3, %v3230_v2 }
  0x2c   :  { %1846 = vmatpush.bf16.msrb.mxu0 %v3135_v18  ;;  %v3302_v63 = vld [vmem:[%s6367_s1 + $0x3a0] sm:$0xf]  ;;  %v4009_v1 = vld [vmem:[%s6367_s1 + $0x3a4] sm:$0xf0]  ;;  %v3975_v5 = vld [vmem:[%s6367_s1 + $0x294] sm:$0xf0]  ;;  %v3111_v6 = vor.u32 %v3961_v62, %v3110_v61 }
  0x2d   :  { %1865 = vmatpush.bf16.msrb.mxu1 %v3199_v12  ;;  %v3102_v7 = vld [vmem:[%s6367_s1 + $0x210] sm:$0xf]  ;;  %v3959_v10 = vld [vmem:[%s6367_s1 + $0x214] sm:$0xf0]  ;;  %v3167_v13 = vor.u32 %v3975_v5, %v3166_v4  ;;  %v3222_v14 = vld [vmem:[%s6367_s1 + $0x300] sm:$0xf] }
  0x2e   :  { %1884 = vmatpush.bf16.msrb.mxu2 %v3263_v8  ;;  %v3303_v8 = vor.u32 %v4009_v1, %v3302_v63  ;;  %v3294_v11 = vld [vmem:[%s6367_s1 + $0x390] sm:$0xf]  ;;  %v4007_v12 = vld [vmem:[%s6367_s1 + $0x394] sm:$0xf0]  ;;  %v3989_v15 = vld [vmem:[%s6367_s1 + $0x304] sm:$0xf0]  ;;  %v3103_v20 = vor.u32 %v3959_v10, %v3102_v7 }
  0x2f   :  { %1903 = vmatpush.bf16.msrb.mxu3 %v3327_v22  ;;  %v3158_v16 = vld [vmem:[%s6367_s1 + $0x280] sm:$0xf]  ;;  %v3973_v17 = vld [vmem:[%s6367_s1 + $0x284] sm:$0xf0]  ;;  %v3534_v18 = vld [vmem:[%s6367_s1 + $0x570] sm:$0xf]  ;;  %v3295_v24 = vor.u32 %v4007_v12, %v3294_v11  ;;  %v3223_v25 = vor.u32 %v3989_v15, %v3222_v14 }
  0x30   :  { %1847 = vmatpush.bf16.msrb.mxu0 %v3127_v35  ;;  %v4067_v19 = vld [vmem:[%s6367_s1 + $0x574] sm:$0xf0]  ;;  %v3094_v21 = vld [vmem:[%s6367_s1 + $0x200] sm:$0xf]  ;;  %v3470_v22 = vld [vmem:[%s6367_s1 + $0x4f0] sm:$0xf]  ;;  %v3159_v29 = vor.u32 %v3973_v17, %v3158_v16 }
  0x31   :  { %1866 = vmatpush.bf16.msrb.mxu1 %v3191_v27  ;;  %v3957_v26 = vld [vmem:[%s6367_s1 + $0x204] sm:$0xf0]  ;;  %v3286_v27 = vld [vmem:[%s6367_s1 + $0x380] sm:$0xf]  ;;  %v2726_v30 = vld [vmem:[%s6368_s0 + $0x10] sm:$0xf]  ;;  %v3535_v34 = vor.u32 %v4067_v19, %v3534_v18 }
  0x32   :  { %1885 = vmatpush.bf16.msrb.mxu2 %v3255_v23  ;;  %v4051_v23 = vld [vmem:[%s6367_s1 + $0x4f4] sm:$0xf0]  ;;  %v4005_v28 = vld [vmem:[%s6367_s1 + $0x384] sm:$0xf0]  ;;  %v3870_v31 = vld [vmem:[%s6368_s0 + $0x4c] sm:$0xf0]  ;;  %v3095_v42 = vor.u32 %v3957_v26, %v3094_v21 }
  0x33   :  { %1904 = vmatpush.bf16.msrb.mxu3 %v3319_v39  ;;  %1781 = vmatmul.bf16.gmra.mxu0 %v4588_v44  ;;  %v3862_v32 = vld [vmem:[%s6368_s0 + $0x14] sm:$0xf]  ;;  %v3406_v35 = vld [vmem:[%s6367_s1 + $0x470] sm:$0xf]  ;;  %v4035_v36 = vld [vmem:[%s6367_s1 + $0x474] sm:$0xf0]  ;;  %v3471_v38 = vor.u32 %v4051_v23, %v3470_v22  ;;  %v3287_v47 = vor.u32 %v4005_v28, %v3286_v27 }
  0x34   :  { %1800 = vmatmul.bf16.gmra.mxu1 %v4599_v50  ;;  %1848 = vmatpush.bf16.msrb.mxu0 %v3119_v58  ;;  %v2728_v33 = vld [vmem:[%s6368_s0 + $0x50] sm:$0xf0]  ;;  %v3598_v37 = vld [vmem:[%s6367_s1 + $0x5f0] sm:$0xf]  ;;  %v4083_v39 = vld [vmem:[%s6367_s1 + $0x5f4] sm:$0xf0]  ;;  %v3407_v52 = vor.u32 %v4035_v36, %v3406_v35 }
  0x35   :  { %1867 = vmatpush.bf16.msrb.mxu1 %v3183_v45  ;;  %1819 = vmatmul.bf16.gmra.mxu2 %v4601_v51  ;;  %v4065_v41 = vld [vmem:[%s6367_s1 + $0x564] sm:$0xf0]  ;;  %v2734_v43 = vld [vmem:[%s6368_s0 + $0x18] sm:$0xf]  ;;  %v3863_v46 = vld [vmem:[%s6368_s0 + $0x1c] sm:$0xf]  ;;  %v4746_v1 = vor.u32 %v3862_v32, %v2728_v33 }
  0x36   :  { %1886 = vmatpush.bf16.msrb.mxu2 %v3247_v40  ;;  %1838 = vmatmul.bf16.gmra.mxu3 %v4609_v56  ;;  %v3526_v40 = vld [vmem:[%s6367_s1 + $0x560] sm:$0xf]  ;;  %v3871_v45 = vld [vmem:[%s6368_s0 + $0x54] sm:$0xf0]  ;;  %v2736_v49 = vld [vmem:[%s6368_s0 + $0x58] sm:$0xf0] }
  0x37   :  { %1905 = vmatpush.bf16.msrb.mxu3 %v3311_v59  ;;  %v3398_v55 = vld [vmem:[%s6367_s1 + $0x460] sm:$0xf]  ;;  %v4033_v58 = vld [vmem:[%s6367_s1 + $0x464] sm:$0xf0]  ;;  %v3599_v59 = vor.u32 %v4083_v39, %v3598_v37  ;;  %v3518_v3 = vld [vmem:[%s6367_s1 + $0x550] sm:$0xf]  ;;  %v4757_v5 = vor.u32 %v3871_v45, %v2734_v43 }
  0x38   :  { %1849 = vmatpush.bf16.msrb.mxu0 %v3111_v6  ;;  %v3462_v61 = vld [vmem:[%s6367_s1 + $0x4e0] sm:$0xf]  ;;  %v4049_v62 = vld [vmem:[%s6367_s1 + $0x4e4] sm:$0xf0]  ;;  %v4063_v4 = vld [vmem:[%s6367_s1 + $0x554] sm:$0xf0]  ;;  %v4759_v6 = vor.u32 %v3863_v46, %v2736_v49  ;;  %v3399_v7 = vor.u32 %v4033_v58, %v3398_v55 }
  0x39   :  { %1868 = vmatpush.bf16.msrb.mxu1 %v3175_v0  ;;  %v3590_v63 = vld [vmem:[%s6367_s1 + $0x5e0] sm:$0xf]  ;;  %v4744_v0 = vor.u32 %v3870_v31, %v2726_v30  ;;  %v4081_v2 = vld [vmem:[%s6367_s1 + $0x5e4] sm:$0xf0]  ;;  %v4031_v10 = vld [vmem:[%s6367_s1 + $0x454] sm:$0xf0]  ;;  %v3519_v12 = vor.u32 %v4063_v4, %v3518_v3 }
  0x3a   :  { %1887 = vmatpush.bf16.msrb.mxu2 %v3239_v60  ;;  %v3527_v60 = vor.u32 %v4065_v41, %v3526_v40  ;;  %v3591_v11 = vor.u32 %v4081_v2, %v3590_v63  ;;  %v4047_v14 = vld [vmem:[%s6367_s1 + $0x4d4] sm:$0xf0]  ;;  %v3582_v15 = vld [vmem:[%s6367_s1 + $0x5d0] sm:$0xf]  ;;  %v3510_v17 = vld [vmem:[%s6367_s1 + $0x540] sm:$0xf] }
  0x3b   :  { %1906 = vmatpush.bf16.msrb.mxu3 %v3303_v8  ;;  %v3463_v8 = vor.u32 %v4049_v62, %v3462_v61  ;;  %v4079_v16 = vld [vmem:[%s6367_s1 + $0x5d4] sm:$0xf0]  ;;  %v4061_v18 = vld [vmem:[%s6367_s1 + $0x544] sm:$0xf0]  ;;  %v3382_v21 = vld [vmem:[%s6367_s1 + $0x440] sm:$0xf] }
  0x3c   :  { %1850 = vmatpush.bf16.msrb.mxu0 %v3103_v20  ;;  %v4029_v22 = vld [vmem:[%s6367_s1 + $0x444] sm:$0xf0]  ;;  %v3583_v23 = vor.u32 %v4079_v16, %v3582_v15  ;;  %v3574_v27 = vld [vmem:[%s6367_s1 + $0x5c0] sm:$0xf]  ;;  %v4059_v30 = vld [vmem:[%s6367_s1 + $0x534] sm:$0xf0] }
  0x3d   :  { %1869 = vmatpush.bf16.msrb.mxu1 %v3167_v13  ;;  %v3454_v13 = vld [vmem:[%s6367_s1 + $0x4d0] sm:$0xf]  ;;  %v4045_v26 = vld [vmem:[%s6367_s1 + $0x4c4] sm:$0xf0]  ;;  %v3383_v31 = vor.u32 %v4029_v22, %v3382_v21  ;;  %v2792_v39 = vld [vmem:[%s6368_s0 + $0xd0] sm:$0xf0] }
  0x3e   :  { %1888 = vmatpush.bf16.msrb.mxu2 %v3231_v9  ;;  %v3390_v9 = vld [vmem:[%s6367_s1 + $0x450] sm:$0xf]  ;;  %v3455_v20 = vor.u32 %v4047_v14, %v3454_v13  ;;  %v4077_v28 = vld [vmem:[%s6367_s1 + $0x5c4] sm:$0xf0]  ;;  %v4075_v45 = vld [vmem:[%s6367_s1 + $0x5b4] sm:$0xf0] }
  0x3f   :  { %1907 = vmatpush.bf16.msrb.mxu3 %v3295_v24  ;;  %v3391_v19 = vor.u32 %v4031_v10, %v3390_v9  ;;  %v3511_v24 = vor.u32 %v4061_v18, %v3510_v17  ;;  %v3374_v33 = vld [vmem:[%s6367_s1 + $0x430] sm:$0xf]  ;;  %v3575_v35 = vor.u32 %v4077_v28, %v3574_v27  ;;  %v3494_v46 = vld [vmem:[%s6367_s1 + $0x520] sm:$0xf]  ;;  %v2798_v49 = vld [vmem:[%s6368_s0 + $0x98] sm:$0xf] }
  0x40   :  { %1851 = vmatpush.bf16.msrb.mxu0 %v3095_v42  ;;  %v2790_v36 = vld [vmem:[%s6368_s0 + $0x90] sm:$0xf]  ;;  %v4043_v42 = vld [vmem:[%s6367_s1 + $0x4b4] sm:$0xf0]  ;;  %v3879_v55 = vld [vmem:[%s6368_s0 + $0x9c] sm:$0xf] }
  0x41   :  { %1870 = vmatpush.bf16.msrb.mxu1 %v3159_v29  ;;  %v3502_v29 = vld [vmem:[%s6367_s1 + $0x530] sm:$0xf]  ;;  %v2800_v58 = vld [vmem:[%s6368_s0 + $0xd8] sm:$0xf0]  ;;  %v3366_v61 = vld [vmem:[%s6367_s1 + $0x420] sm:$0xf] }
  0x42   :  { %1889 = vmatpush.bf16.msrb.mxu2 %v3223_v25  ;;  %v3446_v25 = vld [vmem:[%s6367_s1 + $0x4c0] sm:$0xf]  ;;  %v3886_v37 = vld [vmem:[%s6368_s0 + $0xcc] sm:$0xf0]  ;;  %v3503_v40 = vor.u32 %v4059_v30, %v3502_v29  ;;  %v4025_v62 = vld [vmem:[%s6367_s1 + $0x424] sm:$0xf0]  ;;  %v4891_v14 = vor.u32 %v3879_v55, %v2800_v58 }
  0x43   :  { %1908 = vmatpush.bf16.msrb.mxu3 %v3287_v47  ;;  %1852 = vmatmul.bf16.vlgmr.msrb.gmra.mxu0 %v4744_v0  ;;  %v3447_v32 = vor.u32 %v4045_v26, %v3446_v25  ;;  %v3438_v41 = vld [vmem:[%s6367_s1 + $0x4b0] sm:$0xf]  ;;  %v4057_v47 = vld [vmem:[%s6367_s1 + $0x524] sm:$0xf0]  ;;  %v3430_v3 = vld [vmem:[%s6367_s1 + $0x4a0] sm:$0xf]  ;;  %v3367_v15 = vor.u32 %v4025_v62, %v3366_v61 }
  0x44   :  { %1920 = vmatpush.bf16.msra.mxu0 %v3407_v52  ;;  %1871 = vmatmul.bf16.vlgmr.msrb.gmra.mxu1 %v4746_v1  ;;  %v3566_v43 = vld [vmem:[%s6367_s1 + $0x5b0] sm:$0xf]  ;;  %v3887_v52 = vld [vmem:[%s6368_s0 + $0xd4] sm:$0xf0]  ;;  %v3495_v2 = vor.u32 %v4057_v47, %v3494_v46  ;;  %v4041_v4 = vld [vmem:[%s6367_s1 + $0x4a4] sm:$0xf0] }
  0x45   :  { %1939 = vmatpush.bf16.msra.mxu1 %v3471_v38  ;;  %1890 = vmatmul.bf16.vlgmr.msrb.gmra.mxu2 %v4757_v5  ;;  %v3878_v38 = vld [vmem:[%s6368_s0 + $0x94] sm:$0xf]  ;;  %v3567_v63 = vor.u32 %v4075_v45, %v3566_v43  ;;  %v4073_v10 = vld [vmem:[%s6367_s1 + $0x5a4] sm:$0xf0]  ;;  %v4889_v13 = vor.u32 %v3887_v52, %v2798_v49  ;;  %v3431_v16 = vor.u32 %v4041_v4, %v3430_v3  ;;  %v3358_v17 = vld [vmem:[%s6367_s1 + $0x410] sm:$0xf] }
  0x46   :  { %1958 = vmatpush.bf16.msra.mxu2 %v3535_v34  ;;  %1909 = vmatmul.bf16.vlgmr.msrb.gmra.mxu3 %v4759_v6  ;;  %v4027_v34 = vld [vmem:[%s6367_s1 + $0x434] sm:$0xf0]  ;;  %v4878_v9 = vor.u32 %v3878_v38, %v2792_v39  ;;  %v3422_v21 = vld [vmem:[%s6367_s1 + $0x490] sm:$0xf]  ;;  %v3478_v25 = vld [vmem:[%s6367_s1 + $0x500] sm:$0xf] }
  0x47   :  { %1977 = vmatpush.bf16.msra.mxu3 %v3599_v59  ;;  %v3375_v59 = vor.u32 %v4027_v34, %v3374_v33  ;;  %v4023_v18 = vld [vmem:[%s6367_s1 + $0x414] sm:$0xf0]  ;;  %v4053_v26 = vld [vmem:[%s6367_s1 + $0x504] sm:$0xf0]  ;;  %v3790_v27 = vld [vmem:[%s6367_s1 + $0x770] sm:$0xf] }
  0x48   :  { %1921 = vmatpush.bf16.msra.mxu0 %v3399_v7  ;;  %v3558_v7 = vld [vmem:[%s6367_s1 + $0x5a0] sm:$0xf]  ;;  %v4039_v22 = vld [vmem:[%s6367_s1 + $0x494] sm:$0xf0]  ;;  %v3359_v29 = vor.u32 %v4023_v18, %v3358_v17  ;;  %v4069_v38 = vld [vmem:[%s6367_s1 + $0x584] sm:$0xf0] }
  0x49   :  { %1940 = vmatpush.bf16.msra.mxu1 %v3463_v8  ;;  %v4876_v8 = vor.u32 %v3886_v37, %v2790_v36  ;;  %v4131_v28 = vld [vmem:[%s6367_s1 + $0x774] sm:$0xf0]  ;;  %v3423_v30 = vor.u32 %v4039_v22, %v3422_v21  ;;  %v3414_v33 = vld [vmem:[%s6367_s1 + $0x480] sm:$0xf]  ;;  %v4037_v36 = vld [vmem:[%s6367_s1 + $0x484] sm:$0xf0] }
  0x4a   :  { %1959 = vmatpush.bf16.msra.mxu2 %v3527_v60  ;;  %v3439_v60 = vor.u32 %v4043_v42, %v3438_v41  ;;  %v3542_v37 = vld [vmem:[%s6367_s1 + $0x580] sm:$0xf]  ;;  %v3791_v39 = vor.u32 %v4131_v28, %v3790_v27  ;;  %v4099_v41 = vld [vmem:[%s6367_s1 + $0x674] sm:$0xf0]  ;;  %v3726_v42 = vld [vmem:[%s6367_s1 + $0x6f0] sm:$0xf]  ;;  %v3415_v49 = vor.u32 %v4037_v36, %v3414_v33 }
  0x4b   :  { %1978 = vmatpush.bf16.msra.mxu3 %v3591_v11  ;;  %v3486_v11 = vld [vmem:[%s6367_s1 + $0x510] sm:$0xf]  ;;  %v4115_v43 = vld [vmem:[%s6367_s1 + $0x6f4] sm:$0xf0]  ;;  %v3782_v52 = vld [vmem:[%s6367_s1 + $0x760] sm:$0xf]  ;;  %v3543_v58 = vor.u32 %v4069_v38, %v3542_v37 }
  0x4c   :  { %1922 = vmatpush.bf16.msra.mxu0 %v3391_v19  ;;  %v3559_v19 = vor.u32 %v4073_v10, %v3558_v7  ;;  %v3854_v45 = vld [vmem:[%s6367_s1 + $0x7f0] sm:$0xf]  ;;  %v4147_v46 = vld [vmem:[%s6367_s1 + $0x7f4] sm:$0xf0]  ;;  %v4129_v55 = vld [vmem:[%s6367_s1 + $0x764] sm:$0xf0] }
  0x4d   :  { %1941 = vmatpush.bf16.msra.mxu1 %v3455_v20  ;;  %v3864_v61 = vld [vmem:[%s6368_s0 + $0x24] sm:$0xf]  ;;  %v3855_v3 = vor.u32 %v4147_v46, %v3854_v45  ;;  %v3654_v4 = vld [vmem:[%s6367_s1 + $0x660] sm:$0xf]  ;;  %v4097_v7 = vld [vmem:[%s6367_s1 + $0x664] sm:$0xf0] }
  0x4e   :  { %1960 = vmatpush.bf16.msra.mxu2 %v3519_v12  ;;  %v4055_v12 = vld [vmem:[%s6367_s1 + $0x514] sm:$0xf0]  ;;  %v2750_v10 = vld [vmem:[%s6368_s0 + $0x28] sm:$0xf]  ;;  %v3718_v17 = vld [vmem:[%s6367_s1 + $0x6e0] sm:$0xf] }
  0x4f   :  { %1979 = vmatpush.bf16.msra.mxu3 %v3583_v23  ;;  %v3487_v20 = vor.u32 %v4055_v12, %v3486_v11  ;;  %v3550_v23 = vld [vmem:[%s6367_s1 + $0x590] sm:$0xf]  ;;  %v3873_v11 = vld [vmem:[%s6368_s0 + $0x64] sm:$0xf0]  ;;  %v3865_v12 = vld [vmem:[%s6368_s0 + $0x2c] sm:$0xf] }
  0x50   :  { %1923 = vmatpush.bf16.msra.mxu0 %v3383_v31  ;;  %v3350_v31 = vld [vmem:[%s6367_s1 + $0x400] sm:$0xf]  ;;  %v4113_v18 = vld [vmem:[%s6367_s1 + $0x6e4] sm:$0xf0]  ;;  %v3774_v22 = vld [vmem:[%s6367_s1 + $0x750] sm:$0xf]  ;;  %v5027_v28 = vor.u32 %v3873_v11, %v2750_v10 }
  0x51   :  { %1942 = vmatpush.bf16.msra.mxu1 %v3447_v32  ;;  %v4021_v32 = vld [vmem:[%s6367_s1 + $0x404] sm:$0xf0]  ;;  %v4095_v27 = vld [vmem:[%s6367_s1 + $0x654] sm:$0xf0]  ;;  %v3838_v36 = vld [vmem:[%s6367_s1 + $0x7d0] sm:$0xf] }
  0x52   :  { %1961 = vmatpush.bf16.msra.mxu2 %v3511_v24  ;;  %v4071_v24 = vld [vmem:[%s6367_s1 + $0x594] sm:$0xf0]  ;;  %v3351_v47 = vor.u32 %v4021_v32, %v3350_v31  ;;  %v4145_v21 = vld [vmem:[%s6367_s1 + $0x7e4] sm:$0xf0]  ;;  %v3710_v32 = vld [vmem:[%s6367_s1 + $0x6d0] sm:$0xf] }
  0x53   :  { %1980 = vmatpush.bf16.msra.mxu3 %v3575_v35  ;;  %1857 = vmatmul.bf16.gmra.mxu0 %v4876_v8  ;;  %v3551_v34 = vor.u32 %v4071_v24, %v3550_v23  ;;  %v3479_v35 = vor.u32 %v4053_v26, %v3478_v25  ;;  %v4127_v25 = vld [vmem:[%s6367_s1 + $0x754] sm:$0xf0]  ;;  %v3646_v26 = vld [vmem:[%s6367_s1 + $0x650] sm:$0xf]  ;;  %v3766_v38 = vld [vmem:[%s6367_s1 + $0x740] sm:$0xf] }
  0x54   :  { %1924 = vmatpush.bf16.msra.mxu0 %v3375_v59  ;;  %1876 = vmatmul.bf16.gmra.mxu1 %v4878_v9  ;;  %v2742_v59 = vld [vmem:[%s6368_s0 + $0x20] sm:$0xf]  ;;  %v4111_v33 = vld [vmem:[%s6367_s1 + $0x6d4] sm:$0xf0]  ;;  %v4109_v46 = vld [vmem:[%s6367_s1 + $0x6c4] sm:$0xf0] }
  0x55   :  { %1943 = vmatpush.bf16.msra.mxu1 %v3439_v60  ;;  %1895 = vmatmul.bf16.gmra.mxu2 %v4889_v13  ;;  %v3872_v60 = vld [vmem:[%s6368_s0 + $0x5c] sm:$0xf0]  ;;  %v4143_v37 = vld [vmem:[%s6367_s1 + $0x7d4] sm:$0xf0]  ;;  %v3880_v10 = vld [vmem:[%s6368_s0 + $0xa4] sm:$0xf] }
  0x56   :  { %1962 = vmatpush.bf16.msra.mxu2 %v3503_v40  ;;  %1914 = vmatmul.bf16.gmra.mxu3 %v4891_v14  ;;  %v3662_v40 = vld [vmem:[%s6367_s1 + $0x670] sm:$0xf]  ;;  %v5014_v23 = vor.u32 %v3872_v60, %v2742_v59  ;;  %v3702_v45 = vld [vmem:[%s6367_s1 + $0x6c0] sm:$0xf]  ;;  %v4123_v59 = vld [vmem:[%s6367_s1 + $0x734] sm:$0xf0] }
  0x57   :  { %1981 = vmatpush.bf16.msra.mxu3 %v3567_v63  ;;  %v3663_v62 = vor.u32 %v4099_v41, %v3662_v40  ;;  %v2744_v63 = vld [vmem:[%s6368_s0 + $0x60] sm:$0xf0]  ;;  %v3638_v40 = vld [vmem:[%s6367_s1 + $0x640] sm:$0xf]  ;;  %v4093_v41 = vld [vmem:[%s6367_s1 + $0x644] sm:$0xf0] }
  0x58   :  { %1925 = vmatpush.bf16.msra.mxu0 %v3367_v15  ;;  %v3783_v15 = vor.u32 %v4129_v55, %v3782_v52  ;;  %v5016_v24 = vor.u32 %v3864_v61, %v2744_v63  ;;  %v3830_v52 = vld [vmem:[%s6367_s1 + $0x7c0] sm:$0xf]  ;;  %v4141_v55 = vld [vmem:[%s6367_s1 + $0x7c4] sm:$0xf0]  ;;  %v3630_v60 = vld [vmem:[%s6367_s1 + $0x630] sm:$0xf] }
  0x59   :  { %1944 = vmatpush.bf16.msra.mxu1 %v3431_v16  ;;  %v2752_v16 = vld [vmem:[%s6368_s0 + $0x68] sm:$0xf0]  ;;  %v4091_v61 = vld [vmem:[%s6367_s1 + $0x634] sm:$0xf0]  ;;  %v3831_v63 = vor.u32 %v4141_v55, %v3830_v52  ;;  %v2808_v11 = vld [vmem:[%s6368_s0 + $0xe0] sm:$0xf0] }
  0x5a   :  { %1963 = vmatpush.bf16.msra.mxu2 %v3495_v2  ;;  %v3727_v2 = vor.u32 %v4115_v43, %v3726_v42  ;;  %v3711_v42 = vor.u32 %v4111_v33, %v3710_v32  ;;  %v3839_v43 = vor.u32 %v4143_v37, %v3838_v36  ;;  %v3686_v32 = vld [vmem:[%s6367_s1 + $0x6a0] sm:$0xf]  ;;  %v4105_v33 = vld [vmem:[%s6367_s1 + $0x6a4] sm:$0xf0]  ;;  %v3678_v52 = vld [vmem:[%s6367_s1 + $0x690] sm:$0xf] }
  0x5b   :  { %1982 = vmatpush.bf16.msra.mxu3 %v3559_v19  ;;  %v3655_v19 = vor.u32 %v4097_v7, %v3654_v4  ;;  %v2806_v4 = vld [vmem:[%s6368_s0 + $0xa0] sm:$0xf]  ;;  %v4137_v37 = vld [vmem:[%s6367_s1 + $0x7a4] sm:$0xf0]  ;;  %v4103_v55 = vld [vmem:[%s6367_s1 + $0x694] sm:$0xf0] }
  0x5c   :  { %1926 = vmatpush.bf16.msra.mxu0 %v3359_v29  ;;  %v5029_v29 = vor.u32 %v3865_v12, %v2752_v16  ;;  %v3888_v7 = vld [vmem:[%s6368_s0 + $0xdc] sm:$0xf0]  ;;  %v3822_v16 = vld [vmem:[%s6367_s1 + $0x7b0] sm:$0xf] }
  0x5d   :  { %1945 = vmatpush.bf16.msra.mxu1 %v3423_v30  ;;  %v3719_v30 = vor.u32 %v4113_v18, %v3718_v17  ;;  %v4139_v17 = vld [vmem:[%s6367_s1 + $0x7b4] sm:$0xf0]  ;;  %v3750_v18 = vld [vmem:[%s6367_s1 + $0x720] sm:$0xf] }
  0x5e   :  { %1964 = vmatpush.bf16.msra.mxu2 %v3487_v20  ;;  %v3846_v20 = vld [vmem:[%s6367_s1 + $0x7e0] sm:$0xf] }
  0x5f   :  { %1983 = vmatpush.bf16.msra.mxu3 %v3551_v34  ;;  %v3847_v31 = vor.u32 %v4145_v21, %v3846_v20  ;;  %v3775_v34 = vor.u32 %v4127_v25, %v3774_v22  ;;  %v3622_v20 = vld [vmem:[%s6367_s1 + $0x620] sm:$0xf]  ;;  %v4089_v21 = vld [vmem:[%s6367_s1 + $0x624] sm:$0xf0] }
  0x60   :  { %1927 = vmatpush.bf16.msra.mxu0 %v3351_v47  ;;  %v2814_v22 = vld [vmem:[%s6368_s0 + $0xa8] sm:$0xf]  ;;  %v3814_v36 = vld [vmem:[%s6367_s1 + $0x7a0] sm:$0xf] }
  0x61   :  { %1946 = vmatpush.bf16.msra.mxu1 %v3415_v49  ;;  %v3639_v49 = vor.u32 %v4093_v41, %v3638_v40  ;;  %v3889_v25 = vld [vmem:[%s6368_s0 + $0xe4] sm:$0xf0]  ;;  %v5148_v40 = vor.u32 %v3880_v10, %v2808_v11  ;;  %v4119_v41 = vld [vmem:[%s6367_s1 + $0x714] sm:$0xf0]  ;;  %v3906_v10 = vld [vmem:[%s6367_s1 + $0x74] sm:$0xf] }
  0x62   :  { %1965 = vmatpush.bf16.msra.mxu2 %v3479_v35  ;;  %v3647_v35 = vor.u32 %v4095_v27, %v3646_v26  ;;  %v3881_v26 = vld [vmem:[%s6368_s0 + $0xac] sm:$0xf]  ;;  %v2896_v11 = vld [vmem:[%s6367_s1 + $0x78] sm:$0xf0] }
  0x63   :  { %1984 = vmatpush.bf16.msra.mxu3 %v3543_v58  ;;  %1928 = vmatmul.bf16.vlgmr.msra.gmra.mxu0 %v5014_v23  ;;  %v3758_v58 = vld [vmem:[%s6367_s1 + $0x730] sm:$0xf]  ;;  %v2816_v27 = vld [vmem:[%s6368_s0 + $0xe8] sm:$0xf0] }
  0x64   :  { %1996 = vmatpush.bf16.msrb.mxu0 %v3663_v62  ;;  %1947 = vmatmul.bf16.vlgmr.msra.gmra.mxu1 %v5016_v24  ;;  %v3703_v62 = vor.u32 %v4109_v46, %v3702_v45  ;;  %v3759_v12 = vor.u32 %v4123_v59, %v3758_v58  ;;  %v5159_v45 = vor.u32 %v3889_v25, %v2814_v22  ;;  %v3806_v58 = vld [vmem:[%s6367_s1 + $0x790] sm:$0xf]  ;;  %v3922_v22 = vld [vmem:[%s6367_s1 + $0xf4] sm:$0xf]  ;;  %v2960_v25 = vld [vmem:[%s6367_s1 + $0xf8] sm:$0xf0] }
  0x65   :  { %2015 = vmatpush.bf16.msrb.mxu1 %v3727_v2  ;;  %1966 = vmatmul.bf16.vlgmr.msra.gmra.mxu2 %v5027_v28  ;;  %v3694_v2 = vld [vmem:[%s6367_s1 + $0x6b0] sm:$0xf]  ;;  %v5161_v46 = vor.u32 %v3881_v26, %v2816_v27  ;;  %v2899_v27 = vor.u32 %v3906_v10, %v2896_v11 }
  0x66   :  { %2034 = vmatpush.bf16.msrb.mxu2 %v3791_v39  ;;  %v4125_v39 = vld [vmem:[%s6367_s1 + $0x744] sm:$0xf0]  ;;  %1985 = vmatmul.bf16.vlgmr.msra.gmra.mxu3 %v5029_v29 }
  0x67   :  { %2053 = vmatpush.bf16.msrb.mxu3 %v3855_v3  ;;  %v3767_v47 = vor.u32 %v4125_v39, %v3766_v38  ;;  %v4107_v3 = vld [vmem:[%s6367_s1 + $0x6b4] sm:$0xf0]  ;;  %v3742_v38 = vld [vmem:[%s6367_s1 + $0x710] sm:$0xf]  ;;  %v5146_v39 = vor.u32 %v3888_v7, %v2806_v4  ;;  %v3938_v4 = vld [vmem:[%s6367_s1 + $0x174] sm:$0xf] }
  0x68   :  { %1997 = vmatpush.bf16.msrb.mxu0 %v3655_v19  ;;  %v4121_v19 = vld [vmem:[%s6367_s1 + $0x724] sm:$0xf0]  ;;  %v3743_v59 = vor.u32 %v4119_v41, %v3742_v38  ;;  %v3024_v7 = vld [vmem:[%s6367_s1 + $0x178] sm:$0xf0]  ;;  %v2758_v38 = vld [vmem:[%s6368_s0 + $0x30] sm:$0xf] }
  0x69   :  { %2016 = vmatpush.bf16.msrb.mxu1 %v3719_v30  ;;  %v3695_v30 = vor.u32 %v4107_v3, %v3694_v2  ;;  %v3606_v2 = vld [vmem:[%s6367_s1 + $0x600] sm:$0xf]  ;;  %v4085_v3 = vld [vmem:[%s6367_s1 + $0x604] sm:$0xf0]  ;;  %v3027_v26 = vor.u32 %v3938_v4, %v3024_v7  ;;  %v3874_v41 = vld [vmem:[%s6368_s0 + $0x6c] sm:$0xf0] }
  0x6a   :  { %2035 = vmatpush.bf16.msrb.mxu2 %v3783_v15  ;;  %v3631_v15 = vor.u32 %v4091_v61, %v3630_v60  ;;  %v4135_v61 = vld [vmem:[%s6367_s1 + $0x794] sm:$0xf0]  ;;  %v3934_v4 = vld [vmem:[%s6367_s1 + $0x154] sm:$0xf]  ;;  %v3008_v7 = vld [vmem:[%s6367_s1 + $0x158] sm:$0xf0] }
  0x6b   :  { %2054 = vmatpush.bf16.msrb.mxu3 %v3847_v31  ;;  %v3823_v31 = vor.u32 %v4139_v17, %v3822_v16  ;;  %v3670_v16 = vld [vmem:[%s6367_s1 + $0x680] sm:$0xf]  ;;  %v4101_v17 = vld [vmem:[%s6367_s1 + $0x684] sm:$0xf0] }
  0x6c   :  { %1998 = vmatpush.bf16.msrb.mxu0 %v3647_v35  ;;  %v3623_v35 = vor.u32 %v4089_v21, %v3622_v20  ;;  %v3607_v20 = vor.u32 %v4085_v3, %v3606_v2  ;;  %v4133_v21 = vld [vmem:[%s6367_s1 + $0x784] sm:$0xf0]  ;;  %v3867_v2 = vld [vmem:[%s6368_s0 + $0x3c] sm:$0xf] }
  0x6d   :  { %2017 = vmatpush.bf16.msrb.mxu1 %v3711_v42  ;;  %v3614_v42 = vld [vmem:[%s6367_s1 + $0x610] sm:$0xf]  ;;  %v2768_v3 = vld [vmem:[%s6368_s0 + $0x78] sm:$0xf0] }
  0x6e   :  { %2036 = vmatpush.bf16.msrb.mxu2 %v3775_v34  ;;  %v3751_v34 = vor.u32 %v4121_v19, %v3750_v18  ;;  %v3798_v18 = vld [vmem:[%s6367_s1 + $0x780] sm:$0xf] }
  0x6f   :  { %2055 = vmatpush.bf16.msrb.mxu3 %v3839_v43  ;;  %v4087_v43 = vld [vmem:[%s6367_s1 + $0x614] sm:$0xf0] }
  0x70   :  { %1999 = vmatpush.bf16.msrb.mxu0 %v3639_v49  ;;  %v3815_v49 = vor.u32 %v4137_v37, %v3814_v36  ;;  %v3615_v60 = vor.u32 %v4087_v43, %v3614_v42  ;;  %v3671_v36 = vor.u32 %v4101_v17, %v3670_v16  ;;  %v3799_v37 = vor.u32 %v4133_v21, %v3798_v18  ;;  %v3866_v42 = vld [vmem:[%s6368_s0 + $0x34] sm:$0xf]  ;;  %v3072_v21 = vld [vmem:[%s6367_s1 + $0x1d8] sm:$0xf0] }
  0x71   :  { %2018 = vmatpush.bf16.msrb.mxu1 %v3703_v62  ;;  %v3734_v62 = vld [vmem:[%s6367_s1 + $0x700] sm:$0xf]  ;;  %v2760_v43 = vld [vmem:[%s6368_s0 + $0x70] sm:$0xf0]  ;;  %v5290_v17 = vor.u32 %v3874_v41, %v2758_v38  ;;  %v3948_v38 = vld [vmem:[%s6367_s1 + $0x1c4] sm:$0xf] }
  0x72   :  { %2037 = vmatpush.bf16.msrb.mxu2 %v3767_v47  ;;  %v3687_v47 = vor.u32 %v4105_v33, %v3686_v32  ;;  %v3936_v32 = vld [vmem:[%s6367_s1 + $0x164] sm:$0xf]  ;;  %v3016_v33 = vld [vmem:[%s6367_s1 + $0x168] sm:$0xf0]  ;;  %v3918_v16 = vld [vmem:[%s6367_s1 + $0xd4] sm:$0xf]  ;;  %v5292_v18 = vor.u32 %v3866_v42, %v2760_v43 }
  0x73   :  { %2056 = vmatpush.bf16.msrb.mxu3 %v3831_v63  ;;  %v4117_v63 = vld [vmem:[%s6367_s1 + $0x704] sm:$0xf0]  ;;  %1933 = vmatmul.bf16.gmra.mxu0 %v5146_v39  ;;  %v3064_v41 = vld [vmem:[%s6367_s1 + $0x1c8] sm:$0xf0] }
  0x74   :  { %2000 = vmatpush.bf16.msrb.mxu0 %v3631_v15  ;;  %1952 = vmatmul.bf16.gmra.mxu1 %v5148_v40  ;;  %v3807_v15 = vor.u32 %v4135_v61, %v3806_v58  ;;  %v3735_v19 = vor.u32 %v4117_v63, %v3734_v62  ;;  %v3080_v61 = vld [vmem:[%s6367_s1 + $0x1e8] sm:$0xf0]  ;;  %v2766_v62 = vld [vmem:[%s6368_s0 + $0x38] sm:$0xf] }
  0x75   :  { %2019 = vmatpush.bf16.msrb.mxu1 %v3695_v30  ;;  %1971 = vmatmul.bf16.gmra.mxu2 %v5159_v45  ;;  %v3954_v30 = vld [vmem:[%s6367_s1 + $0x1f4] sm:$0xf]  ;;  %v3875_v63 = vld [vmem:[%s6368_s0 + $0x74] sm:$0xf0] }
  0x76   :  { %2038 = vmatpush.bf16.msrb.mxu2 %v3759_v12  ;;  %1990 = vmatmul.bf16.gmra.mxu3 %v5161_v46  ;;  %v3679_v12 = vor.u32 %v4103_v55, %v3678_v52  ;;  %v3920_v52 = vld [vmem:[%s6367_s1 + $0xe4] sm:$0xf]  ;;  %v3019_v55 = vor.u32 %v3936_v32, %v3016_v33 }
  0x77   :  { %2057 = vmatpush.bf16.msrb.mxu3 %v3823_v31  ;;  %v3088_v31 = vld [vmem:[%s6367_s1 + $0x1f8] sm:$0xf0] }
  0x78   :  { %2001 = vmatpush.bf16.msrb.mxu0 %v3623_v35  ;;  %v2888_v35 = vld [vmem:[%s6367_s1 + $0x68] sm:$0xf0] }
  0x79   :  { %2020 = vmatpush.bf16.msrb.mxu1 %v3687_v47  ;;  %v2963_v47 = vor.u32 %v3922_v22, %v2960_v25  ;;  %v5303_v22 = vor.u32 %v3875_v63, %v2766_v62  ;;  %v5305_v25 = vor.u32 %v3867_v2, %v2768_v3  ;;  %v3946_v62 = vld [vmem:[%s6367_s1 + $0x1b4] sm:$0xf]  ;;  %v3056_v63 = vld [vmem:[%s6367_s1 + $0x1b8] sm:$0xf0] }
  0x7a   :  { %2039 = vmatpush.bf16.msrb.mxu2 %v3751_v34  ;;  %v3904_v34 = vld [vmem:[%s6367_s1 + $0x64] sm:$0xf] }
  0x7b   :  { %2058 = vmatpush.bf16.msrb.mxu3 %v3815_v49  ;;  %v3091_v49 = vor.u32 %v3954_v30, %v3088_v31  ;;  %v2891_v58 = vor.u32 %v3904_v34, %v2888_v35  ;;  %v3932_v30 = vld [vmem:[%s6367_s1 + $0x144] sm:$0xf]  ;;  %v3000_v31 = vld [vmem:[%s6367_s1 + $0x148] sm:$0xf0] }
  0x7c   :  { %2002 = vmatpush.bf16.msrb.mxu0 %v3615_v60  ;;  %v3952_v60 = vld [vmem:[%s6367_s1 + $0x1e4] sm:$0xf]  ;;  %v2872_v35 = vld [vmem:[%s6367_s1 + $0x48] sm:$0xf0]  ;;  %v3003_v42 = vor.u32 %v3932_v30, %v3000_v31 }
  0x7d   :  { %2021 = vmatpush.bf16.msrb.mxu1 %v3679_v12  ;;  %v3083_v11 = vor.u32 %v3952_v60, %v3080_v61  ;;  %v3902_v12 = vld [vmem:[%s6367_s1 + $0x54] sm:$0xf]  ;;  %v3900_v34 = vld [vmem:[%s6367_s1 + $0x44] sm:$0xf]  ;;  %v2928_v61 = vld [vmem:[%s6367_s1 + $0xb8] sm:$0xf0] }
  0x7e   :  { %2040 = vmatpush.bf16.msrb.mxu2 %v3743_v59  ;;  %v2952_v59 = vld [vmem:[%s6367_s1 + $0xe8] sm:$0xf0]  ;;  %v2875_v43 = vor.u32 %v3900_v34, %v2872_v35  ;;  %v3914_v60 = vld [vmem:[%s6367_s1 + $0xb4] sm:$0xf]  ;;  %v3944_v30 = vld [vmem:[%s6367_s1 + $0x1a4] sm:$0xf] }
  0x7f   :  { %2059 = vmatpush.bf16.msrb.mxu3 %v3807_v15  ;;  %v2955_v10 = vor.u32 %v3920_v52, %v2952_v59  ;;  %v2880_v15 = vld [vmem:[%s6367_s1 + $0x58] sm:$0xf0]  ;;  %v3048_v31 = vld [vmem:[%s6367_s1 + $0x1a8] sm:$0xf0] }
  0x80   :  { %2003 = vmatpush.bf16.msrb.mxu0 %v3607_v20  ;;  %v3950_v20 = vld [vmem:[%s6367_s1 + $0x1d4] sm:$0xf]  ;;  %v2864_v59 = vld [vmem:[%s6367_s1 + $0x38] sm:$0xf0] }
  0x81   :  { %2022 = vmatpush.bf16.msrb.mxu1 %v3671_v36  ;;  %v3075_v33 = vor.u32 %v3950_v20, %v3072_v21  ;;  %v3916_v36 = vld [vmem:[%s6367_s1 + $0xc4] sm:$0xf]  ;;  %v2856_v21 = vld [vmem:[%s6367_s1 + $0x28] sm:$0xf0]  ;;  %v3883_v34 = vld [vmem:[%s6368_s0 + $0xbc] sm:$0xf] }
  0x82   :  { %2041 = vmatpush.bf16.msrb.mxu2 %v3735_v19  ;;  %v2944_v19 = vld [vmem:[%s6367_s1 + $0xd8] sm:$0xf0]  ;;  %v3896_v20 = vld [vmem:[%s6367_s1 + $0x24] sm:$0xf] }
  0x83   :  { %2060 = vmatpush.bf16.msrb.mxu3 %v3799_v37  ;;  %v2947_v32 = vor.u32 %v3918_v16, %v2944_v19  ;;  %2004 = vmatmul.bf16.vlgmr.msrb.gmra.mxu0 %v5290_v17  ;;  %v2936_v37 = vld [vmem:[%s6367_s1 + $0xc8] sm:$0xf0]  ;;  %v2931_v16 = vor.u32 %v3914_v60, %v2928_v61  ;;  %v3059_v19 = vor.u32 %v3946_v62, %v3056_v63  ;;  %v2832_v35 = vld [vmem:[%s6368_s0 + $0xf8] sm:$0xf0]  ;;  %v3942_v60 = vld [vmem:[%s6367_s1 + $0x194] sm:$0xf] }
  0x84   :  { %2072 = vmatpush.bf16.msra.mxu0 %v2899_v27  ;;  %v2883_v27 = vor.u32 %v3902_v12, %v2880_v15  ;;  %2023 = vmatmul.bf16.vlgmr.msrb.gmra.mxu1 %v5292_v18  ;;  %v2939_v52 = vor.u32 %v3916_v36, %v2936_v37  ;;  %v3882_v12 = vld [vmem:[%s6368_s0 + $0xb4] sm:$0xf]  ;;  %v2859_v37 = vor.u32 %v3896_v20, %v2856_v21  ;;  %v3040_v61 = vld [vmem:[%s6367_s1 + $0x198] sm:$0xf0]  ;;  %v3940_v20 = vld [vmem:[%s6367_s1 + $0x184] sm:$0xf] }
  0x85   :  { %2091 = vmatpush.bf16.msra.mxu1 %v2963_v47  ;;  %2042 = vmatmul.bf16.vlgmr.msrb.gmra.mxu2 %v5303_v22  ;;  %v3930_v47 = vld [vmem:[%s6367_s1 + $0x134] sm:$0xf]  ;;  %v5437_v63 = vor.u32 %v3883_v34, %v2832_v35  ;;  %v3032_v21 = vld [vmem:[%s6367_s1 + $0x188] sm:$0xf0]  ;;  %v3216_v35 = vld [vmem:[%s6367_s1 + $0x2f8] sm:$0xf0] }
  0x86   :  { %2110 = vmatpush.bf16.msra.mxu2 %v3027_v26  ;;  %v3011_v26 = vor.u32 %v3934_v4, %v3008_v7  ;;  %2061 = vmatmul.bf16.vlgmr.msrb.gmra.mxu3 %v5305_v25  ;;  %v3928_v4 = vld [vmem:[%s6367_s1 + $0x124] sm:$0xf]  ;;  %v2984_v7 = vld [vmem:[%s6367_s1 + $0x128] sm:$0xf0]  ;;  %v2824_v15 = vld [vmem:[%s6368_s0 + $0xf0] sm:$0xf0] }
  0x87   :  { %2129 = vmatpush.bf16.msra.mxu3 %v3091_v49  ;;  %v2992_v49 = vld [vmem:[%s6367_s1 + $0x138] sm:$0xf0]  ;;  %v2987_v36 = vor.u32 %v3928_v4, %v2984_v7  ;;  %v2968_v7 = vld [vmem:[%s6367_s1 + $0x108] sm:$0xf0] }
  0x88   :  { %2073 = vmatpush.bf16.msra.mxu0 %v2891_v58  ;;  %v3898_v58 = vld [vmem:[%s6367_s1 + $0x34] sm:$0xf]  ;;  %v2995_v2 = vor.u32 %v3930_v47, %v2992_v49  ;;  %v2848_v49 = vld [vmem:[%s6367_s1 + $0x18] sm:$0xf0] }
  0x89   :  { %2092 = vmatpush.bf16.msra.mxu1 %v2955_v10  ;;  %v2867_v3 = vor.u32 %v3898_v58, %v2864_v59  ;;  %v2822_v10 = vld [vmem:[%s6368_s0 + $0xb0] sm:$0xf]  ;;  %v3894_v47 = vld [vmem:[%s6367_s1 + $0x14] sm:$0xf]  ;;  %v5424_v58 = vor.u32 %v3882_v12, %v2824_v15  ;;  %v2912_v59 = vld [vmem:[%s6367_s1 + $0x98] sm:$0xf0]  ;;  %v3043_v15 = vor.u32 %v3942_v60, %v3040_v61 }
  0x8a   :  { %2111 = vmatpush.bf16.msra.mxu2 %v3019_v55  ;;  %v3067_v55 = vor.u32 %v3948_v38, %v3064_v41  ;;  %v3926_v38 = vld [vmem:[%s6367_s1 + $0x114] sm:$0xf]  ;;  %v2976_v41 = vld [vmem:[%s6367_s1 + $0x118] sm:$0xf0]  ;;  %v2851_v4 = vor.u32 %v3894_v47, %v2848_v49  ;;  %v4000_v47 = vld [vmem:[%s6367_s1 + $0x364] sm:$0xf] }
  0x8b   :  { %2130 = vmatpush.bf16.msra.mxu3 %v3083_v11  ;;  %v3890_v11 = vld [vmem:[%s6368_s0 + $0xec] sm:$0xf0]  ;;  %v3272_v49 = vld [vmem:[%s6367_s1 + $0x368] sm:$0xf0]  ;;  %v3968_v60 = vld [vmem:[%s6367_s1 + $0x264] sm:$0xf] }
  0x8c   :  { %2074 = vmatpush.bf16.msra.mxu0 %v2883_v27  ;;  %v2920_v27 = vld [vmem:[%s6367_s1 + $0xa8] sm:$0xf0] }
  0x8d   :  { %2093 = vmatpush.bf16.msra.mxu1 %v2947_v32  ;;  %v2830_v32 = vld [vmem:[%s6368_s0 + $0xb8] sm:$0xf]  ;;  %v3144_v61 = vld [vmem:[%s6367_s1 + $0x268] sm:$0xf0] }
  0x8e   :  { %2112 = vmatpush.bf16.msra.mxu2 %v3011_v26  ;;  %v3912_v26 = vld [vmem:[%s6367_s1 + $0xa4] sm:$0xf] }
  0x8f   :  { %2131 = vmatpush.bf16.msra.mxu3 %v3075_v33  ;;  %v3891_v33 = vld [vmem:[%s6368_s0 + $0xf4] sm:$0xf0] }
  0x90   :  { %2075 = vmatpush.bf16.msra.mxu0 %v2875_v43  ;;  %v3051_v43 = vor.u32 %v3944_v30, %v3048_v31  ;;  %v5435_v62 = vor.u32 %v3891_v33, %v2830_v32  ;;  %v3970_v30 = vld [vmem:[%s6367_s1 + $0x274] sm:$0xf]  ;;  %v3152_v31 = vld [vmem:[%s6367_s1 + $0x278] sm:$0xf0] }
  0x91   :  { %2094 = vmatpush.bf16.msra.mxu1 %v2939_v52  ;;  %v3910_v52 = vld [vmem:[%s6367_s1 + $0x94] sm:$0xf] }
  0x92   :  { %2113 = vmatpush.bf16.msra.mxu2 %v3003_v42  ;;  %v2923_v42 = vor.u32 %v3912_v26, %v2920_v27  ;;  %v2915_v12 = vor.u32 %v3910_v52, %v2912_v59  ;;  %v4002_v26 = vld [vmem:[%s6367_s1 + $0x374] sm:$0xf]  ;;  %v3280_v27 = vld [vmem:[%s6367_s1 + $0x378] sm:$0xf0] }
  0x93   :  { %2132 = vmatpush.bf16.msra.mxu3 %v3067_v55  ;;  %v5422_v55 = vor.u32 %v3890_v11, %v2822_v10  ;;  %v3892_v10 = vld [vmem:[%s6367_s1 + $0x4] sm:$0xf]  ;;  %v2840_v11 = vld [vmem:[%s6367_s1 + $0x8] sm:$0xf0]  ;;  %v3986_v32 = vld [vmem:[%s6367_s1 + $0x2f4] sm:$0xf] }
  0x94   :  { %2076 = vmatpush.bf16.msra.mxu0 %v2867_v3  ;;  %v2979_v3 = vor.u32 %v3926_v38, %v2976_v41  ;;  %2028 = vmatmul.bf16.gmra.mxu1 %v5424_v58  ;;  %v2843_v34 = vor.u32 %v3892_v10, %v2840_v11  ;;  %v3035_v41 = vor.u32 %v3940_v20, %v3032_v21  ;;  %v3966_v20 = vld [vmem:[%s6367_s1 + $0x254] sm:$0xf]  ;;  %v3136_v21 = vld [vmem:[%s6367_s1 + $0x258] sm:$0xf0] }
  0x95   :  { %2095 = vmatpush.bf16.msra.mxu1 %v2931_v16  ;;  %v3908_v16 = vld [vmem:[%s6367_s1 + $0x84] sm:$0xf]  ;;  %2009 = vmatmul.bf16.gmra.mxu0 %v5422_v55  ;;  %v3219_v52 = vor.u32 %v3986_v32, %v3216_v35  ;;  %v3275_v10 = vor.u32 %v4000_v47, %v3272_v49  ;;  %v3147_v11 = vor.u32 %v3968_v60, %v3144_v61  ;;  %v3328_v32 = vld [vmem:[%s6367_s1 + $0x3d8] sm:$0xf0]  ;;  %v3128_v47 = vld [vmem:[%s6367_s1 + $0x248] sm:$0xf0] }
  0x96   :  { %2114 = vmatpush.bf16.msra.mxu2 %v2995_v2  ;;  %v3924_v2 = vld [vmem:[%s6367_s1 + $0x104] sm:$0xf]  ;;  %2066 = vmatmul.bf16.gmra.mxu3 %v5437_v63  ;;  %v3320_v60 = vld [vmem:[%s6367_s1 + $0x3c8] sm:$0xf0]  ;;  %v3994_v61 = vld [vmem:[%s6367_s1 + $0x334] sm:$0xf] }
  0x97   :  { %2133 = vmatpush.bf16.msra.mxu3 %v3059_v19  ;;  %v2904_v19 = vld [vmem:[%s6367_s1 + $0x88] sm:$0xf0]  ;;  %2047 = vmatmul.bf16.gmra.mxu2 %v5435_v62  ;;  %v2971_v33 = vor.u32 %v3924_v2, %v2968_v7  ;;  %v3984_v2 = vld [vmem:[%s6367_s1 + $0x2e4] sm:$0xf] }
  0x98   :  { %2077 = vmatpush.bf16.msra.mxu0 %v2859_v37  ;;  %v3344_v37 = vld [vmem:[%s6367_s1 + $0x3f8] sm:$0xf0]  ;;  %v2907_v38 = vor.u32 %v3908_v16, %v2904_v19  ;;  %v3336_v7 = vld [vmem:[%s6367_s1 + $0x3e8] sm:$0xf0]  ;;  %v3998_v16 = vld [vmem:[%s6367_s1 + $0x354] sm:$0xf] }
  0x99   :  { %2096 = vmatpush.bf16.msra.mxu1 %v2923_v42  ;;  %v3283_v42 = vor.u32 %v4002_v26, %v3280_v27  ;;  %v3264_v19 = vld [vmem:[%s6367_s1 + $0x358] sm:$0xf0]  ;;  %v3982_v26 = vld [vmem:[%s6367_s1 + $0x2d4] sm:$0xf]  ;;  %v3980_v49 = vld [vmem:[%s6367_s1 + $0x2c4] sm:$0xf] }
  0x9a   :  { %2115 = vmatpush.bf16.msra.mxu2 %v2987_v36  ;;  %v4018_v36 = vld [vmem:[%s6367_s1 + $0x3f4] sm:$0xf]  ;;  %v3267_v35 = vor.u32 %v3998_v16, %v3264_v19  ;;  %v3184_v16 = vld [vmem:[%s6367_s1 + $0x2b8] sm:$0xf0] }
  0x9b   :  { %2134 = vmatpush.bf16.msra.mxu3 %v3051_v43  ;;  %v3155_v43 = vor.u32 %v3970_v30, %v3152_v31  ;;  %v3347_v59 = vor.u32 %v4018_v36, %v3344_v37  ;;  %v3200_v30 = vld [vmem:[%s6367_s1 + $0x2d8] sm:$0xf0]  ;;  %v4014_v31 = vld [vmem:[%s6367_s1 + $0x3d4] sm:$0xf]  ;;  %v3139_v36 = vor.u32 %v3966_v20, %v3136_v21  ;;  %v3996_v37 = vld [vmem:[%s6367_s1 + $0x344] sm:$0xf] }
  0x9c   :  { %2078 = vmatpush.bf16.msra.mxu0 %v2851_v4  ;;  %v4016_v4 = vld [vmem:[%s6367_s1 + $0x3e4] sm:$0xf]  ;;  %v4010_v19 = vld [vmem:[%s6367_s1 + $0x3b4] sm:$0xf]  ;;  %v3312_v20 = vld [vmem:[%s6367_s1 + $0x3b8] sm:$0xf0] }
  0x9d   :  { %2097 = vmatpush.bf16.msra.mxu1 %v2915_v12 }
  0x9e   :  { %2116 = vmatpush.bf16.msra.mxu2 %v2979_v3  ;;  %v3208_v3 = vld [vmem:[%s6367_s1 + $0x2e8] sm:$0xf0] }
  0x9f   :  { %2135 = vmatpush.bf16.msra.mxu3 %v3043_v15  ;;  %v3211_v12 = vor.u32 %v3984_v2, %v3208_v3  ;;  %v3339_v15 = vor.u32 %v4016_v4, %v3336_v7  ;;  %v3248_v2 = vld [vmem:[%s6367_s1 + $0x338] sm:$0xf0] }
  0xa0   :  { %2079 = vmatpush.bf16.msra.mxu0 %v2843_v34  ;;  %v1777_v27 = vpop.f32.mrf.mxu0 }
  0xa1   :  { %2098 = vmatpush.bf16.msra.mxu1 %v2907_v38  ;;  %v3256_v38 = vld [vmem:[%s6367_s1 + $0x348] sm:$0xf0] }
  0xa2   :  { %2117 = vmatpush.bf16.msra.mxu2 %v2971_v33  ;;  %v1796_v33 = vpop.f32.mrf.mxu1 }
  0xa3   :  { %2136 = vmatpush.bf16.msra.mxu3 %v3035_v41  ;;  %v1797_v34 = vadd.f32 %v1796_v33, %v1777_v27  ;;  %v3203_v41 = vor.u32 %v3982_v26, %v3200_v30  ;;  %v3251_v26 = vor.u32 %v3994_v61, %v3248_v2  ;;  %v3240_v33 = vld [vmem:[%s6367_s1 + $0x328] sm:$0xf0]  ;;  %v3958_v61 = vld [vmem:[%s6367_s1 + $0x214] sm:$0xf]  ;;  %v3104_v2 = vld [vmem:[%s6367_s1 + $0x218] sm:$0xf0] }
  0xa4   :  { %2148 = vmatpush.bf16.msrb.mxu0 %v3155_v43  ;;  %v3964_v43 = vld [vmem:[%s6367_s1 + $0x244] sm:$0xf]  ;;  %2099 = vmatmul.bf16.vlgmr.msra.gmra.mxu1 %v4467_v53 }
  0xa5   :  { %2167 = vmatpush.bf16.msrb.mxu1 %v3219_v52  ;;  %2080 = vmatmul.bf16.vlgmr.msra.gmra.mxu0 %v4456_v48  ;;  %v3192_v52 = vld [vmem:[%s6367_s1 + $0x2c8] sm:$0xf0]  ;;  %v3259_v48 = vor.u32 %v3996_v37, %v3256_v38  ;;  %v3131_v53 = vor.u32 %v3964_v43, %v3128_v47  ;;  %v3976_v38 = vld [vmem:[%s6367_s1 + $0x2a4] sm:$0xf] }
  0xa6   :  { %2186 = vmatpush.bf16.msrb.mxu2 %v3283_v42  ;;  %v3331_v42 = vor.u32 %v4014_v31, %v3328_v32  ;;  %2137 = vmatmul.bf16.vlgmr.msra.gmra.mxu3 %v4477_v57  ;;  %v3195_v4 = vor.u32 %v3980_v49, %v3192_v52  ;;  %v3120_v57 = vld [vmem:[%s6367_s1 + $0x238] sm:$0xf0]  ;;  %v3992_v32 = vld [vmem:[%s6367_s1 + $0x324] sm:$0xf]  ;;  %v3112_v37 = vld [vmem:[%s6367_s1 + $0x228] sm:$0xf0] }
  0xa7   :  { %2205 = vmatpush.bf16.msrb.mxu3 %v3347_v59  ;;  %v4012_v59 = vld [vmem:[%s6367_s1 + $0x3c4] sm:$0xf]  ;;  %2118 = vmatmul.bf16.vlgmr.msra.gmra.mxu2 %v4469_v54  ;;  %v3962_v54 = vld [vmem:[%s6367_s1 + $0x234] sm:$0xf]  ;;  %v3304_v43 = vld [vmem:[%s6367_s1 + $0x3a8] sm:$0xf0]  ;;  %v3243_v47 = vor.u32 %v3992_v32, %v3240_v33 }
  0xa8   :  { %2149 = vmatpush.bf16.msrb.mxu0 %v3147_v11  ;;  %v1815_v3 = vpop.f32.mrf.mxu2  ;;  %v3323_v7 = vor.u32 %v4012_v59, %v3320_v60  ;;  %v3123_v31 = vor.u32 %v3962_v54, %v3120_v57  ;;  %v3990_v52 = vld [vmem:[%s6367_s1 + $0x314] sm:$0xf]  ;;  %v3232_v59 = vld [vmem:[%s6367_s1 + $0x318] sm:$0xf0] }
  0xa9   :  { %2168 = vmatpush.bf16.msrb.mxu1 %v3211_v12  ;;  %v1816_v11 = vadd.f32 %v1815_v3, %v1797_v34  ;;  %v1834_v12 = vpop.f32.mrf.mxu3  ;;  %v3974_v3 = vld [vmem:[%s6367_s1 + $0x294] sm:$0xf]  ;;  %v3168_v57 = vld [vmem:[%s6367_s1 + $0x298] sm:$0xf0] }
  0xaa   :  { %2187 = vmatpush.bf16.msrb.mxu2 %v3275_v10  ;;  %v3978_v10 = vld [vmem:[%s6367_s1 + $0x2b4] sm:$0xf]  ;;  %v1798_v21 = vpop.f32.mrf.mxu1  ;;  %v3171_v32 = vor.u32 %v3974_v3, %v3168_v57 }
  0xab   :  { %2206 = vmatpush.bf16.msrb.mxu3 %v3339_v15  ;;  %v1779_v15 = vpop.f32.mrf.mxu0  ;;  %v5591_v27 = vadd.f32 %v1834_v12, %v1816_v11  ;;  %v3187_v34 = vor.u32 %v3978_v10, %v3184_v16  ;;  %v4006_v10 = vld [vmem:[%s6367_s1 + $0x394] sm:$0xf]  ;;  %v3296_v11 = vld [vmem:[%s6367_s1 + $0x398] sm:$0xf0]  ;;  %v3988_v16 = vld [vmem:[%s6367_s1 + $0x304] sm:$0xf] }
  0xac   :  { %2150 = vmatpush.bf16.msrb.mxu0 %v3139_v36  ;;  %v1799_v30 = vadd.f32 %v1798_v21, %v1779_v15  ;;  %v3960_v36 = vld [vmem:[%s6367_s1 + $0x224] sm:$0xf]  ;;  %v3235_v15 = vor.u32 %v3990_v52, %v3232_v59  ;;  %v3107_v21 = vor.u32 %v3958_v61, %v3104_v2  ;;  %v3299_v33 = vor.u32 %v4006_v10, %v3296_v11 }
  0xad   :  { %2169 = vmatpush.bf16.msrb.mxu1 %v3203_v41  ;;  %v3176_v41 = vld [vmem:[%s6367_s1 + $0x2a8] sm:$0xf0]  ;;  %v3115_v49 = vor.u32 %v3960_v36, %v3112_v37  ;;  %v4004_v36 = vld [vmem:[%s6367_s1 + $0x384] sm:$0xf] }
  0xae   :  { %2188 = vmatpush.bf16.msrb.mxu2 %v3267_v35  ;;  %v3315_v35 = vor.u32 %v4010_v19, %v3312_v20  ;;  %v3288_v37 = vld [vmem:[%s6367_s1 + $0x388] sm:$0xf0]  ;;  %v4032_v11 = vld [vmem:[%s6367_s1 + $0x464] sm:$0xf] }
  0xaf   :  { %2207 = vmatpush.bf16.msrb.mxu3 %v3331_v42  ;;  %v4008_v42 = vld [vmem:[%s6367_s1 + $0x3a4] sm:$0xf] }
  0xb0   :  { %2151 = vmatpush.bf16.msrb.mxu0 %v3131_v53  ;;  %v1817_v60 = vpop.f32.mrf.mxu2  ;;  %v3307_v53 = vor.u32 %v4008_v42, %v3304_v43  ;;  %v4050_v42 = vld [vmem:[%s6367_s1 + $0x4f4] sm:$0xf] }
  0xb1   :  { %2170 = vmatpush.bf16.msrb.mxu1 %v3195_v4  ;;  %v1818_v4 = vadd.f32 %v1817_v60, %v1799_v30  ;;  %v3956_v30 = vld [vmem:[%s6367_s1 + $0x204] sm:$0xf]  ;;  %v3291_v60 = vor.u32 %v4004_v36, %v3288_v37  ;;  %v3520_v36 = vld [vmem:[%s6367_s1 + $0x558] sm:$0xf0] }
  0xb2   :  { %2189 = vmatpush.bf16.msrb.mxu2 %v3259_v48  ;;  %v3179_v48 = vor.u32 %v3976_v38, %v3176_v41  ;;  %v1801_v12 = vpop.f32.mrf.mxu1  ;;  %v4066_v38 = vld [vmem:[%s6367_s1 + $0x574] sm:$0xf]  ;;  %v3536_v41 = vld [vmem:[%s6367_s1 + $0x578] sm:$0xf0] }
  0xb3   :  { %2208 = vmatpush.bf16.msrb.mxu3 %v3323_v7  ;;  %v1836_v7 = vpop.f32.mrf.mxu3  ;;  %v1782_v54 = vpop.f32.mrf.mxu0  ;;  %v3539_v2 = vor.u32 %v4066_v38, %v3536_v41  ;;  %v4030_v38 = vld [vmem:[%s6367_s1 + $0x454] sm:$0xf]  ;;  %v3392_v41 = vld [vmem:[%s6367_s1 + $0x458] sm:$0xf0] }
  0xb4   :  { %2152 = vmatpush.bf16.msrb.mxu0 %v3123_v31  ;;  %v5644_v19 = vadd.f32 %v1836_v7, %v1818_v4  ;;  %v1802_v20 = vadd.f32 %v1801_v12, %v1782_v54  ;;  %v3096_v31 = vld [vmem:[%s6367_s1 + $0x208] sm:$0xf0]  ;;  %2104 = vmatmul.bf16.gmra.mxu1 %v4599_v50  ;;  %v3408_v50 = vld [vmem:[%s6367_s1 + $0x478] sm:$0xf0]  ;;  %v4064_v4 = vld [vmem:[%s6367_s1 + $0x564] sm:$0xf] }
  0xb5   :  { %2171 = vmatpush.bf16.msrb.mxu1 %v3187_v34  ;;  %v3972_v34 = vld [vmem:[%s6367_s1 + $0x284] sm:$0xf]  ;;  %2085 = vmatmul.bf16.gmra.mxu0 %v4588_v44  ;;  %v4034_v44 = vld [vmem:[%s6367_s1 + $0x474] sm:$0xf]  ;;  %v3528_v7 = vld [vmem:[%s6367_s1 + $0x568] sm:$0xf0] }
  0xb6   :  { %2190 = vmatpush.bf16.msrb.mxu2 %v3251_v26  ;;  %v3224_v26 = vld [vmem:[%s6367_s1 + $0x308] sm:$0xf0]  ;;  %2142 = vmatmul.bf16.gmra.mxu3 %v4609_v56  ;;  %v4082_v56 = vld [vmem:[%s6367_s1 + $0x5f4] sm:$0xf]  ;;  %v3411_v3 = vor.u32 %v4034_v44, %v3408_v50 }
  0xb7   :  { %2209 = vmatpush.bf16.msrb.mxu3 %v3315_v35  ;;  %v3160_v35 = vld [vmem:[%s6367_s1 + $0x288] sm:$0xf0]  ;;  %2123 = vmatmul.bf16.gmra.mxu2 %v4601_v51  ;;  %v3227_v43 = vor.u32 %v3988_v16, %v3224_v26  ;;  %v3472_v51 = vld [vmem:[%s6367_s1 + $0x4f8] sm:$0xf0]  ;;  %v4080_v26 = vld [vmem:[%s6367_s1 + $0x5e4] sm:$0xf] }
  0xb8   :  { %2153 = vmatpush.bf16.msrb.mxu0 %v3115_v49  ;;  %v3600_v49 = vld [vmem:[%s6367_s1 + $0x5f8] sm:$0xf0]  ;;  %v1820_v52 = vpop.f32.mrf.mxu2  ;;  %v3163_v59 = vor.u32 %v3972_v34, %v3160_v35  ;;  %v3475_v57 = vor.u32 %v4050_v42, %v3472_v51  ;;  %v3400_v12 = vld [vmem:[%s6367_s1 + $0x468] sm:$0xf0]  ;;  %v4062_v35 = vld [vmem:[%s6367_s1 + $0x554] sm:$0xf] }
  0xb9   :  { %2172 = vmatpush.bf16.msrb.mxu1 %v3179_v48  ;;  %v1821_v48 = vadd.f32 %v1820_v52, %v1802_v20  ;;  %v3603_v10 = vor.u32 %v4082_v56, %v3600_v49  ;;  %v4046_v44 = vld [vmem:[%s6367_s1 + $0x4d4] sm:$0xf]  ;;  %v3584_v51 = vld [vmem:[%s6367_s1 + $0x5d8] sm:$0xf0] }
  0xba   :  { %2191 = vmatpush.bf16.msrb.mxu2 %v3243_v47  ;;  %v3099_v47 = vor.u32 %v3956_v30, %v3096_v31  ;;  %v1803_v54 = vpop.f32.mrf.mxu1  ;;  %v3592_v30 = vld [vmem:[%s6367_s1 + $0x5e8] sm:$0xf0]  ;;  %v3531_v31 = vor.u32 %v4064_v4, %v3528_v7  ;;  %v4028_v4 = vld [vmem:[%s6367_s1 + $0x444] sm:$0xf] }
  0xbb   :  { %2210 = vmatpush.bf16.msrb.mxu3 %v3307_v53  ;;  %v1839_v53 = vpop.f32.mrf.mxu3  ;;  %v1784_v61 = vpop.f32.mrf.mxu0  ;;  %v3595_v34 = vor.u32 %v4080_v26, %v3592_v30  ;;  %v4044_v7 = vld [vmem:[%s6367_s1 + $0x4c4] sm:$0xf]  ;;  %v4042_v26 = vld [vmem:[%s6367_s1 + $0x4b4] sm:$0xf] }
  0xbc   :  { %2154 = vmatpush.bf16.msrb.mxu0 %v3107_v21  ;;  %v5710_v16 = vadd.f32 %v1839_v53, %v1821_v48  ;;  %v1804_v20 = vadd.f32 %v1803_v54, %v1784_v61  ;;  %v3464_v21 = vld [vmem:[%s6367_s1 + $0x4e8] sm:$0xf0]  ;;  %v3395_v48 = vor.u32 %v4030_v38, %v3392_v41  ;;  %v4060_v53 = vld [vmem:[%s6367_s1 + $0x544] sm:$0xf] }
  0xbd   :  { %2173 = vmatpush.bf16.msrb.mxu1 %v3171_v32  ;;  %v3403_v32 = vor.u32 %v4032_v11, %v3400_v12  ;;  %v3512_v61 = vld [vmem:[%s6367_s1 + $0x548] sm:$0xf0]  ;;  %v4058_v12 = vld [vmem:[%s6367_s1 + $0x534] sm:$0xf] }
  0xbe   :  { %2192 = vmatpush.bf16.msrb.mxu2 %v3235_v15  ;;  %v4048_v15 = vld [vmem:[%s6367_s1 + $0x4e4] sm:$0xf]  ;;  %v3576_v11 = vld [vmem:[%s6367_s1 + $0x5c8] sm:$0xf0] }
  0xbf   :  { %2211 = vmatpush.bf16.msrb.mxu3 %v3299_v33  ;;  %v3467_v33 = vor.u32 %v4048_v15, %v3464_v21  ;;  %v3504_v15 = vld [vmem:[%s6367_s1 + $0x538] sm:$0xf0] }
  0xc0   :  { %2155 = vmatpush.bf16.msrb.mxu0 %v3099_v47  ;;  %v1822_v37 = vpop.f32.mrf.mxu2  ;;  %v4078_v47 = vld [vmem:[%s6367_s1 + $0x5d4] sm:$0xf]  ;;  %v3507_v38 = vor.u32 %v4058_v12, %v3504_v15  ;;  %v3552_v12 = vld [vmem:[%s6367_s1 + $0x598] sm:$0xf0] }
  0xc1   :  { %2174 = vmatpush.bf16.msrb.mxu1 %v3163_v59  ;;  %v1823_v50 = vadd.f32 %v1822_v37, %v1804_v20 }
  0xc2   :  { %2193 = vmatpush.bf16.msrb.mxu2 %v3227_v43  ;;  %v3456_v43 = vld [vmem:[%s6367_s1 + $0x4d8] sm:$0xf0]  ;;  %v1872_v49 = vpop.f32.mrf.mxu1 }
  0xc3   :  { %2212 = vmatpush.bf16.msrb.mxu3 %v3291_v60  ;;  %v1841_v42 = vpop.f32.mrf.mxu3  ;;  %v1853_v56 = vpop.f32.mrf.mxu0  ;;  %v3523_v60 = vor.u32 %v4062_v35, %v3520_v36 }
  0xc4   :  { %2224 = vmatpush.bf16.msra.mxu0 %v3411_v3  ;;  %v5745_v52 = vadd.f32 %v1841_v42, %v1823_v50  ;;  %v1854_v59 = vadd.f32 %v1853_v56, %v5591_v27  ;;  %v3587_v3 = vor.u32 %v4078_v47, %v3584_v51  ;;  %v3384_v27 = vld [vmem:[%s6367_s1 + $0x448] sm:$0xf0]  ;;  %2175 = vmatmul.bf16.vlgmr.msrb.gmra.mxu1 %v4746_v1  ;;  %v4024_v51 = vld [vmem:[%s6367_s1 + $0x424] sm:$0xf] }
  0xc5   :  { %2243 = vmatpush.bf16.msra.mxu1 %v3475_v57  ;;  %2156 = vmatmul.bf16.vlgmr.msrb.gmra.mxu0 %v4744_v0  ;;  %v3448_v57 = vld [vmem:[%s6367_s1 + $0x4c8] sm:$0xf0]  ;;  %v3515_v0 = vor.u32 %v4060_v53, %v3512_v61  ;;  %v3387_v1 = vor.u32 %v4028_v4, %v3384_v27 }
  0xc6   :  { %2262 = vmatpush.bf16.msra.mxu2 %v3539_v2  ;;  %v3459_v2 = vor.u32 %v4046_v44, %v3456_v43  ;;  %v1873_v54 = vadd.f32 %v1872_v49, %v1854_v59  ;;  %2213 = vmatmul.bf16.vlgmr.msrb.gmra.mxu3 %v4759_v6  ;;  %v3451_v20 = vor.u32 %v4044_v7, %v3448_v57  ;;  %v3376_v6 = vld [vmem:[%s6367_s1 + $0x438] sm:$0xf0]  ;;  %v4056_v44 = vld [vmem:[%s6367_s1 + $0x524] sm:$0xf]  ;;  %v3496_v50 = vld [vmem:[%s6367_s1 + $0x528] sm:$0xf0] }
  0xc7   :  { %2281 = vmatpush.bf16.msra.mxu3 %v3603_v10  ;;  %v4076_v10 = vld [vmem:[%s6367_s1 + $0x5c4] sm:$0xf]  ;;  %2194 = vmatmul.bf16.vlgmr.msrb.gmra.mxu2 %v4757_v5  ;;  %v4026_v5 = vld [vmem:[%s6367_s1 + $0x434] sm:$0xf]  ;;  %v3368_v56 = vld [vmem:[%s6367_s1 + $0x428] sm:$0xf0]  ;;  %v3499_v53 = vor.u32 %v4056_v44, %v3496_v50 }
  0xc8   :  { %2225 = vmatpush.bf16.msra.mxu0 %v3403_v32  ;;  %v3579_v21 = vor.u32 %v4076_v10, %v3576_v11  ;;  %v1891_v30 = vpop.f32.mrf.mxu2  ;;  %v3440_v32 = vld [vmem:[%s6367_s1 + $0x4b8] sm:$0xf0]  ;;  %v3379_v41 = vor.u32 %v4026_v5, %v3376_v6  ;;  %v4040_v49 = vld [vmem:[%s6367_s1 + $0x4a4] sm:$0xf]  ;;  %v3432_v59 = vld [vmem:[%s6367_s1 + $0x4a8] sm:$0xf0]  ;;  %v3371_v61 = vor.u32 %v4024_v51, %v3368_v56 }
  0xc9   :  { %2244 = vmatpush.bf16.msra.mxu1 %v3467_v33  ;;  %v4074_v33 = vld [vmem:[%s6367_s1 + $0x5b4] sm:$0xf]  ;;  %v1892_v35 = vadd.f32 %v1891_v30, %v1873_v54  ;;  %v3443_v43 = vor.u32 %v4042_v26, %v3440_v32  ;;  %v3435_v4 = vor.u32 %v4040_v49, %v3432_v59  ;;  %v3360_v54 = vld [vmem:[%s6367_s1 + $0x418] sm:$0xf0]  ;;  %v3480_v26 = vld [vmem:[%s6367_s1 + $0x508] sm:$0xf0] }
  0xca   :  { %2263 = vmatpush.bf16.msra.mxu2 %v3531_v31  ;;  %v5802_v37 = vpop.f32.mrf.mxu1  ;;  %v4022_v7 = vld [vmem:[%s6367_s1 + $0x414] sm:$0xf]  ;;  %v4020_v30 = vld [vmem:[%s6367_s1 + $0x404] sm:$0xf]  ;;  %v3792_v50 = vld [vmem:[%s6367_s1 + $0x778] sm:$0xf0] }
  0xcb   :  { %2282 = vmatpush.bf16.msra.mxu3 %v3595_v34  ;;  %v1910_v31 = vpop.f32.mrf.mxu3  ;;  %v3568_v34 = vld [vmem:[%s6367_s1 + $0x5b8] sm:$0xf0]  ;;  %v5800_v36 = vpop.f32.mrf.mxu0  ;;  %v4038_v57 = vld [vmem:[%s6367_s1 + $0x494] sm:$0xf]  ;;  %v3363_v6 = vor.u32 %v4022_v7, %v3360_v54 }
  0xcc   :  { %2226 = vmatpush.bf16.msra.mxu0 %v3395_v48  ;;  %v5810_v42 = vadd.f32 %v1910_v31, %v1892_v35  ;;  %v3571_v47 = vor.u32 %v4074_v33, %v3568_v34  ;;  %v3560_v48 = vld [vmem:[%s6367_s1 + $0x5a8] sm:$0xf0]  ;;  %v4036_v34 = vld [vmem:[%s6367_s1 + $0x484] sm:$0xf]  ;;  %v4130_v44 = vld [vmem:[%s6367_s1 + $0x774] sm:$0xf] }
  0xcd   :  { %2245 = vmatpush.bf16.msra.mxu1 %v3459_v2  ;;  %v4054_v2 = vld [vmem:[%s6367_s1 + $0x514] sm:$0xf]  ;;  %v3352_v31 = vld [vmem:[%s6367_s1 + $0x408] sm:$0xf0]  ;;  %v3856_v56 = vld [vmem:[%s6367_s1 + $0x7f8] sm:$0xf0] }
  0xce   :  { %2264 = vmatpush.bf16.msra.mxu2 %v3523_v60  ;;  %v4072_v60 = vld [vmem:[%s6367_s1 + $0x5a4] sm:$0xf]  ;;  %v3416_v35 = vld [vmem:[%s6367_s1 + $0x488] sm:$0xf0]  ;;  %v3355_v51 = vor.u32 %v4020_v30, %v3352_v31 }
  0xcf   :  { %2283 = vmatpush.bf16.msra.mxu3 %v3587_v3  ;;  %v3488_v3 = vld [vmem:[%s6367_s1 + $0x518] sm:$0xf0]  ;;  %v3563_v27 = vor.u32 %v4072_v60, %v3560_v48  ;;  %v3419_v49 = vor.u32 %v4036_v34, %v3416_v35  ;;  %v4094_v34 = vld [vmem:[%s6367_s1 + $0x654] sm:$0xf] }
  0xd0   :  { %2227 = vmatpush.bf16.msra.mxu0 %v3387_v1  ;;  %v5845_v10 = vpop.f32.mrf.mxu2  ;;  %v4070_v1 = vld [vmem:[%s6367_s1 + $0x594] sm:$0xf]  ;;  %v3491_v5 = vor.u32 %v4054_v2, %v3488_v3  ;;  %v4128_v2 = vld [vmem:[%s6367_s1 + $0x764] sm:$0xf]  ;;  %v3784_v3 = vld [vmem:[%s6367_s1 + $0x768] sm:$0xf0] }
  0xd1   :  { %2246 = vmatpush.bf16.msra.mxu1 %v3451_v20  ;;  %v3555_v33 = vor.u32 %v4070_v1, %v3552_v12  ;;  %v4112_v1 = vld [vmem:[%s6367_s1 + $0x6e4] sm:$0xf]  ;;  %v3720_v12 = vld [vmem:[%s6367_s1 + $0x6e8] sm:$0xf0]  ;;  %v3648_v35 = vld [vmem:[%s6367_s1 + $0x658] sm:$0xf0] }
  0xd2   :  { %2265 = vmatpush.bf16.msra.mxu2 %v3515_v0  ;;  %v3424_v0 = vld [vmem:[%s6367_s1 + $0x498] sm:$0xf0]  ;;  %v5860_v20 = vpop.f32.mrf.mxu1  ;;  %v3723_v30 = vor.u32 %v4112_v1, %v3720_v12 }
  0xd3   :  { %2284 = vmatpush.bf16.msra.mxu3 %v3579_v21  ;;  %v5847_v11 = vpop.f32.mrf.mxu3  ;;  %v5858_v15 = vpop.f32.mrf.mxu0  ;;  %v4052_v21 = vld [vmem:[%s6367_s1 + $0x504] sm:$0xf]  ;;  %v3427_v32 = vor.u32 %v4038_v57, %v3424_v0  ;;  %v3656_v0 = vld [vmem:[%s6367_s1 + $0x668] sm:$0xf0] }
  0xd4   :  { %2228 = vmatpush.bf16.msra.mxu0 %v3379_v41  ;;  %2180 = vmatmul.bf16.gmra.mxu1 %v4878_v9  ;;  %v3544_v41 = vld [vmem:[%s6367_s1 + $0x588] sm:$0xf0]  ;;  %v3664_v9 = vld [vmem:[%s6367_s1 + $0x678] sm:$0xf0]  ;;  %v4096_v57 = vld [vmem:[%s6367_s1 + $0x664] sm:$0xf] }
  0xd5   :  { %2247 = vmatpush.bf16.msra.mxu1 %v3443_v43  ;;  %2161 = vmatmul.bf16.gmra.mxu0 %v4876_v8  ;;  %v4098_v8 = vld [vmem:[%s6367_s1 + $0x674] sm:$0xf] }
  0xd6   :  { %2266 = vmatpush.bf16.msra.mxu2 %v3507_v38  ;;  %v4068_v38 = vld [vmem:[%s6367_s1 + $0x584] sm:$0xf]  ;;  %2218 = vmatmul.bf16.gmra.mxu3 %v4891_v14  ;;  %v4114_v43 = vld [vmem:[%s6367_s1 + $0x6f4] sm:$0xf] }
  0xd7   :  { %2285 = vmatpush.bf16.msra.mxu3 %v3571_v47  ;;  %2199 = vmatmul.bf16.gmra.mxu2 %v4889_v13  ;;  %v3483_v47 = vor.u32 %v4052_v21, %v3480_v26  ;;  %v3728_v13 = vld [vmem:[%s6367_s1 + $0x6f8] sm:$0xf0]  ;;  %v4146_v14 = vld [vmem:[%s6367_s1 + $0x7f4] sm:$0xf]  ;;  %v3547_v59 = vor.u32 %v4068_v38, %v3544_v41  ;;  %v4144_v21 = vld [vmem:[%s6367_s1 + $0x7e4] sm:$0xf]  ;;  %v3659_v26 = vor.u32 %v4096_v57, %v3656_v0 }
  0xd8   :  { %2229 = vmatpush.bf16.msra.mxu0 %v3371_v61  ;;  %v5914_v60 = vpop.f32.mrf.mxu2  ;;  %v3667_v61 = vor.u32 %v4098_v8, %v3664_v9  ;;  %v3731_v7 = vor.u32 %v4114_v43, %v3728_v13  ;;  %v3859_v54 = vor.u32 %v4146_v14, %v3856_v56  ;;  %v4110_v38 = vld [vmem:[%s6367_s1 + $0x6d4] sm:$0xf]  ;;  %v3840_v9 = vld [vmem:[%s6367_s1 + $0x7d8] sm:$0xf0]  ;;  %v3651_v13 = vor.u32 %v4094_v34, %v3648_v35  ;;  %v4124_v14 = vld [vmem:[%s6367_s1 + $0x744] sm:$0xf] }
  0xd9   :  { %2248 = vmatpush.bf16.msra.mxu1 %v3435_v4  ;;  %v4142_v8 = vld [vmem:[%s6367_s1 + $0x7d4] sm:$0xf]  ;;  %v3768_v56 = vld [vmem:[%s6367_s1 + $0x748] sm:$0xf0]  ;;  %v3760_v0 = vld [vmem:[%s6367_s1 + $0x738] sm:$0xf0] }
  0xda   :  { %2267 = vmatpush.bf16.msra.mxu2 %v3499_v53  ;;  %v3795_v53 = vor.u32 %v4130_v44, %v3792_v50  ;;  %v3712_v50 = vld [vmem:[%s6367_s1 + $0x6d8] sm:$0xf0]  ;;  %v4122_v57 = vld [vmem:[%s6367_s1 + $0x734] sm:$0xf] }
  0xdb   :  { %2286 = vmatpush.bf16.msra.mxu3 %v3563_v27  ;;  %v5916_v48 = vpop.f32.mrf.mxu3  ;;  %v5924_v4 = vpop.f32.mrf.mxu0  ;;  %v3763_v34 = vor.u32 %v4122_v57, %v3760_v0  ;;  %v4102_v57 = vld [vmem:[%s6367_s1 + $0x694] sm:$0xf] }
  0xdc   :  { %2230 = vmatpush.bf16.msra.mxu0 %v3363_v6  ;;  %v5926_v27 = vpop.f32.mrf.mxu1  ;;  %v3787_v6 = vor.u32 %v4128_v2, %v3784_v3  ;;  %v4108_v2 = vld [vmem:[%s6367_s1 + $0x6c4] sm:$0xf]  ;;  %v3704_v3 = vld [vmem:[%s6367_s1 + $0x6c8] sm:$0xf0] }
  0xdd   :  { %2249 = vmatpush.bf16.msra.mxu1 %v3427_v32  ;;  %v4126_v32 = vld [vmem:[%s6367_s1 + $0x754] sm:$0xf]  ;;  %v3707_v1 = vor.u32 %v4108_v2, %v3704_v3  ;;  %v3744_v3 = vld [vmem:[%s6367_s1 + $0x718] sm:$0xf0] }
  0xde   :  { %2268 = vmatpush.bf16.msra.mxu2 %v3491_v5  ;;  %v3848_v5 = vld [vmem:[%s6367_s1 + $0x7e8] sm:$0xf0]  ;;  %v4118_v2 = vld [vmem:[%s6367_s1 + $0x714] sm:$0xf] }
  0xdf   :  { %2287 = vmatpush.bf16.msra.mxu3 %v3555_v33  ;;  %v3851_v31 = vor.u32 %v4144_v21, %v3848_v5  ;;  %v3776_v33 = vld [vmem:[%s6367_s1 + $0x758] sm:$0xf0]  ;;  %v4106_v21 = vld [vmem:[%s6367_s1 + $0x6b4] sm:$0xf] }
  0xe0   :  { %2231 = vmatpush.bf16.msra.mxu0 %v3355_v51  ;;  %v5961_v41 = vpop.f32.mrf.mxu2  ;;  %v3779_v51 = vor.u32 %v4126_v32, %v3776_v33 }
  0xe1   :  { %2250 = vmatpush.bf16.msra.mxu1 %v3419_v49  ;;  %v3715_v49 = vor.u32 %v4110_v38, %v3712_v50  ;;  %v4120_v38 = vld [vmem:[%s6367_s1 + $0x724] sm:$0xf]  ;;  %v3752_v50 = vld [vmem:[%s6367_s1 + $0x728] sm:$0xf0] }
  0xe2   :  { %2269 = vmatpush.bf16.msra.mxu2 %v3483_v47 }
  0xe3   :  { %2288 = vmatpush.bf16.msra.mxu3 %v3547_v59  ;;  %v5963_v44 = vpop.f32.mrf.mxu3  ;;  %v5974_v43 = vpop.f32.mrf.mxu0  ;;  %v3843_v59 = vor.u32 %v4142_v8, %v3840_v9 }
  0xe4   :  { %2300 = vmatpush.bf16.msrb.mxu0 %v3667_v61  ;;  %v5976_v47 = vpop.f32.mrf.mxu1  ;;  %v3640_v61 = vld [vmem:[%s6367_s1 + $0x648] sm:$0xf0]  ;;  %2251 = vmatmul.bf16.vlgmr.msra.gmra.mxu1 %v5016_v24 }
  0xe5   :  { %2319 = vmatpush.bf16.msrb.mxu1 %v3731_v7  ;;  %2232 = vmatmul.bf16.vlgmr.msra.gmra.mxu0 %v5014_v23  ;;  %v4140_v7 = vld [vmem:[%s6367_s1 + $0x7c4] sm:$0xf]  ;;  %v3771_v23 = vor.u32 %v4124_v14, %v3768_v56  ;;  %v3688_v56 = vld [vmem:[%s6367_s1 + $0x6a8] sm:$0xf0] }
  0xe6   :  { %2338 = vmatpush.bf16.msrb.mxu2 %v3795_v53  ;;  %v4092_v53 = vld [vmem:[%s6367_s1 + $0x644] sm:$0xf]  ;;  %2289 = vmatmul.bf16.vlgmr.msra.gmra.mxu3 %v5029_v29  ;;  %v3632_v29 = vld [vmem:[%s6367_s1 + $0x638] sm:$0xf0] }
  0xe7   :  { %2357 = vmatpush.bf16.msrb.mxu3 %v3859_v54  ;;  %v3832_v54 = vld [vmem:[%s6367_s1 + $0x7c8] sm:$0xf0]  ;;  %2270 = vmatmul.bf16.vlgmr.msra.gmra.mxu2 %v5027_v28  ;;  %v3643_v24 = vor.u32 %v4092_v53, %v3640_v61  ;;  %v4090_v28 = vld [vmem:[%s6367_s1 + $0x634] sm:$0xf]  ;;  %v4104_v14 = vld [vmem:[%s6367_s1 + $0x6a4] sm:$0xf]  ;;  %v3755_v53 = vor.u32 %v4120_v38, %v3752_v50 }
  0xe8   :  { %2301 = vmatpush.bf16.msrb.mxu0 %v3659_v26  ;;  %v3835_v12 = vor.u32 %v4140_v7, %v3832_v54  ;;  %v6021_v5 = vpop.f32.mrf.mxu2  ;;  %v3696_v26 = vld [vmem:[%s6367_s1 + $0x6b8] sm:$0xf0]  ;;  %v3635_v35 = vor.u32 %v4090_v28, %v3632_v29  ;;  %v3691_v7 = vor.u32 %v4104_v14, %v3688_v56  ;;  %v4134_v28 = vld [vmem:[%s6367_s1 + $0x794] sm:$0xf]  ;;  %v3736_v38 = vld [vmem:[%s6367_s1 + $0x708] sm:$0xf0] }
  0xe9   :  { %2320 = vmatpush.bf16.msrb.mxu1 %v3723_v30  ;;  %v4138_v30 = vld [vmem:[%s6367_s1 + $0x7b4] sm:$0xf]  ;;  %v3699_v8 = vor.u32 %v4106_v21, %v3696_v26  ;;  %v3808_v29 = vld [vmem:[%s6367_s1 + $0x798] sm:$0xf0]  ;;  %v3800_v14 = vld [vmem:[%s6367_s1 + $0x788] sm:$0xf0] }
  0xea   :  { %2339 = vmatpush.bf16.msrb.mxu2 %v3787_v6 }
  0xeb   :  { %2358 = vmatpush.bf16.msrb.mxu3 %v3851_v31  ;;  %v6023_v6 = vpop.f32.mrf.mxu3  ;;  %v3824_v31 = vld [vmem:[%s6367_s1 + $0x7b8] sm:$0xf0]  ;;  %v6034_v32 = vpop.f32.mrf.mxu0 }
  0xec   :  { %2302 = vmatpush.bf16.msrb.mxu0 %v3651_v13  ;;  %v6036_v33 = vpop.f32.mrf.mxu1  ;;  %v3827_v9 = vor.u32 %v4138_v30, %v3824_v31  ;;  %v3624_v13 = vld [vmem:[%s6367_s1 + $0x628] sm:$0xf0]  ;;  %v1856_v30 = vadd.f32 %v5800_v36, %v5644_v19  ;;  %v3747_v31 = vor.u32 %v4118_v2, %v3744_v3  ;;  %v4084_v19 = vld [vmem:[%s6367_s1 + $0x604] sm:$0xf] }
  0xed   :  { %2321 = vmatpush.bf16.msrb.mxu1 %v3715_v49  ;;  %v4136_v49 = vld [vmem:[%s6367_s1 + $0x7a4] sm:$0xf]  ;;  %v3608_v36 = vld [vmem:[%s6367_s1 + $0x608] sm:$0xf0] }
  0xee   :  { %2340 = vmatpush.bf16.msrb.mxu2 %v3779_v51  ;;  %v4088_v51 = vld [vmem:[%s6367_s1 + $0x624] sm:$0xf]  ;;  %v3611_v56 = vor.u32 %v4084_v19, %v3608_v36 }
  0xef   :  { %2359 = vmatpush.bf16.msrb.mxu3 %v3843_v59  ;;  %v3816_v59 = vld [vmem:[%s6367_s1 + $0x7a8] sm:$0xf0]  ;;  %v3627_v61 = vor.u32 %v4088_v51, %v3624_v13  ;;  %v4132_v13 = vld [vmem:[%s6367_s1 + $0x784] sm:$0xf] }
  0xf0   :  { %2303 = vmatpush.bf16.msrb.mxu0 %v3643_v24  ;;  %v3819_v54 = vor.u32 %v4136_v49, %v3816_v59  ;;  %v3616_v24 = vld [vmem:[%s6367_s1 + $0x618] sm:$0xf0]  ;;  %v6077_v0 = vpop.f32.mrf.mxu2  ;;  %v3672_v51 = vld [vmem:[%s6367_s1 + $0x688] sm:$0xf0]  ;;  %v1930_v49 = vadd.f32 %v5974_v43, %v5810_v42 }
  0xf1   :  { %2322 = vmatpush.bf16.msrb.mxu1 %v3707_v1 }
  0xf2   :  { %2341 = vmatpush.bf16.msrb.mxu2 %v3771_v23  ;;  %v4086_v23 = vld [vmem:[%s6367_s1 + $0x614] sm:$0xf] }
  0xf3   :  { %2360 = vmatpush.bf16.msrb.mxu3 %v3835_v12  ;;  %v6079_v1 = vpop.f32.mrf.mxu3  ;;  %v3680_v12 = vld [vmem:[%s6367_s1 + $0x698] sm:$0xf0]  ;;  %v6090_v21 = vpop.f32.mrf.mxu0 }
  0xf4   :  { %2304 = vmatpush.bf16.msrb.mxu0 %v3635_v35  ;;  %v6092_v26 = vpop.f32.mrf.mxu1  ;;  %v4116_v35 = vld [vmem:[%s6367_s1 + $0x704] sm:$0xf]  ;;  %v3683_v50 = vor.u32 %v4102_v57, %v3680_v12  ;;  %2256 = vmatmul.bf16.gmra.mxu1 %v5148_v40 }
  0xf5   :  { %2323 = vmatpush.bf16.msrb.mxu1 %v3699_v8  ;;  %v3811_v8 = vor.u32 %v4134_v28, %v3808_v29  ;;  %2237 = vmatmul.bf16.gmra.mxu0 %v5146_v39  ;;  %v1875_v39 = vadd.f32 %v5802_v37, %v1856_v30  ;;  %v3739_v40 = vor.u32 %v4116_v35, %v3736_v38 }
  0xf6   :  { %2342 = vmatpush.bf16.msrb.mxu2 %v3763_v34  ;;  %v3619_v34 = vor.u32 %v4086_v23, %v3616_v24  ;;  %2294 = vmatmul.bf16.gmra.mxu3 %v5161_v46  ;;  %v1859_v46 = vadd.f32 %v5858_v15, %v5710_v16  ;;  %v1949_v37 = vadd.f32 %v5976_v47, %v1930_v49 }
  0xf7   :  { %2361 = vmatpush.bf16.msrb.mxu3 %v3827_v9  ;;  %v4100_v9 = vld [vmem:[%s6367_s1 + $0x684] sm:$0xf]  ;;  %2275 = vmatmul.bf16.gmra.mxu2 %v5159_v45  ;;  %v1894_v3 = vadd.f32 %v5845_v10, %v1875_v39  ;;  %v1861_v15 = vadd.f32 %v5924_v4, %v5745_v52 }
  0xf8   :  { %2305 = vmatpush.bf16.msrb.mxu0 %v3627_v61  ;;  %v3675_v59 = vor.u32 %v4100_v9, %v3672_v51  ;;  %v1972_v61 = vpop.f32.mrf.mxu2  ;;  %v1968_v43 = vadd.f32 %v6021_v5, %v1949_v37 }
  0xf9   :  { %2324 = vmatpush.bf16.msrb.mxu1 %v3691_v7  ;;  %v1913_v42 = vadd.f32 %v5847_v11, %v1894_v3 }
  0xfa   :  { %2343 = vmatpush.bf16.msrb.mxu2 %v3755_v53  ;;  %v3803_v53 = vor.u32 %v4132_v13, %v3800_v14  ;;  %v1987_v12 = vadd.f32 %v6023_v6, %v1968_v43 }
  0xfb   :  { %2362 = vmatpush.bf16.msrb.mxu3 %v3819_v54  ;;  %v1991_v2 = vpop.f32.mrf.mxu3  ;;  %v1936_v45 = vpop.f32.mrf.mxu0  ;;  %v1878_v54 = vadd.f32 %v5860_v20, %v1859_v46  ;;  %v1932_v23 = vadd.f32 %v6034_v32, %v1913_v42 }
  0xfc   :  { %2306 = vmatpush.bf16.msrb.mxu0 %v3619_v34  ;;  %v1955_v7 = vpop.f32.mrf.mxu1 }
  0xfd   :  { %2325 = vmatpush.bf16.msrb.mxu1 %v3683_v50  ;;  %v1897_v57 = vadd.f32 %v5914_v60, %v1878_v54  ;;  %v1951_v47 = vadd.f32 %v6036_v33, %v1932_v23  ;;  %v1880_v60 = vadd.f32 %v5926_v27, %v1861_v15 }
  0xfe   :  { %2344 = vmatpush.bf16.msrb.mxu2 %v3747_v31 }
  0xff   :  { %2363 = vmatpush.bf16.msrb.mxu3 %v3811_v8  ;;  %v1916_v20 = vadd.f32 %v5916_v48, %v1897_v57  ;;  %v1970_v5 = vadd.f32 %v6077_v0, %v1951_v47  ;;  %v1899_v4 = vadd.f32 %v5961_v41, %v1880_v60 }
 0x100   :  { %2307 = vmatpush.bf16.msrb.mxu0 %v3611_v56  ;;  %v1974_v10 = vpop.f32.mrf.mxu2 }
 0x101   :  { %2326 = vmatpush.bf16.msrb.mxu1 %v3675_v59  ;;  %v1935_v6 = vadd.f32 %v6090_v21, %v1916_v20  ;;  %v6155_v21 = vld [vmem:[%s6369_s2] sm:$0x3] }
 0x102   :  { %2345 = vmatpush.bf16.msrb.mxu2 %v3739_v40 }
 0x103   :  { %2364 = vmatpush.bf16.msrb.mxu3 %v3803_v53  ;;  %v1993_v24 = vpop.f32.mrf.mxu3  ;;  %v2005_v28 = vpop.f32.mrf.mxu0  ;;  %v1954_v0 = vadd.f32 %v6092_v26, %v1935_v6  ;;  %v2405_v26 = vperm.slane %v6155_v21, 0 }
 0x104   :  { %v2024_v16 = vpop.f32.mrf.mxu1  ;;  %v2006_v11 = vadd.f32 %v2005_v28, %v1987_v12  ;;  %2327 = vmatmul.bf16.vlgmr.msrb.gmra.mxu1 %v5292_v18 }
 0x105   :  { %2308 = vmatmul.bf16.vlgmr.msrb.gmra.mxu0 %v5290_v17  ;;  %v1989_v17 = vadd.f32 %v6079_v1, %v1970_v5 }
 0x106   :  { %2365 = vmatmul.bf16.vlgmr.msrb.gmra.mxu3 %v5305_v25  ;;  %v2025_v52 = vadd.f32 %v2024_v16, %v2006_v11  ;;  %v1973_v25 = vadd.f32 %v1972_v61, %v1954_v0 }
 0x107   :  { %2346 = vmatmul.bf16.vlgmr.msrb.gmra.mxu2 %v5303_v22  ;;  %v1918_v22 = vadd.f32 %v5963_v44, %v1899_v4 }
 0x108   :  { %v2043_v32 = vpop.f32.mrf.mxu2  ;;  %v1992_v1 = vadd.f32 %v1991_v2, %v1973_v25  ;;  %v4188_v2 = vmov 32.0  }
 0x109   :  { %v2044_v18 = vadd.f32 %v2043_v32, %v2025_v52  ;;  %v1937_v27 = vadd.f32 %v1936_v45, %v1918_v22  ;;  %4150 = vrcp.f32 %v4188_v2 }
 0x10b   :  { %v2062_v33 = vpop.f32.mrf.mxu3  ;;  %v2007_v29 = vpop.f32.mrf.mxu0  ;;  %v1956_v19 = vadd.f32 %v1955_v7, %v1937_v27 }
 0x10c   :  { %v2026_v48 = vpop.f32.mrf.mxu1  ;;  %v2008_v30 = vadd.f32 %v2007_v29, %v1989_v17  ;;  %v2063_v31 = vadd.f32 %v2062_v33, %v2044_v18 }
 0x10d   :  { %v1975_v9 = vadd.f32 %v1974_v10, %v1956_v19 }
 0x10e   :  { %v2027_v41 = vadd.f32 %v2026_v48, %v2008_v30  ;;  %v6162_v51 = vadd.f32 %v2405_v26, %v2063_v31 }
 0x10f   :  { %v1994_v39 = vadd.f32 %v1993_v24, %v1975_v9  ;;  %v4151_v42 = vpop.eup %4150 }
 0x110   :  { %v2045_v34 = vpop.f32.mrf.mxu2  ;;  %v2436_v16 = vmul.f32 32.0, %v4151_v42  ;;  %vm2440_vm0 = vweird.f32 %v4151_v42 }
 0x111   :  { %v2046_v38 = vadd.f32 %v2045_v34, %v2027_v41 }
 0x112   :  { %v2437_v47 = vsub.f32 1.0, %v2436_v16 }
 0x113   :  { %v2064_v35 = vpop.f32.mrf.mxu3  ;;  %v2010_v50 = vpop.f32.mrf.mxu0 }
 0x114   :  { %v2029_v8 = vpop.f32.mrf.mxu1  ;;  %v2065_v36 = vadd.f32 %v2064_v35, %v2046_v38  ;;  %v2011_v44 = vadd.f32 %v2010_v50, %v1992_v1  ;;  %2332 = vmatmul.bf16.gmra.mxu1 %v5424_v58  ;;  %v2444_v58 = vmul.f32 %v6162_v51, %v6162_v51  ;;  %v2438_v29 = vmul.f32 %v4151_v42, %v2437_v47 }
 0x115   :  { %2313 = vmatmul.bf16.gmra.mxu0 %v5422_v55 }
 0x116   :  { %2370 = vmatmul.bf16.gmra.mxu3 %v5437_v63  ;;  %v2030_v13 = vadd.f32 %v2029_v8, %v2011_v44  ;;  %v6164_v14 = vadd.f32 %v2405_v26, %v2065_v36  ;;  %v2439_v25 = vadd.f32 %v4151_v42, %v2438_v29 }
 0x117   :  { %2351 = vmatmul.bf16.gmra.mxu2 %v5435_v62 }
 0x118   :  { %v2417_v55 = vadd.f32 %v6164_v14, %v6162_v51  ;;  %v2446_v62 = vmul.f32 %v6164_v14, %v6164_v14  ;;  %v6184_v36 = vsel %vm2440_vm0, %v4151_v42, %v2439_v25 }
 0x11a   :  { %v2048_v40 = vpop.f32.mrf.mxu2  ;;  %v2452_v3 = vadd.f32 %v2446_v62, %v2444_v58 }
 0x11b   :  { %v2067_v56 = vpop.f32.mrf.mxu3  ;;  %v2049_v49 = vadd.f32 %v2048_v40, %v2030_v13  ;;  %v2012_v59 = vpop.f32.mrf.mxu0 }
 0x11c   :  { %v2031_v53 = vpop.f32.mrf.mxu1  ;;  %v2013_v61 = vadd.f32 %v2012_v59, %v1994_v39 }
 0x11d   :  { %v2068_v63 = vadd.f32 %v2067_v56, %v2049_v49 }
 0x11e   :  { %v2032_v45 = vadd.f32 %v2031_v53, %v2013_v61 }
 0x11f   :  { %v6172_v7 = vadd.f32 %v2405_v26, %v2068_v63 }
 0x121   :  { %v2418_v54 = vadd.f32 %v2417_v55, %v6172_v7  ;;  %v2448_v23 = vmul.f32 %v6172_v7, %v6172_v7 }
 0x122   :  { %v2050_v46 = vpop.f32.mrf.mxu2 }
 0x123   :  { %v2069_v37 = vpop.f32.mrf.mxu3  ;;  %v2051_v43 = vadd.f32 %v2050_v46, %v2032_v45  ;;  %v2081_v10 = vpop.f32.mrf.mxu0  ;;  %v2453_v28 = vadd.f32 %v2452_v3, %v2448_v23 }
 0x124   :  { %v2100_v24 = vpop.f32.mrf.mxu1 }
 0x125   :  { %v2101_v57 = vadd.f32 %v2100_v24, %v2081_v10  ;;  %v2070_v12 = vadd.f32 %v2069_v37, %v2051_v43 }
 0x127   :  { %v6177_v15 = vadd.f32 %v2405_v26, %v2070_v12 }
 0x129   :  { %v2419_v5 = vadd.f32 %v2418_v54, %v6177_v15  ;;  %v2450_v60 = vmul.f32 %v6177_v15, %v6177_v15 }
 0x12a   :  { %v2119_v11 = vpop.f32.mrf.mxu2 }
 0x12b   :  { %v2138_v20 = vpop.f32.mrf.mxu3  ;;  %v2120_v6 = vadd.f32 %v2119_v11, %v2101_v57  ;;  %v2083_v52 = vpop.f32.mrf.mxu0  ;;  %v2420_v33 = vrot.slane %v2419_v5, 4  ;;  %v2454_v17 = vadd.f32 %v2453_v28, %v2450_v60 }
 0x12c   :  { %v2102_v4 = vpop.f32.mrf.mxu1 }
 0x12d   :  { %v2103_v32 = vadd.f32 %v2102_v4, %v2083_v52  ;;  %v2139_v18 = vadd.f32 %v2138_v20, %v2120_v6  ;;  %v2421_v48 = vadd.f32 %v2420_v33, %v2419_v5  ;;  %v2455_v0 = vrot.slane %v2454_v17, 4  ;;  %v6205_v52 = vld [vmem:[%s6370_s3] sm:$0x3] }
 0x12e   :  { %v6210_v4 = vld [vmem:[%s6371_s4] sm:$0x3] }
 0x12f   :  { %v2422_v30 = vrot.slane %v2421_v48, 2  ;;  %v2456_v22 = vadd.f32 %v2455_v0, %v2454_v17 }
 0x131   :  { %v2423_v41 = vadd.f32 %v2422_v30, %v2421_v48  ;;  %v2457_v34 = vrot.slane %v2456_v22, 2  ;;  %v2532_v30 = vperm.slane %v6210_v4, 0 }
 0x132   :  { %v2121_v31 = vpop.f32.mrf.mxu2 }
 0x133   :  { %v2140_v27 = vpop.f32.mrf.mxu3  ;;  %v2122_v35 = vadd.f32 %v2121_v31, %v2103_v32  ;;  %v2086_v1 = vpop.f32.mrf.mxu0  ;;  %v2424_v8 = vrot.slane %v2423_v41, 1  ;;  %v2458_v26 = vadd.f32 %v2457_v34, %v2456_v22 }
 0x134   :  { %v2105_v38 = vpop.f32.mrf.mxu1 }
 0x135   :  { %v2106_v50 = vadd.f32 %v2105_v38, %v2086_v1  ;;  %v6182_v19 = vadd.f32 %v2140_v27, %v2122_v35  ;;  %v2425_v44 = vadd.f32 %v2424_v8, %v2423_v41  ;;  %v2459_v9 = vrot.slane %v2458_v26, 1 }
 0x137   :  { %v2442_v13 = vmul.f32 %v6184_v36, %v2425_v44  ;;  %v2460_v39 = vadd.f32 %v2459_v9, %v2458_v26 }
 0x139   :  { %v2470_v49 = vmul.f32 %v2460_v39, %v6184_v36  ;;  %v2472_v59 = vmul.f32 %v2442_v13, %v2442_v13  ;;  %v2478_v53 = vsub.f32 %v6162_v51, %v2442_v13  ;;  %v2480_v55 = vsub.f32 %v6164_v14, %v2442_v13 }
 0x13a   :  { %v2124_v40 = vpop.f32.mrf.mxu2  ;;  %v2482_v63 = vsub.f32 %v6172_v7, %v2442_v13  ;;  %v2484_v61 = vsub.f32 %v6177_v15, %v2442_v13 }
 0x13b   :  { %v2143_v56 = vpop.f32.mrf.mxu3  ;;  %v2088_v58 = vpop.f32.mrf.mxu0  ;;  %v2125_v2 = vadd.f32 %v2124_v40, %v2106_v50  ;;  %v2474_v45 = vsub.f32 %v2470_v49, %v2472_v59 }
 0x13c   :  { %v2107_v62 = vpop.f32.mrf.mxu1 }
 0x13d   :  { %v2108_v3 = vadd.f32 %v2107_v62, %v2088_v58  ;;  %v6192_v46 = vadd.f32 %v2143_v56, %v2125_v2  ;;  %v2476_v37 = vmax.f32 %v2474_v45, 0.0 }
 0x13f   :  { %v2486_v42 = vadd.f32 1e-05, %v2476_v37 }
 0x141   :  { %4152 = vrsqrt.f32 %v2486_v42  ;;  %vm2494_vm2 = vweird.f32 %v2486_v42 }
 0x142   :  { %v2126_v43 = vpop.f32.mrf.mxu2 }
 0x143   :  { %v2145_v54 = vpop.f32.mrf.mxu3  ;;  %v2127_v23 = vadd.f32 %v2126_v43, %v2108_v3  ;;  %v2157_v51 = vpop.f32.mrf.mxu0 }
 0x144   :  { %v2176_v10 = vpop.f32.mrf.mxu1  ;;  %v2158_v14 = vadd.f32 %v2157_v51, %v2139_v18  ;;  %v2518_v18 = vperm.slane %v6205_v52, 0 }
 0x145   :  { %v6194_v24 = vadd.f32 %v2145_v54, %v2127_v23 }
 0x146   :  { %v2177_v57 = vadd.f32 %v2176_v10, %v2158_v14 }
 0x147   :  { %v4153_v7 = vpop.eup %4152 }
 0x148   :  { %v2489_v12 = vmul.f32 %v4153_v7, %v2486_v42  ;;  %vm2495_vm1 = vweird.f32 %v4153_v7 }
 0x149   :  { %vm2496_vm3 = vmor %vm2494_vm2, %vm2495_vm1 }
 0x14a   :  { %v2195_v28 = vpop.f32.mrf.mxu2  ;;  %v2490_v20 = vmul.f32 %v4153_v7, %v2489_v12 }
 0x14b   :  { %v2214_v16 = vpop.f32.mrf.mxu3  ;;  %v2196_v15 = vadd.f32 %v2195_v28, %v2177_v57  ;;  %v6196_v47 = vpop.f32.mrf.mxu0 }
 0x14c   :  { %v6198_v11 = vpop.f32.mrf.mxu1  ;;  %v2491_v60 = vmul.f32 0.5, %v2490_v20 }
 0x14d   :  { %v6200_v5 = vadd.f32 %v2214_v16, %v2196_v15 }
 0x14e   :  { %v2492_v6 = vsub.f32 1.5, %v2491_v60 }
 0x150   :  { %v2493_v32 = vmul.f32 %v4153_v7, %v2492_v6 }
 0x152   :  { %v6212_v33 = vpop.f32.mrf.mxu2  ;;  %v2497_v0 = vsel %vm2496_vm3, %v4153_v7, %v2493_v32  ;;  %v2160_v7 = vadd.f32 %v6196_v47, %v6182_v19 }
 0x153   :  { %v6214_v17 = vpop.f32.mrf.mxu3  ;;  %v6217_v29 = vpop.f32.mrf.mxu0  ;;  %v2508_v22 = vmul.f32 %v2497_v0, %v2478_v53  ;;  %v2510_v25 = vmul.f32 %v2497_v0, %v2480_v55  ;;  %v2512_v31 = vmul.f32 %v2497_v0, %v2482_v63  ;;  %v2514_v27 = vmul.f32 %v2497_v0, %v2484_v61 }
 0x154   :  { %v6219_v48 = vpop.f32.mrf.mxu1  ;;  %v2179_v32 = vadd.f32 %v6198_v11, %v2160_v7 }
 0x155   :  { %v2522_v41 = vmul.f32 %v2518_v18, %v2508_v22  ;;  %v2524_v34 = vmul.f32 %v2518_v18, %v2510_v25  ;;  %v2526_v35 = vmul.f32 %v2518_v18, %v2512_v31  ;;  %v2528_v1 = vmul.f32 %v2518_v18, %v2514_v27 }
 0x157   :  { %v2536_v38 = vadd.f32 %v2532_v30, %v2522_v41  ;;  %v2538_v50 = vadd.f32 %v2532_v30, %v2524_v34  ;;  %v2540_v8 = vadd.f32 %v2532_v30, %v2526_v35  ;;  %v2542_v26 = vadd.f32 %v2532_v30, %v2528_v1 }
 0x159   :  { %v2544_v13 = vsub.f32 0.0, %v2536_v38  ;;  %v2546_v39 = vsub.f32 0.0, %v2538_v50  ;;  %v2548_v40 = vsub.f32 0.0, %v2540_v8  ;;  %v2550_v56 = vsub.f32 0.0, %v2542_v26 }
 0x15a   :  { %v6222_v44 = vpop.f32.mrf.mxu2 }
 0x15b   :  { %v6224_v9 = vpop.f32.mrf.mxu3  ;;  %v6226_v49 = vpop.f32.mrf.mxu0  ;;  %v2552_v53 = vmul.f32 1.442695, %v2544_v13  ;;  %v2556_v55 = vmul.f32 1.442695, %v2546_v39  ;;  %v2560_v58 = vmul.f32 1.442695, %v2548_v40 }
 0x15c   :  { %v6228_v59 = vpop.f32.mrf.mxu1  ;;  %v2564_v62 = vmul.f32 1.442695, %v2550_v56 }
 0x15d   :  { %4154 = vpow2.f32 %v2552_v53 }
 0x15e   :  { %4156 = vpow2.f32 %v2556_v55 }
 0x15f   :  { %4158 = vpow2.f32 %v2560_v58 }
 0x160   :  { %4160 = vpow2.f32 %v2564_v62 }
 0x162   :  { %v6230_v63 = vpop.f32.mrf.mxu2 }
 0x163   :  { %v6232_v61 = vpop.f32.mrf.mxu3  ;;  %v2233_v2 = vpop.f32.mrf.mxu0 }
 0x164   :  { %v6234_v3 = vpop.f32.mrf.mxu1  ;;  %v4155_v45 = vpop.eup %4154  ;;  %v6254_v18 = vadd.f32 %v2233_v2, %v6200_v5 }
 0x165   :  { %v4157_v37 = vpop.eup %4156  ;;  %v2568_v42 = vadd.f32 1.0, %v4155_v45 }
 0x166   :  { %v4159_v43 = vpop.eup %4158  ;;  %v2570_v54 = vadd.f32 1.0, %v4157_v37 }
 0x167   :  { %v4161_v23 = vpop.eup %4160  ;;  %v6236_v51 = vadd.f32 1.0, %v4159_v43  ;;  %4162 = vrcp.f32 %v2568_v42  ;;  %v2585_v16 = vand.u32 2147483647, %v2568_v42  ;;  %v2587_v20 = vand.u32 2147483648, %v2568_v42 }
 0x168   :  { %v6238_v10 = vadd.f32 1.0, %v4161_v23  ;;  %4164 = vrcp.f32 %v2570_v54  ;;  %vm2581_vm4 = vweird.f32 %v2568_v42  ;;  %vm2611_vm5 = vweird.f32 %v2570_v54 }
 0x169   :  { %4166 = vrcp.f32 %v6236_v51  ;;  %v2615_v19 = vand.u32 2147483647, %v2570_v54  ;;  %vm6256_vm6 = vcmp.eq.f32.partialorder %v2585_v16, 8.507059e+37  ;;  %v2617_v25 = vand.u32 2147483648, %v2570_v54 }
 0x16a   :  { %v6241_v14 = vpop.f32.mrf.mxu2  ;;  %4168 = vrcp.f32 %v6238_v10  ;;  %v2588_v41 = vor.u32 1.1754944e-38, %v2587_v20  ;;  %vm2641_vm7 = vweird.f32 %v6236_v51  ;;  %v2645_v11 = vand.u32 2147483647, %v6236_v51 }
 0x16b   :  { %v6243_v57 = vpop.f32.mrf.mxu3  ;;  %v6247_v12 = vpop.f32.mrf.mxu0  ;;  %vm6272_vm10 = vcmp.eq.f32.partialorder %v2615_v19, 8.507059e+37  ;;  %v2647_v40 = vand.u32 2147483648, %v6236_v51  ;;  %v2618_v62 = vor.u32 1.1754944e-38, %v2617_v25  ;;  %v2675_v2 = vand.u32 2147483647, %v6238_v10 }
 0x16c   :  { %v6249_v28 = vpop.f32.mrf.mxu1  ;;  %v2677_v45 = vand.u32 2147483648, %v6238_v10  ;;  %vm2671_vm0 = vweird.f32 %v6238_v10  ;;  %vm2646_vm1 = vcmp.eq.f32.partialorder %v2645_v11, 8.507059e+37  ;;  %v2163_v25 = vadd.f32 %v6217_v29, %v6192_v46 }
 0x16d   :  { %v4163_v15 = vpop.eup %4162  ;;  %vm2676_vm3 = vcmp.eq.f32.partialorder %v2675_v2, 8.507059e+37  ;;  %v2165_v46 = vadd.f32 %v6226_v49, %v6194_v24 }
 0x16e   :  { %v4165_v60 = vpop.eup %4164  ;;  %v2577_v6 = vmul.f32 %v4163_v15, %v2568_v42  ;;  %vm2582_vm8 = vweird.f32 %v4163_v15  ;;  %v2648_v42 = vor.u32 1.1754944e-38, %v2647_v40 }
 0x16f   :  { %v4167_v0 = vpop.eup %4166  ;;  %v2607_v30 = vmul.f32 %v4165_v60, %v2570_v54  ;;  %vm2612_vm9 = vweird.f32 %v4165_v60  ;;  %vm2583_vm12 = vmor %vm2581_vm4, %vm2582_vm8 }
 0x170   :  { %v2578_v47 = vsub.f32 1.0, %v2577_v6  ;;  %v2637_v31 = vmul.f32 %v4167_v0, %v6236_v51  ;;  %v4169_v27 = vpop.eup %4168  ;;  %vm2642_vm11 = vweird.f32 %v4167_v0  ;;  %vm2613_vm13 = vmor %vm2611_vm5, %vm2612_vm9 }
 0x171   :  { %v2608_v34 = vsub.f32 1.0, %v2607_v30  ;;  %v2667_v50 = vmul.f32 %v4169_v27, %v6238_v10  ;;  %vm2672_vm14 = vweird.f32 %v4169_v27  ;;  %vm2643_vm15 = vmor %vm2641_vm7, %vm2642_vm11 }
 0x172   :  { %v6263_v5 = vpop.f32.mrf.mxu2  ;;  %v2579_v1 = vmul.f32 %v4163_v15, %v2578_v47  ;;  %v2638_v38 = vsub.f32 1.0, %v2637_v31  ;;  %vm2673_vm2 = vmor %vm2671_vm0, %vm2672_vm14  ;;  %v2253_v31 = vadd.f32 %v6234_v3, %v6254_v18 }
 0x173   :  { %v6265_v35 = vpop.f32.mrf.mxu3  ;;  %v6268_v8 = vpop.f32.mrf.mxu0  ;;  %v2609_v13 = vmul.f32 %v4165_v60, %v2608_v34  ;;  %v2668_v55 = vsub.f32 1.0, %v2667_v50  ;;  %v2182_v34 = vadd.f32 %v6219_v48, %v2163_v25 }
 0x174   :  { %v6270_v26 = vpop.f32.mrf.mxu1  ;;  %v2580_v56 = vadd.f32 %v4163_v15, %v2579_v1  ;;  %v2639_v53 = vmul.f32 %v4167_v0, %v2638_v38 }
 0x175   :  { %v2610_v58 = vadd.f32 %v4165_v60, %v2609_v13  ;;  %v2669_v23 = vmul.f32 %v4169_v27, %v2668_v55  ;;  %v2201_v1 = vadd.f32 %v6222_v44, %v2182_v34 }
 0x176   :  { %v2584_v37 = vsel %vm2583_vm12, %v4163_v15, %v2580_v56  ;;  %v2640_v43 = vadd.f32 %v4167_v0, %v2639_v53 }
 0x177   :  { %v2589_v7 = vsel %vm6256_vm6, %v2588_v41, %v2584_v37  ;;  %v2614_v16 = vsel %vm2613_vm13, %v4165_v60, %v2610_v58  ;;  %v2670_v54 = vadd.f32 %v4169_v27, %v2669_v23  ;;  %v2678_v60 = vor.u32 1.1754944e-38, %v2677_v45 }
 0x178   :  { %v2619_v20 = vsel %vm6272_vm10, %v2618_v62, %v2614_v16  ;;  %v2644_v15 = vsel %vm2643_vm15, %v4167_v0, %v2640_v43  ;;  %2696 = vst [vmem:[%s6372_s5] sm:$0xff] %v2589_v7  ;;  %v2198_v0 = vadd.f32 %v6212_v33, %v2179_v32  ;;  %v2272_v41 = vadd.f32 %v6241_v14, %v2253_v31 }
 0x179   :  { %v2649_v6 = vsel %vm2646_vm1, %v2648_v42, %v2644_v15  ;;  %2698 = vst [vmem:[%s6372_s5 + $0x10] sm:$0xff] %v2619_v20  ;;  %v2674_v10 = vsel %vm2673_vm2, %v4169_v27, %v2670_v54  ;;  %v2220_v3 = vadd.f32 %v6224_v9, %v2201_v1  ;;  %v2184_v14 = vadd.f32 %v6228_v59, %v2165_v46 }
 0x17a   :  { %v2276_v51 = vpop.f32.mrf.mxu2  ;;  %2700 = vst [vmem:[%s6372_s5 + $0x20] sm:$0xff] %v2649_v6  ;;  %v2679_v22 = vsel %vm2676_vm3, %v2678_v60, %v2674_v10  ;;  %v2217_v27 = vadd.f32 %v6214_v17, %v2198_v0  ;;  %v2291_v38 = vadd.f32 %v6243_v57, %v2272_v41  ;;  %v2406_v37 = vperm.slane %v6155_v21, 1 }
 0x17b   :  { %v2295_v30 = vpop.f32.mrf.mxu3  ;;  %v2240_v19 = vpop.f32.mrf.mxu0  ;;  %2702 = vst [vmem:[%s6372_s5 + $0x30] sm:$0xff] %v2679_v22  ;;  %v2203_v44 = vadd.f32 %v6230_v63, %v2184_v14 }
 0x17c   :  { %v2259_v47 = vpop.f32.mrf.mxu1  ;;  %v2236_v33 = vadd.f32 %v6247_v12, %v2217_v27  ;;  %v2239_v12 = vadd.f32 %v6268_v8, %v2220_v3 }
 0x17d   :  { %v2222_v9 = vadd.f32 %v6232_v61, %v2203_v44 }
 0x17e   :  { %v2255_v29 = vadd.f32 %v6249_v28, %v2236_v33  ;;  %v2258_v28 = vadd.f32 %v6270_v26, %v2239_v12 }
 0x17f   :  { %v2241_v59 = vadd.f32 %v2240_v19, %v2222_v9 }
 0x180   :  { %v2274_v48 = vadd.f32 %v6263_v5, %v2255_v29  ;;  %v2277_v5 = vadd.f32 %v2276_v51, %v2258_v28 }
 0x182   :  { %v2278_v32 = vpop.f32.mrf.mxu2  ;;  %v2293_v40 = vadd.f32 %v6265_v35, %v2274_v48  ;;  %v2296_v2 = vadd.f32 %v2295_v30, %v2277_v5  ;;  %v2260_v35 = vadd.f32 %v2259_v47, %v2241_v59 }
 0x183   :  { %v2297_v11 = vpop.f32.mrf.mxu3  ;;  %v2309_v50 = vpop.f32.mrf.mxu0 }
 0x184   :  { %v2328_v13 = vpop.f32.mrf.mxu1  ;;  %v2310_v17 = vadd.f32 %v2309_v50, %v2291_v38  ;;  %v2279_v7 = vadd.f32 %v2278_v32, %v2260_v35 }
 0x186   :  { %v2329_v18 = vadd.f32 %v2328_v13, %v2310_v17  ;;  %v2298_v20 = vadd.f32 %v2297_v11, %v2279_v7 }
 0x18a   :  { %v2347_v57 = vpop.f32.mrf.mxu2 }
 0x18b   :  { %v2366_v39 = vpop.f32.mrf.mxu3  ;;  %v2348_v56 = vadd.f32 %v2347_v57, %v2329_v18  ;;  %v2311_v24 = vpop.f32.mrf.mxu0 }
 0x18c   :  { %v2330_v49 = vpop.f32.mrf.mxu1  ;;  %v2312_v53 = vadd.f32 %v2311_v24, %v2293_v40 }
 0x18d   :  { %v2367_v55 = vadd.f32 %v2366_v39, %v2348_v56 }
 0x18e   :  { %v2331_v58 = vadd.f32 %v2330_v49, %v2312_v53 }
 0x18f   :  { %v6324_v26 = vadd.f32 %v2406_v37, %v2367_v55 }
 0x191   :  { %v2445_v21 = vmul.f32 %v6324_v26, %v6324_v26 }
 0x192   :  { %v2349_v8 = vpop.f32.mrf.mxu2 }
 0x193   :  { %v2368_v62 = vpop.f32.mrf.mxu3  ;;  %v2350_v63 = vadd.f32 %v2349_v8, %v2331_v58  ;;  %v2314_v45 = vpop.f32.mrf.mxu0 }
 0x194   :  { %v2315_v23 = vadd.f32 %v2314_v45, %v2296_v2  ;;  %v2333_v16 = vpop.f32.mrf.mxu1 }
 0x195   :  { %v2369_v43 = vadd.f32 %v2368_v62, %v2350_v63 }
 0x196   :  { %v2334_v42 = vadd.f32 %v2333_v16, %v2315_v23 }
 0x197   :  { %v6326_v61 = vadd.f32 %v2406_v37, %v2369_v43  ;;  %v2533_v43 = vperm.slane %v6210_v4, 1 }
 0x199   :  { %v2426_v51 = vadd.f32 %v6326_v61, %v6324_v26  ;;  %v2447_v30 = vmul.f32 %v6326_v61, %v6326_v61 }
 0x19a   :  { %v2352_v15 = vpop.f32.mrf.mxu2 }
 0x19b   :  { %v2371_v54 = vpop.f32.mrf.mxu3  ;;  %v2353_v6 = vadd.f32 %v2352_v15, %v2334_v42  ;;  %v2316_v60 = vpop.f32.mrf.mxu0  ;;  %v2461_v19 = vadd.f32 %v2447_v30, %v2445_v21 }
 0x19c   :  { %v2317_v0 = vadd.f32 %v2316_v60, %v2298_v20  ;;  %v2335_v47 = vpop.f32.mrf.mxu1 }
 0x19d   :  { %v2372_v10 = vadd.f32 %v2371_v54, %v2353_v6 }
 0x19e   :  { %v2336_v22 = vadd.f32 %v2335_v47, %v2317_v0 }
 0x19f   :  { %v2414_v25 = vadd.f32 %v2406_v37, %v2372_v10 }
 0x1a1   :  { %v2427_v41 = vadd.f32 %v2426_v51, %v2414_v25  ;;  %v2449_v34 = vmul.f32 %v2414_v25, %v2414_v25 }
 0x1a2   :  { %v2354_v31 = vpop.f32.mrf.mxu2 }
 0x1a3   :  { %v2355_v27 = vadd.f32 %v2354_v31, %v2336_v22  ;;  %v2373_v33 = vpop.f32.mrf.mxu3  ;;  %v2462_v11 = vadd.f32 %v2461_v19, %v2449_v34 }
 0x1a5   :  { %v2374_v32 = vadd.f32 %v2373_v33, %v2355_v27 }
 0x1a7   :  { %v2416_v1 = vadd.f32 %v2406_v37, %v2374_v32 }
 0x1a9   :  { %v2428_v38 = vadd.f32 %v2427_v41, %v2416_v1  ;;  %v2451_v50 = vmul.f32 %v2416_v1, %v2416_v1 }
 0x1ab   :  { %v2429_v13 = vrot.slane %v2428_v38, 4  ;;  %v2463_v46 = vadd.f32 %v2462_v11, %v2451_v50 }
 0x1ad   :  { %v2430_v29 = vadd.f32 %v2429_v13, %v2428_v38  ;;  %v2464_v17 = vrot.slane %v2463_v46, 4 }
 0x1af   :  { %v2431_v3 = vrot.slane %v2430_v29, 2  ;;  %v2465_v48 = vadd.f32 %v2464_v17, %v2463_v46 }
 0x1b1   :  { %v2432_v14 = vadd.f32 %v2431_v3, %v2430_v29  ;;  %v2466_v12 = vrot.slane %v2465_v48, 2 }
 0x1b3   :  { %v2433_v18 = vrot.slane %v2432_v14, 1  ;;  %v2467_v44 = vadd.f32 %v2466_v12, %v2465_v48 }
 0x1b5   :  { %v2434_v57 = vadd.f32 %v2433_v18, %v2432_v14  ;;  %v2468_v39 = vrot.slane %v2467_v44, 1 }
 0x1b7   :  { %v2443_v40 = vmul.f32 %v6184_v36, %v2434_v57  ;;  %v2469_v56 = vadd.f32 %v2468_v39, %v2467_v44 }
 0x1b9   :  { %v2471_v24 = vmul.f32 %v2469_v56, %v6184_v36  ;;  %v2473_v49 = vmul.f32 %v2443_v40, %v2443_v40  ;;  %v2479_v28 = vsub.f32 %v6324_v26, %v2443_v40  ;;  %v2481_v53 = vsub.f32 %v6326_v61, %v2443_v40 }
 0x1ba   :  { %v2483_v9 = vsub.f32 %v2414_v25, %v2443_v40  ;;  %v2485_v5 = vsub.f32 %v2416_v1, %v2443_v40  ;;  %v2519_v36 = vperm.slane %v6205_v52, 1 }
 0x1bb   :  { %v2475_v55 = vsub.f32 %v2471_v24, %v2473_v49 }
 0x1bd   :  { %v2477_v59 = vmax.f32 %v2475_v55, 0.0 }
 0x1bf   :  { %v2487_v58 = vadd.f32 1e-05, %v2477_v59 }
 0x1c1   :  { %4170 = vrsqrt.f32 %v2487_v58  ;;  %vm2504_vm5 = vweird.f32 %v2487_v58 }
 0x1c7   :  { %v4171_v8 = vpop.eup %4170 }
 0x1c8   :  { %v2499_v62 = vmul.f32 %v4171_v8, %v2487_v58  ;;  %vm2505_vm4 = vweird.f32 %v4171_v8 }
 0x1c9   :  { %vm2506_vm6 = vmor %vm2504_vm5, %vm2505_vm4 }
 0x1ca   :  { %v2500_v2 = vmul.f32 %v4171_v8, %v2499_v62 }
 0x1cc   :  { %v2501_v63 = vmul.f32 0.5, %v2500_v2 }
 0x1ce   :  { %v2502_v45 = vsub.f32 1.5, %v2501_v63 }
 0x1d0   :  { %v2503_v37 = vmul.f32 %v4171_v8, %v2502_v45 }
 0x1d2   :  { %v2507_v35 = vsel %vm2506_vm6, %v4171_v8, %v2503_v37 }
 0x1d3   :  { %v2509_v23 = vmul.f32 %v2507_v35, %v2479_v28  ;;  %v2511_v7 = vmul.f32 %v2507_v35, %v2481_v53  ;;  %v2513_v16 = vmul.f32 %v2507_v35, %v2483_v9  ;;  %v2515_v26 = vmul.f32 %v2507_v35, %v2485_v5 }
 0x1d5   :  { %v2523_v42 = vmul.f32 %v2519_v36, %v2509_v23  ;;  %v2525_v61 = vmul.f32 %v2519_v36, %v2511_v7  ;;  %v2527_v20 = vmul.f32 %v2519_v36, %v2513_v16  ;;  %v2529_v15 = vmul.f32 %v2519_v36, %v2515_v26 }
 0x1d7   :  { %v2537_v54 = vadd.f32 %v2533_v43, %v2523_v42  ;;  %v2539_v6 = vadd.f32 %v2533_v43, %v2525_v61  ;;  %v2541_v60 = vadd.f32 %v2533_v43, %v2527_v20  ;;  %v2543_v51 = vadd.f32 %v2533_v43, %v2529_v15 }
 0x1d9   :  { %v2545_v21 = vsub.f32 0.0, %v2537_v54  ;;  %v2547_v30 = vsub.f32 0.0, %v2539_v6  ;;  %v2549_v10 = vsub.f32 0.0, %v2541_v60  ;;  %v2551_v0 = vsub.f32 0.0, %v2543_v51 }
 0x1db   :  { %v2554_v52 = vmul.f32 1.442695, %v2545_v21  ;;  %v2558_v19 = vmul.f32 1.442695, %v2547_v30  ;;  %v2562_v47 = vmul.f32 1.442695, %v2549_v10 }
 0x1dc   :  { %v2566_v4 = vmul.f32 1.442695, %v2551_v0 }
 0x1dd   :  { %4172 = vpow2.f32 %v2554_v52 }
 0x1de   :  { %4174 = vpow2.f32 %v2558_v19 }
 0x1df   :  { %4176 = vpow2.f32 %v2562_v47 }
 0x1e0   :  { %4178 = vpow2.f32 %v2566_v4 }
 0x1e3   :  { %v4173_v22 = vpop.eup %4172 }
 0x1e4   :  { %v4175_v25 = vpop.eup %4174  ;;  %v2569_v31 = vadd.f32 1.0, %v4173_v22 }
 0x1e5   :  { %v4177_v27 = vpop.eup %4176  ;;  %v2571_v41 = vadd.f32 1.0, %v4175_v25 }
 0x1e6   :  { %v4179_v34 = vpop.eup %4178  ;;  %v2573_v33 = vadd.f32 1.0, %v4177_v27  ;;  %4180 = vrcp.f32 %v2569_v31  ;;  %v2600_v11 = vand.u32 2147483647, %v2569_v31  ;;  %v2602_v38 = vand.u32 2147483648, %v2569_v31 }
 0x1e7   :  { %v2575_v32 = vadd.f32 1.0, %v4179_v34  ;;  %4182 = vrcp.f32 %v2571_v41  ;;  %vm2596_vm7 = vweird.f32 %v2569_v31  ;;  %vm2626_vm8 = vweird.f32 %v2571_v41 }
 0x1e8   :  { %4184 = vrcp.f32 %v2573_v33  ;;  %v2630_v17 = vand.u32 2147483647, %v2571_v41  ;;  %vm6340_vm9 = vcmp.eq.f32.partialorder %v2600_v11, 8.507059e+37  ;;  %v2632_v14 = vand.u32 2147483648, %v2571_v41 }
 0x1e9   :  { %4186 = vrcp.f32 %v2575_v32  ;;  %v2603_v44 = vor.u32 1.1754944e-38, %v2602_v38  ;;  %vm2656_vm10 = vweird.f32 %v2573_v33  ;;  %v2660_v39 = vand.u32 2147483647, %v2573_v33 }
 0x1ea   :  { %vm6344_vm13 = vcmp.eq.f32.partialorder %v2630_v17, 8.507059e+37  ;;  %v2662_v53 = vand.u32 2147483648, %v2573_v33  ;;  %v2633_v58 = vor.u32 1.1754944e-38, %v2632_v14  ;;  %v2690_v8 = vand.u32 2147483647, %v2575_v32 }
 0x1eb   :  { %v2692_v62 = vand.u32 2147483648, %v2575_v32  ;;  %vm2686_vm3 = vweird.f32 %v2575_v32  ;;  %vm2661_vm4 = vcmp.eq.f32.partialorder %v2660_v39, 8.507059e+37 }
 0x1ec   :  { %v4181_v1 = vpop.eup %4180  ;;  %v2663_v35 = vor.u32 1.1754944e-38, %v2662_v53  ;;  %vm2691_vm6 = vcmp.eq.f32.partialorder %v2690_v8, 8.507059e+37 }
 0x1ed   :  { %v4183_v50 = vpop.eup %4182  ;;  %v2592_v13 = vmul.f32 %v4181_v1, %v2569_v31  ;;  %vm2597_vm11 = vweird.f32 %v4181_v1  ;;  %v2693_v26 = vor.u32 1.1754944e-38, %v2692_v62 }
 0x1ee   :  { %v4185_v46 = vpop.eup %4184  ;;  %v2622_v29 = vmul.f32 %v4183_v50, %v2571_v41  ;;  %vm2627_vm12 = vweird.f32 %v4183_v50  ;;  %vm2598_vm15 = vmor %vm2596_vm7, %vm2597_vm11 }
 0x1ef   :  { %v2593_v3 = vsub.f32 1.0, %v2592_v13  ;;  %v2652_v12 = vmul.f32 %v4185_v46, %v2573_v33  ;;  %v4187_v18 = vpop.eup %4186  ;;  %vm2657_vm14 = vweird.f32 %v4185_v46  ;;  %vm2628_vm0 = vmor %vm2626_vm8, %vm2627_vm12 }
 0x1f0   :  { %v2623_v57 = vsub.f32 1.0, %v2622_v29  ;;  %v2682_v24 = vmul.f32 %v4187_v18, %v2575_v32  ;;  %vm2687_vm1 = vweird.f32 %v4187_v18  ;;  %vm2658_vm2 = vmor %vm2656_vm10, %vm2657_vm14 }
 0x1f1   :  { %v2594_v40 = vmul.f32 %v4181_v1, %v2593_v3  ;;  %v2653_v56 = vsub.f32 1.0, %v2652_v12  ;;  %vm2688_vm5 = vmor %vm2686_vm3, %vm2687_vm1 }
 0x1f2   :  { %v2624_v49 = vmul.f32 %v4183_v50, %v2623_v57  ;;  %v2683_v55 = vsub.f32 1.0, %v2682_v24 }
 0x1f3   :  { %v2595_v9 = vadd.f32 %v4181_v1, %v2594_v40  ;;  %v2654_v5 = vmul.f32 %v4185_v46, %v2653_v56 }
 0x1f4   :  { %v2625_v59 = vadd.f32 %v4183_v50, %v2624_v49  ;;  %v2684_v45 = vmul.f32 %v4187_v18, %v2683_v55 }
 0x1f5   :  { %v2599_v2 = vsel %vm2598_vm15, %v4181_v1, %v2595_v9  ;;  %v2655_v63 = vadd.f32 %v4185_v46, %v2654_v5 }
 0x1f6   :  { %v2604_v37 = vsel %vm6340_vm9, %v2603_v44, %v2599_v2  ;;  %v2629_v36 = vsel %vm2628_vm0, %v4183_v50, %v2625_v59  ;;  %v2685_v7 = vadd.f32 %v4187_v18, %v2684_v45 }
 0x1f7   :  { %v2634_v43 = vsel %vm6344_vm13, %v2633_v58, %v2629_v36  ;;  %v2659_v23 = vsel %vm2658_vm2, %v4185_v46, %v2655_v63  ;;  %2697 = vst [vmem:[%s6372_s5 + $0x8] sm:$0xff] %v2604_v37 }
 0x1f8   :  { %v2664_v16 = vsel %vm2661_vm4, %v2663_v35, %v2659_v23  ;;  %2699 = vst [vmem:[%s6372_s5 + $0x18] sm:$0xff] %v2634_v43  ;;  %v2689_v42 = vsel %vm2688_vm5, %v4187_v18, %v2685_v7 }
 0x1f9   :  { %2701 = vst [vmem:[%s6372_s5 + $0x28] sm:$0xff] %v2664_v16  ;;  %v2694_v61 = vsel %vm2691_vm6, %v2693_v26, %v2689_v42 }
 0x1fa   :  { %2703 = vst [vmem:[%s6372_s5 + $0x38] sm:$0xff] %v2694_v61 }

</bundles_post_ra>
